<compile_context>
chip_gen: v5e
topology: v5e:2x2
jax: 0.10.0
libtpu: 0.0.40
codegen_flags: <defaults>
</compile_context>

<pallas_src>
import functools

import jax
import jax.numpy as jnp
from jax.experimental import pallas as pl
from jax.experimental.pallas import tpu as pltpu


# ----------------------------------------------------------------------------
# One fused kernel: the whole decoder stack for one batch element per grid step
# ----------------------------------------------------------------------------

def fused_decoder_kernel(x_ref, enc_ref, tgt_bias_ref, src_bias_ref,
                         wqkv_ref, wo_ref, bo_ref, ln_g_ref, ln_b_ref,
                         ffw1_ref, ffb1_ref, ffw2_ref, ffb2_ref,
                         fcw_ref, fcb_ref, o_ref, *, heads, num_layers):
    S = x_ref.shape[1]
    E = x_ref.shape[2]
    hd = E // heads
    inv_scale = 1.0 / (float(E) ** 0.5)     # reference divides by sqrt(embed_size)

    x = x_ref[0].astype(jnp.float32)        # (S, E)
    tgt_bias = tgt_bias_ref[0]              # (S, S) f32, mask + scale pre-folded
    src_bias = src_bias_ref[0]              # (S, S) f32

    def split_heads(t):
        # (S, E) f32 -> (heads*S, hd) f32, head-major rows.  Uses only lane
        # slices + a sublane concat (one relayout per input, not 3*heads);
        # a minor-dim split reshape (S,E)->(S,heads,hd) is deliberately avoided.
        return jnp.concatenate([t[:, h * hd:(h + 1) * hd] for h in range(heads)],
                               axis=0)

    # Encoder activations: head-split + bf16 cast hoisted ONCE for all layers.
    enc2 = split_heads(enc_ref[0].astype(jnp.float32)).astype(jnp.bfloat16)

    def attention(q2_bf, kv2_bf, bias, a):
        # q2_bf / kv2_bf: (heads*S, hd) bf16, head-major rows (already cast).
        wq = wqkv_ref[3 * a + 0]            # (hd, hd) bf16, [in, out]
        wk = wqkv_ref[3 * a + 1]
        wv = wqkv_ref[3 * a + 2]
        # Shared per-head projections: single 2-D dots (no block-diag weights).
        q = (jnp.dot(q2_bf, wq, preferred_element_type=jnp.float32) * inv_scale
             ).reshape(heads, S, hd).astype(jnp.bfloat16)      # tile-aligned split
        k = jnp.dot(kv2_bf, wk, preferred_element_type=jnp.float32
                    ).reshape(heads, S, hd).astype(jnp.bfloat16)
        v = jnp.dot(kv2_bf, wv, preferred_element_type=jnp.float32
                    ).reshape(heads, S, hd).astype(jnp.bfloat16)
        # Head-batched scores / context (one dot_general each).
        scores = jnp.einsum("hqd,hkd->hqk", q, k,
                            preferred_element_type=jnp.float32) + bias   # (H,S,S)
        m = jnp.max(scores, axis=-1, keepdims=True)
        p = jnp.exp(scores - m)
        att = p * pl.reciprocal(jnp.sum(p, axis=-1, keepdims=True), approx=True)
        ctx = jnp.einsum("hqk,hkd->hqd", att.astype(jnp.bfloat16), v,
                         preferred_element_type=jnp.float32)             # (H,S,hd)
        # Output projection directly from head-major context: batched matmul
        # against wo reshaped to (heads, hd, E) in the wrapper, then sum over
        # heads.  Equivalent to concat(ctx) @ Wo but with no per-head concat.
        per_head = jnp.einsum("hqd,hdf->hqf", ctx.astype(jnp.bfloat16), wo_ref[a],
                              preferred_element_type=jnp.float32)        # (H,S,E)
        return jnp.sum(per_head, axis=0) + bo_ref[a]                      # (S,E)

    def ln_res(a_act, b_act, i):
        # LayerNorm(a + b), eps = 1e-5 (PyTorch default), f32 math.
        y = a_act + b_act
        mean = jnp.mean(y, axis=-1, keepdims=True)
        var = jnp.mean(jnp.square(y - mean), axis=-1, keepdims=True)
        yn = (y - mean) * jax.lax.rsqrt(var + 1e-5)
        return yn * ln_g_ref[i] + ln_b_ref[i]

    def ffn(h, l):
        z = jnp.dot(h.astype(jnp.bfloat16), ffw1_ref[l],
                    preferred_element_type=jnp.float32) + ffb1_ref[l]
        z = jnp.maximum(z, 0.0)
        return jnp.dot(z.astype(jnp.bfloat16), ffw2_ref[l],
                       preferred_element_type=jnp.float32) + ffb2_ref[l]

    for l in range(num_layers):                     # static unroll over layers
        x2 = split_heads(x).astype(jnp.bfloat16)    # one split + one cast per layer
        att = attention(x2, x2, tgt_bias, 2 * l + 0)            # masked self-attn
        query = ln_res(att, x, 3 * l + 0)
        q2 = split_heads(query).astype(jnp.bfloat16)
        att2 = attention(q2, enc2, src_bias, 2 * l + 1)         # cross-attention
        h = ln_res(att2, query, 3 * l + 1)
        x = ln_res(ffn(h, l), h, 3 * l + 2)

    # Final vocab projection — Vp is padded to a multiple of 128 (lane-dense store).
    logits = jnp.dot(x.astype(jnp.bfloat16), fcw_ref[...],
                     preferred_element_type=jnp.float32) + fcb_ref[...]
    o_ref[0] = logits.astype(o_ref.dtype)


# ----------------------------------------------------------------------------
# Wrapper: single pallas_call for the whole decoder
# ----------------------------------------------------------------------------

def _const_spec(shape, pipeline_mode):
    ndim = len(shape)
    index_map = lambda n: (0,) * ndim
    if pipeline_mode is None:
        return pl.BlockSpec(shape, index_map)
    return pl.BlockSpec(shape, index_map, pipeline_mode=pipeline_mode)


def _vmem_limit_bytes(packed, S, E, Vp):
    wkeys = ("wqkv", "wo", "bo", "ln_g", "ln_b",
             "ffw1", "ffb1", "ffw2", "ffb2", "fc_w", "fc_b")
    wbytes = sum(int(packed[k].size) * packed[k].dtype.itemsize for k in wkeys)
    io = 4 * (2 * S * E + 2 * S * S + S * Vp)      # per-step f32 blocks
    limit = 2 * (wbytes + 2 * io) + (8 << 20)      # worst-case double-buffer + headroom
    return int(min(max(limit, 16 << 20), 48 << 20))   # stay under v7x physical VMEM


def _build_call(packed, N, S, E, Vp, weight_pipeline_mode, vmem_limit):
    L = packed["num_layers"]
    heads = packed["heads"]
    hd = E // heads
    Hff = packed["ffw1"].shape[2]
    kernel = functools.partial(fused_decoder_kernel, heads=heads, num_layers=L)
    in_specs = [
        pl.BlockSpec((1, S, E), lambda n: (n, 0, 0)),     # embedded tokens
        pl.BlockSpec((1, S, E), lambda n: (n, 0, 0)),     # encoder output
        pl.BlockSpec((1, S, S), lambda n: (n, 0, 0)),     # tgt additive bias (f32)
        pl.BlockSpec((1, S, S), lambda n: (n, 0, 0)),     # src additive bias (f32)
        _const_spec((6 * L, hd, hd), weight_pipeline_mode),     # q/k/v shared weights
        _const_spec((2 * L, heads, hd, E), weight_pipeline_mode),  # fc_out W, head-major
        _const_spec((2 * L, 1, E), weight_pipeline_mode),        # fc_out bias
        _const_spec((3 * L, 1, E), weight_pipeline_mode),        # LN gamma
        _const_spec((3 * L, 1, E), weight_pipeline_mode),        # LN beta
        _const_spec((L, E, Hff), weight_pipeline_mode),          # ff w1 [in,out]
        _const_spec((L, 1, Hff), weight_pipeline_mode),          # ff b1
        _const_spec((L, Hff, E), weight_pipeline_mode),          # ff w2 [in,out]
        _const_spec((L, 1, E), weight_pipeline_mode),            # ff b2
        _const_spec((E, Vp), weight_pipeline_mode),              # fc_out W (padded)
        _const_spec((1, Vp), weight_pipeline_mode),              # fc_out b (padded)
    ]
    return pl.pallas_call(
        kernel,
        out_shape=jax.ShapeDtypeStruct((N, S, Vp), jnp.float32),
        grid=(N,),
        in_specs=in_specs,
        out_specs=pl.BlockSpec((1, S, Vp), lambda n: (n, 0, 0)),
        compiler_params=pltpu.CompilerParams(
            dimension_semantics=("parallel",),           # batch over v7x TCs
            vmem_limit_bytes=vmem_limit),
    )


def decoder_forward(packed, tokens, enc_out, src_mask, tgt_mask):
    L = packed["num_layers"]
    N, S = tokens.shape
    E = packed["word_emb"].shape[1]
    V = packed["vocab"]
    Vp = packed["fc_b"].shape[1]
    assert S <= packed["pos_emb"].shape[0]   # reference pos-embedding table size

    # Embedding gathers stay in plain JAX (no clean rectangular BlockSpec gather).
    x = (packed["word_emb"][tokens]
         + packed["pos_emb"][jnp.arange(S)][None, :, :]).astype(jnp.float32)

    # Mask -> additive bias in the wrapper, with the 1/sqrt(E) scale folded in
    # (kernel adds it to already-scaled scores; no per-step compare/select).
    inv_scale = 1.0 / (float(E) ** 0.5)
    neg = jnp.float32(-1e20 * inv_scale)
    tgt_bias = jnp.where(tgt_mask == 0, neg, jnp.float32(0.0)).astype(jnp.float32)
    src_bias = jnp.where(src_mask == 0, neg, jnp.float32(0.0)).astype(jnp.float32)

    args = (x, enc_out.astype(jnp.float32), tgt_bias, src_bias,
            packed["wqkv"], packed["wo"], packed["bo"],
            packed["ln_g"], packed["ln_b"],
            packed["ffw1"], packed["ffb1"], packed["ffw2"], packed["ffb2"],
            packed["fc_w"], packed["fc_b"])

    vmem_limit = _vmem_limit_bytes(packed, S, E, Vp)
    try:
        # Constant-index weight blocks never change -> request single buffering.
        out_p = jax.block_until_ready(
            _build_call(packed, N, S, E, Vp, pl.Buffered(1), vmem_limit)(*args))
    except Exception:
        # Fallback: default double-buffered weight blocks (always supported).
        out_p = _build_call(packed, N, S, E, Vp, None, vmem_limit)(*args)

    return out_p[..., :V]   # drop the lane-padding of the vocab dim


# ----------------------------------------------------------------------------
# Parameter init (PyTorch conventions) + one-time packing for the kernel
# ----------------------------------------------------------------------------

def init_params(key, vocab, embed, num_layers, heads, fwd_expansion):
    hd = embed // heads
    hidden = fwd_expansion * embed
    kit = iter(jax.random.split(key, 64))

    def w(shape, scale=0.02):
        return (scale * jax.random.normal(next(kit), shape)).astype(jnp.float32)

    def attn_params():
        return dict(wq=w((hd, hd)), wk=w((hd, hd)), wv=w((hd, hd)),
                    wo=w((embed, embed)), bo=jnp.zeros((1, embed), jnp.float32))

    def ln_params():
        return dict(g=jnp.ones((1, embed), jnp.float32),
                    b=jnp.zeros((1, embed), jnp.float32))

    layers = []
    for _ in range(num_layers):
        layers.append(dict(
            sa=attn_params(),            # DecoderBlock.attention
            norm=ln_params(),            # DecoderBlock.norm
            tb_attn=attn_params(),       # TransformerBlock.attention
            norm1=ln_params(), norm2=ln_params(),
            ff=dict(w1=w((hidden, embed)), b1=jnp.zeros((1, hidden), jnp.float32),
                    w2=w((embed, hidden)), b2=jnp.zeros((1, embed), jnp.float32)),
        ))

    return dict(
        word_emb=w((vocab, embed), 1.0),
        pos_emb=w((embed, embed), 1.0),   # nn.Embedding(embed_size, embed_size)
        layers=layers,
        fc_w=w((vocab, embed)),
        fc_b=jnp.zeros((1, vocab), jnp.float32),
    )


def pack_params(params, heads):
    """One-time repack: [in,out] layouts, head-major fc_out weights, bf16 matmul
    weights, lane-padded vocab projection.  No block-diagonal expansion."""
    L = len(params["layers"])
    E = params["word_emb"].shape[1]
    hd = E // heads

    wqkv, wo, bo, ln_g, ln_b = [], [], [], [], []
    ffw1, ffb1, ffw2, ffb2 = [], [], [], []
    for lp in params["layers"]:
        for attn in (lp["sa"], lp["tb_attn"]):
            # shared per-head (hd,hd) weights, PyTorch [out,in] -> [in,out]
            wqkv += [attn["wq"].T, attn["wk"].T, attn["wv"].T]
            # fc_out weight -> [in,out], reshaped head-major so the kernel can
            # consume per-head context without a concat.
            wo.append(attn["wo"].T.reshape(heads, hd, E))
            bo.append(attn["bo"])
        for nm in (lp["norm"], lp["norm1"], lp["norm2"]):
            ln_g.append(nm["g"])
            ln_b.append(nm["b"])
        ffw1.append(lp["ff"]["w1"].T)
        ffb1.append(lp["ff"]["b1"])
        ffw2.append(lp["ff"]["w2"].T)
        ffb2.append(lp["ff"]["b2"])

    V = params["fc_w"].shape[0]
    Vp = ((V + 127) // 128) * 128                       # lane-dense output padding
    fc_w = jnp.pad(params["fc_w"].T, ((0, 0), (0, Vp - V)))   # (E, Vp)
    fc_b = jnp.pad(params["fc_b"], ((0, 0), (0, Vp - V)))     # (1, Vp)

    return dict(
        wqkv=jnp.stack(wqkv).astype(jnp.bfloat16),    # (6L, hd, hd)
        wo=jnp.stack(wo).astype(jnp.bfloat16),        # (2L, heads, hd, E)
        bo=jnp.stack(bo),                             # (2L, 1, E) f32
        ln_g=jnp.stack(ln_g),                         # (3L, 1, E) f32
        ln_b=jnp.stack(ln_b),                         # (3L, 1, E) f32
        ffw1=jnp.stack(ffw1).astype(jnp.bfloat16),    # (L, E, H)
        ffb1=jnp.stack(ffb1),                         # (L, 1, H) f32
        ffw2=jnp.stack(ffw2).astype(jnp.bfloat16),    # (L, H, E)
        ffb2=jnp.stack(ffb2),                         # (L, 1, E) f32
        fc_w=fc_w.astype(jnp.bfloat16),               # (E, Vp)
        fc_b=fc_b,                                    # (1, Vp) f32
        word_emb=params["word_emb"],
        pos_emb=params["pos_emb"],
        num_layers=L,
        heads=heads,
        vocab=V,
    )


# ----------------------------------------------------------------------------
# Main
# ----------------------------------------------------------------------------

if __name__ == "__main__":
    TGT_VOCAB = 16
    EMBED = 32
    NUM_LAYERS = 2
    HEADS = 4
    FWD_EXPANSION = 2
    N, S = 2, 8           # batch, target / source sequence length

    key = jax.random.PRNGKey(0)
    pkey, tkey, ekey = jax.random.split(key, 3)

    params = init_params(pkey, TGT_VOCAB, EMBED, NUM_LAYERS, HEADS, FWD_EXPANSION)
    packed = pack_params(params, HEADS)

    tokens = jax.random.randint(tkey, (N, S), 0, TGT_VOCAB)            # (N, S) int32
    enc_out = jax.random.normal(ekey, (N, S, EMBED), jnp.float32)      # (N, S, E)
    tgt_mask = jnp.tril(jnp.ones((N, S, S), jnp.int32))                # causal
    src_mask = jnp.ones((N, S, S), jnp.int32)                          # no masking

    out = decoder_forward(packed, tokens, enc_out, src_mask, tgt_mask)
    out = jax.block_until_ready(out)

    assert out.shape == (N, S, TGT_VOCAB), out.shape
    assert bool(jnp.all(jnp.isfinite(out)))
    print("KERNEL_OK")
</pallas_src>

<mosaic_0001>
module attributes {stable_mosaic.version = 11 : i64} {
  func.func @fused_decoder_kernel(%arg0: i32, %arg1: memref<1x8x32xf32, #tpu.memory_space<vmem>>, %arg2: memref<1x8x32xf32, #tpu.memory_space<vmem>>, %arg3: memref<1x8x8xf32, #tpu.memory_space<vmem>>, %arg4: memref<1x8x8xf32, #tpu.memory_space<vmem>>, %arg5: memref<12x8x8xbf16, #tpu.memory_space<vmem>>, %arg6: memref<4x4x8x32xbf16, #tpu.memory_space<vmem>>, %arg7: memref<4x1x32xf32, #tpu.memory_space<vmem>>, %arg8: memref<6x1x32xf32, #tpu.memory_space<vmem>>, %arg9: memref<6x1x32xf32, #tpu.memory_space<vmem>>, %arg10: memref<2x32x64xbf16, #tpu.memory_space<vmem>>, %arg11: memref<2x1x64xf32, #tpu.memory_space<vmem>>, %arg12: memref<2x64x32xbf16, #tpu.memory_space<vmem>>, %arg13: memref<2x1x32xf32, #tpu.memory_space<vmem>>, %arg14: memref<32x128xbf16, #tpu.memory_space<vmem>>, %arg15: memref<1x128xf32, #tpu.memory_space<vmem>>, %arg16: memref<1x8x128xf32, #tpu.memory_space<vmem>>) attributes {dimension_semantics = [#tpu.dimension_semantics<parallel>], iteration_bounds = array<i64: 2>, scalar_prefetch = 0 : i64, scratch_operands = 0 : i64, tpu.core_type = #tpu.core_type<tc>, window_params = [{transform_indices = @transform_0, window_bounds = array<i64: 1, 8, 32>}, {transform_indices = @transform_1, window_bounds = array<i64: 1, 8, 32>}, {transform_indices = @transform_2, window_bounds = array<i64: 1, 8, 8>}, {transform_indices = @transform_3, window_bounds = array<i64: 1, 8, 8>}, {pipeline_mode = #tpu.pipeline_mode<synchronous>, transform_indices = @transform_4, window_bounds = array<i64: 12, 8, 8>}, {pipeline_mode = #tpu.pipeline_mode<synchronous>, transform_indices = @transform_5, window_bounds = array<i64: 4, 4, 8, 32>}, {pipeline_mode = #tpu.pipeline_mode<synchronous>, transform_indices = @transform_6, window_bounds = array<i64: 4, 1, 32>}, {pipeline_mode = #tpu.pipeline_mode<synchronous>, transform_indices = @transform_7, window_bounds = array<i64: 6, 1, 32>}, {pipeline_mode = #tpu.pipeline_mode<synchronous>, transform_indices = @transform_8, window_bounds = array<i64: 6, 1, 32>}, {pipeline_mode = #tpu.pipeline_mode<synchronous>, transform_indices = @transform_9, window_bounds = array<i64: 2, 32, 64>}, {pipeline_mode = #tpu.pipeline_mode<synchronous>, transform_indices = @transform_10, window_bounds = array<i64: 2, 1, 64>}, {pipeline_mode = #tpu.pipeline_mode<synchronous>, transform_indices = @transform_11, window_bounds = array<i64: 2, 64, 32>}, {pipeline_mode = #tpu.pipeline_mode<synchronous>, transform_indices = @transform_12, window_bounds = array<i64: 2, 1, 32>}, {pipeline_mode = #tpu.pipeline_mode<synchronous>, transform_indices = @transform_13, window_bounds = array<i64: 32, 128>}, {pipeline_mode = #tpu.pipeline_mode<synchronous>, transform_indices = @transform_14, window_bounds = array<i64: 1, 128>}, {transform_indices = @transform_15, window_bounds = array<i64: 1, 8, 128>}]} {
    %c0 = arith.constant 0 : index
    %c0_0 = arith.constant 0 : index
    %c0_1 = arith.constant 0 : index
    %0 = vector.load %arg1[%c0, %c0_0, %c0_1] : memref<1x8x32xf32, #tpu.memory_space<vmem>>, vector<1x8x32xf32>
    %1 = vector.shape_cast %0 : vector<1x8x32xf32> to vector<8x32xf32>
    %c0_2 = arith.constant 0 : index
    %c0_3 = arith.constant 0 : index
    %c0_4 = arith.constant 0 : index
    %2 = vector.load %arg3[%c0_2, %c0_3, %c0_4] : memref<1x8x8xf32, #tpu.memory_space<vmem>>, vector<1x8x8xf32>
    %3 = vector.shape_cast %2 : vector<1x8x8xf32> to vector<8x8xf32>
    %c0_5 = arith.constant 0 : index
    %c0_6 = arith.constant 0 : index
    %c0_7 = arith.constant 0 : index
    %4 = vector.load %arg4[%c0_5, %c0_6, %c0_7] : memref<1x8x8xf32, #tpu.memory_space<vmem>>, vector<1x8x8xf32>
    %5 = vector.shape_cast %4 : vector<1x8x8xf32> to vector<8x8xf32>
    %c0_8 = arith.constant 0 : index
    %c0_9 = arith.constant 0 : index
    %c0_10 = arith.constant 0 : index
    %6 = vector.load %arg2[%c0_8, %c0_9, %c0_10] : memref<1x8x32xf32, #tpu.memory_space<vmem>>, vector<1x8x32xf32>
    %7 = vector.shape_cast %6 : vector<1x8x32xf32> to vector<8x32xf32>
    %8 = vector.extract_strided_slice %7 {offsets = [0, 0], sizes = [8, 8], strides = [1, 1]} : vector<8x32xf32> to vector<8x8xf32>
    %9 = vector.extract_strided_slice %7 {offsets = [0, 8], sizes = [8, 8], strides = [1, 1]} : vector<8x32xf32> to vector<8x8xf32>
    %10 = vector.extract_strided_slice %7 {offsets = [0, 16], sizes = [8, 8], strides = [1, 1]} : vector<8x32xf32> to vector<8x8xf32>
    %11 = vector.extract_strided_slice %7 {offsets = [0, 24], sizes = [8, 8], strides = [1, 1]} : vector<8x32xf32> to vector<8x8xf32>
    %12 = tpu.concatenate %8, %9, %10, %11 in 0 : vector<8x8xf32>, vector<8x8xf32>, vector<8x8xf32>, vector<8x8xf32> -> vector<32x8xf32>
    %13 = arith.truncf %12 : vector<32x8xf32> to vector<32x8xbf16>
    %14 = vector.extract_strided_slice %1 {offsets = [0, 0], sizes = [8, 8], strides = [1, 1]} : vector<8x32xf32> to vector<8x8xf32>
    %15 = vector.extract_strided_slice %1 {offsets = [0, 8], sizes = [8, 8], strides = [1, 1]} : vector<8x32xf32> to vector<8x8xf32>
    %16 = vector.extract_strided_slice %1 {offsets = [0, 16], sizes = [8, 8], strides = [1, 1]} : vector<8x32xf32> to vector<8x8xf32>
    %17 = vector.extract_strided_slice %1 {offsets = [0, 24], sizes = [8, 8], strides = [1, 1]} : vector<8x32xf32> to vector<8x8xf32>
    %18 = tpu.concatenate %14, %15, %16, %17 in 0 : vector<8x8xf32>, vector<8x8xf32>, vector<8x8xf32>, vector<8x8xf32> -> vector<32x8xf32>
    %19 = arith.truncf %18 : vector<32x8xf32> to vector<32x8xbf16>
    %c0_11 = arith.constant 0 : index
    %c0_12 = arith.constant 0 : index
    %c0_13 = arith.constant 0 : index
    %20 = vector.load %arg5[%c0_11, %c0_12, %c0_13] : memref<12x8x8xbf16, #tpu.memory_space<vmem>>, vector<1x8x8xbf16>
    %21 = vector.shape_cast %20 : vector<1x8x8xbf16> to vector<8x8xbf16>
    %c1 = arith.constant 1 : index
    %c0_14 = arith.constant 0 : index
    %c0_15 = arith.constant 0 : index
    %22 = vector.load %arg5[%c1, %c0_14, %c0_15] : memref<12x8x8xbf16, #tpu.memory_space<vmem>>, vector<1x8x8xbf16>
    %23 = vector.shape_cast %22 : vector<1x8x8xbf16> to vector<8x8xbf16>
    %c2 = arith.constant 2 : index
    %c0_16 = arith.constant 0 : index
    %c0_17 = arith.constant 0 : index
    %24 = vector.load %arg5[%c2, %c0_16, %c0_17] : memref<12x8x8xbf16, #tpu.memory_space<vmem>>, vector<1x8x8xbf16>
    %25 = vector.shape_cast %24 : vector<1x8x8xbf16> to vector<8x8xbf16>
    %cst = arith.constant dense<0.000000e+00> : vector<32x8xf32>
    %26 = tpu.matmul %19, %21, %cst {dimension_numbers = #tpu.dot_dimension_numbers<[1], [0], [0], [1], [0, 0, 1, 1], [], []>} : vector<32x8xbf16>, vector<8x8xbf16>, vector<32x8xf32> -> vector<32x8xf32>
    %cst_18 = arith.constant 0.176776692 : f32
    %27 = vector.broadcast %cst_18 : f32 to vector<32x8xf32>
    %28 = arith.mulf %26, %27 : vector<32x8xf32>
    %29 = vector.shape_cast %28 : vector<32x8xf32> to vector<4x8x8xf32>
    %30 = arith.truncf %29 : vector<4x8x8xf32> to vector<4x8x8xbf16>
    %cst_19 = arith.constant dense<0.000000e+00> : vector<32x8xf32>
    %31 = tpu.matmul %19, %23, %cst_19 {dimension_numbers = #tpu.dot_dimension_numbers<[1], [0], [0], [1], [0, 0, 1, 1], [], []>} : vector<32x8xbf16>, vector<8x8xbf16>, vector<32x8xf32> -> vector<32x8xf32>
    %32 = vector.shape_cast %31 : vector<32x8xf32> to vector<4x8x8xf32>
    %33 = arith.truncf %32 : vector<4x8x8xf32> to vector<4x8x8xbf16>
    %cst_20 = arith.constant dense<0.000000e+00> : vector<32x8xf32>
    %34 = tpu.matmul %19, %25, %cst_20 {dimension_numbers = #tpu.dot_dimension_numbers<[1], [0], [0], [1], [0, 0, 1, 1], [], []>} : vector<32x8xbf16>, vector<8x8xbf16>, vector<32x8xf32> -> vector<32x8xf32>
    %35 = vector.shape_cast %34 : vector<32x8xf32> to vector<4x8x8xf32>
    %36 = arith.truncf %35 : vector<4x8x8xf32> to vector<4x8x8xbf16>
    "tpu.trace_start"() <{level = 10 : i32, message = "hqd,hkd->hqk"}> : () -> ()
    %cst_21 = arith.constant dense<0.000000e+00> : vector<4x8x8xf32>
    %37 = tpu.matmul %30, %33, %cst_21 {dimension_numbers = #tpu.dot_dimension_numbers<[2], [2], [1], [1], [0, 0, 0, 1, 1, 1], [0], [0]>} : vector<4x8x8xbf16>, vector<4x8x8xbf16>, vector<4x8x8xf32> -> vector<4x8x8xf32>
    "tpu.trace_stop"() : () -> ()
    %38 = vector.shape_cast %3 : vector<8x8xf32> to vector<1x8x8xf32>
    %39 = vector.broadcast %38 : vector<1x8x8xf32> to vector<4x8x8xf32>
    %40 = arith.addf %37, %39 : vector<4x8x8xf32>
    %cst_22 = arith.constant dense<0xFF800000> : vector<4x8xf32>
    %41 = vector.multi_reduction <maximumf>, %40, %cst_22 [2] : vector<4x8x8xf32> to vector<4x8xf32>
    %42 = vector.shape_cast %41 : vector<4x8xf32> to vector<4x8x1xf32>
    %43 = vector.broadcast %42 : vector<4x8x1xf32> to vector<4x8x8xf32>
    %44 = arith.subf %40, %43 : vector<4x8x8xf32>
    %45 = math.exp %44 : vector<4x8x8xf32>
    %cst_23 = arith.constant dense<0.000000e+00> : vector<4x8xf32>
    %46 = vector.multi_reduction <add>, %45, %cst_23 [2] : vector<4x8x8xf32> to vector<4x8xf32>
    %47 = vector.shape_cast %46 : vector<4x8xf32> to vector<4x8x1xf32>
    %48 = tpu.reciprocal %47 {approx = true} : vector<4x8x1xf32> -> vector<4x8x1xf32>
    %49 = vector.broadcast %48 : vector<4x8x1xf32> to vector<4x8x8xf32>
    %50 = arith.mulf %45, %49 : vector<4x8x8xf32>
    %51 = arith.truncf %50 : vector<4x8x8xf32> to vector<4x8x8xbf16>
    "tpu.trace_start"() <{level = 10 : i32, message = "hqk,hkd->hqd"}> : () -> ()
    %cst_24 = arith.constant dense<0.000000e+00> : vector<4x8x8xf32>
    %52 = tpu.matmul %51, %36, %cst_24 {dimension_numbers = #tpu.dot_dimension_numbers<[2], [1], [1], [2], [0, 0, 0, 1, 1, 2], [0], [0]>} : vector<4x8x8xbf16>, vector<4x8x8xbf16>, vector<4x8x8xf32> -> vector<4x8x8xf32>
    "tpu.trace_stop"() : () -> ()
    %53 = arith.truncf %52 : vector<4x8x8xf32> to vector<4x8x8xbf16>
    %c0_25 = arith.constant 0 : index
    %c0_26 = arith.constant 0 : index
    %c0_27 = arith.constant 0 : index
    %c0_28 = arith.constant 0 : index
    %54 = vector.load %arg6[%c0_25, %c0_26, %c0_27, %c0_28] : memref<4x4x8x32xbf16, #tpu.memory_space<vmem>>, vector<1x4x8x32xbf16>
    %55 = vector.shape_cast %54 : vector<1x4x8x32xbf16> to vector<4x8x32xbf16>
    "tpu.trace_start"() <{level = 10 : i32, message = "hqd,hdf->hqf"}> : () -> ()
    %cst_29 = arith.constant dense<0.000000e+00> : vector<4x8x32xf32>
    %56 = tpu.matmul %53, %55, %cst_29 {dimension_numbers = #tpu.dot_dimension_numbers<[2], [1], [1], [2], [0, 0, 0, 1, 1, 2], [0], [0]>} : vector<4x8x8xbf16>, vector<4x8x32xbf16>, vector<4x8x32xf32> -> vector<4x8x32xf32>
    "tpu.trace_stop"() : () -> ()
    %cst_30 = arith.constant dense<0.000000e+00> : vector<8x32xf32>
    %57 = vector.multi_reduction <add>, %56, %cst_30 [0] : vector<4x8x32xf32> to vector<8x32xf32>
    %c0_31 = arith.constant 0 : index
    %c0_32 = arith.constant 0 : index
    %c0_33 = arith.constant 0 : index
    %58 = vector.load %arg7[%c0_31, %c0_32, %c0_33] : memref<4x1x32xf32, #tpu.memory_space<vmem>>, vector<1x1x32xf32>
    %59 = vector.shape_cast %58 : vector<1x1x32xf32> to vector<1x32xf32>
    %60 = vector.broadcast %59 : vector<1x32xf32> to vector<8x32xf32>
    %61 = arith.addf %57, %60 : vector<8x32xf32>
    %62 = arith.addf %61, %1 : vector<8x32xf32>
    %cst_34 = arith.constant dense<0.000000e+00> : vector<8xf32>
    %63 = vector.multi_reduction <add>, %62, %cst_34 [1] : vector<8x32xf32> to vector<8xf32>
    %64 = vector.shape_cast %63 : vector<8xf32> to vector<8x1xf32>
    %cst_35 = arith.constant 3.200000e+01 : f32
    %65 = vector.broadcast %cst_35 : f32 to vector<8x1xf32>
    %66 = arith.divf %64, %65 : vector<8x1xf32>
    %67 = vector.broadcast %66 : vector<8x1xf32> to vector<8x32xf32>
    %68 = arith.subf %62, %67 : vector<8x32xf32>
    %69 = arith.mulf %68, %68 : vector<8x32xf32>
    %cst_36 = arith.constant dense<0.000000e+00> : vector<8xf32>
    %70 = vector.multi_reduction <add>, %69, %cst_36 [1] : vector<8x32xf32> to vector<8xf32>
    %71 = vector.shape_cast %70 : vector<8xf32> to vector<8x1xf32>
    %cst_37 = arith.constant 3.200000e+01 : f32
    %72 = vector.broadcast %cst_37 : f32 to vector<8x1xf32>
    %73 = arith.divf %71, %72 : vector<8x1xf32>
    %74 = vector.broadcast %66 : vector<8x1xf32> to vector<8x32xf32>
    %75 = arith.subf %62, %74 : vector<8x32xf32>
    %cst_38 = arith.constant 9.99999974E-6 : f32
    %76 = vector.broadcast %cst_38 : f32 to vector<8x1xf32>
    %77 = arith.addf %73, %76 : vector<8x1xf32>
    %78 = math.rsqrt %77 : vector<8x1xf32>
    %79 = vector.broadcast %78 : vector<8x1xf32> to vector<8x32xf32>
    %80 = arith.mulf %75, %79 : vector<8x32xf32>
    %c0_39 = arith.constant 0 : index
    %c0_40 = arith.constant 0 : index
    %c0_41 = arith.constant 0 : index
    %81 = vector.load %arg8[%c0_39, %c0_40, %c0_41] : memref<6x1x32xf32, #tpu.memory_space<vmem>>, vector<1x1x32xf32>
    %82 = vector.shape_cast %81 : vector<1x1x32xf32> to vector<1x32xf32>
    %83 = vector.broadcast %82 : vector<1x32xf32> to vector<8x32xf32>
    %84 = arith.mulf %80, %83 : vector<8x32xf32>
    %c0_42 = arith.constant 0 : index
    %c0_43 = arith.constant 0 : index
    %c0_44 = arith.constant 0 : index
    %85 = vector.load %arg9[%c0_42, %c0_43, %c0_44] : memref<6x1x32xf32, #tpu.memory_space<vmem>>, vector<1x1x32xf32>
    %86 = vector.shape_cast %85 : vector<1x1x32xf32> to vector<1x32xf32>
    %87 = vector.broadcast %86 : vector<1x32xf32> to vector<8x32xf32>
    %88 = arith.addf %84, %87 : vector<8x32xf32>
    %89 = vector.extract_strided_slice %88 {offsets = [0, 0], sizes = [8, 8], strides = [1, 1]} : vector<8x32xf32> to vector<8x8xf32>
    %90 = vector.extract_strided_slice %88 {offsets = [0, 8], sizes = [8, 8], strides = [1, 1]} : vector<8x32xf32> to vector<8x8xf32>
    %91 = vector.extract_strided_slice %88 {offsets = [0, 16], sizes = [8, 8], strides = [1, 1]} : vector<8x32xf32> to vector<8x8xf32>
    %92 = vector.extract_strided_slice %88 {offsets = [0, 24], sizes = [8, 8], strides = [1, 1]} : vector<8x32xf32> to vector<8x8xf32>
    %93 = tpu.concatenate %89, %90, %91, %92 in 0 : vector<8x8xf32>, vector<8x8xf32>, vector<8x8xf32>, vector<8x8xf32> -> vector<32x8xf32>
    %94 = arith.truncf %93 : vector<32x8xf32> to vector<32x8xbf16>
    %c3 = arith.constant 3 : index
    %c0_45 = arith.constant 0 : index
    %c0_46 = arith.constant 0 : index
    %95 = vector.load %arg5[%c3, %c0_45, %c0_46] : memref<12x8x8xbf16, #tpu.memory_space<vmem>>, vector<1x8x8xbf16>
    %96 = vector.shape_cast %95 : vector<1x8x8xbf16> to vector<8x8xbf16>
    %c4 = arith.constant 4 : index
    %c0_47 = arith.constant 0 : index
    %c0_48 = arith.constant 0 : index
    %97 = vector.load %arg5[%c4, %c0_47, %c0_48] : memref<12x8x8xbf16, #tpu.memory_space<vmem>>, vector<1x8x8xbf16>
    %98 = vector.shape_cast %97 : vector<1x8x8xbf16> to vector<8x8xbf16>
    %c5 = arith.constant 5 : index
    %c0_49 = arith.constant 0 : index
    %c0_50 = arith.constant 0 : index
    %99 = vector.load %arg5[%c5, %c0_49, %c0_50] : memref<12x8x8xbf16, #tpu.memory_space<vmem>>, vector<1x8x8xbf16>
    %100 = vector.shape_cast %99 : vector<1x8x8xbf16> to vector<8x8xbf16>
    %cst_51 = arith.constant dense<0.000000e+00> : vector<32x8xf32>
    %101 = tpu.matmul %94, %96, %cst_51 {dimension_numbers = #tpu.dot_dimension_numbers<[1], [0], [0], [1], [0, 0, 1, 1], [], []>} : vector<32x8xbf16>, vector<8x8xbf16>, vector<32x8xf32> -> vector<32x8xf32>
    %cst_52 = arith.constant 0.176776692 : f32
    %102 = vector.broadcast %cst_52 : f32 to vector<32x8xf32>
    %103 = arith.mulf %101, %102 : vector<32x8xf32>
    %104 = vector.shape_cast %103 : vector<32x8xf32> to vector<4x8x8xf32>
    %105 = arith.truncf %104 : vector<4x8x8xf32> to vector<4x8x8xbf16>
    %cst_53 = arith.constant dense<0.000000e+00> : vector<32x8xf32>
    %106 = tpu.matmul %13, %98, %cst_53 {dimension_numbers = #tpu.dot_dimension_numbers<[1], [0], [0], [1], [0, 0, 1, 1], [], []>} : vector<32x8xbf16>, vector<8x8xbf16>, vector<32x8xf32> -> vector<32x8xf32>
    %107 = vector.shape_cast %106 : vector<32x8xf32> to vector<4x8x8xf32>
    %108 = arith.truncf %107 : vector<4x8x8xf32> to vector<4x8x8xbf16>
    %cst_54 = arith.constant dense<0.000000e+00> : vector<32x8xf32>
    %109 = tpu.matmul %13, %100, %cst_54 {dimension_numbers = #tpu.dot_dimension_numbers<[1], [0], [0], [1], [0, 0, 1, 1], [], []>} : vector<32x8xbf16>, vector<8x8xbf16>, vector<32x8xf32> -> vector<32x8xf32>
    %110 = vector.shape_cast %109 : vector<32x8xf32> to vector<4x8x8xf32>
    %111 = arith.truncf %110 : vector<4x8x8xf32> to vector<4x8x8xbf16>
    "tpu.trace_start"() <{level = 10 : i32, message = "hqd,hkd->hqk"}> : () -> ()
    %cst_55 = arith.constant dense<0.000000e+00> : vector<4x8x8xf32>
    %112 = tpu.matmul %105, %108, %cst_55 {dimension_numbers = #tpu.dot_dimension_numbers<[2], [2], [1], [1], [0, 0, 0, 1, 1, 1], [0], [0]>} : vector<4x8x8xbf16>, vector<4x8x8xbf16>, vector<4x8x8xf32> -> vector<4x8x8xf32>
    "tpu.trace_stop"() : () -> ()
    %113 = vector.shape_cast %5 : vector<8x8xf32> to vector<1x8x8xf32>
    %114 = vector.broadcast %113 : vector<1x8x8xf32> to vector<4x8x8xf32>
    %115 = arith.addf %112, %114 : vector<4x8x8xf32>
    %cst_56 = arith.constant dense<0xFF800000> : vector<4x8xf32>
    %116 = vector.multi_reduction <maximumf>, %115, %cst_56 [2] : vector<4x8x8xf32> to vector<4x8xf32>
    %117 = vector.shape_cast %116 : vector<4x8xf32> to vector<4x8x1xf32>
    %118 = vector.broadcast %117 : vector<4x8x1xf32> to vector<4x8x8xf32>
    %119 = arith.subf %115, %118 : vector<4x8x8xf32>
    %120 = math.exp %119 : vector<4x8x8xf32>
    %cst_57 = arith.constant dense<0.000000e+00> : vector<4x8xf32>
    %121 = vector.multi_reduction <add>, %120, %cst_57 [2] : vector<4x8x8xf32> to vector<4x8xf32>
    %122 = vector.shape_cast %121 : vector<4x8xf32> to vector<4x8x1xf32>
    %123 = tpu.reciprocal %122 {approx = true} : vector<4x8x1xf32> -> vector<4x8x1xf32>
    %124 = vector.broadcast %123 : vector<4x8x1xf32> to vector<4x8x8xf32>
    %125 = arith.mulf %120, %124 : vector<4x8x8xf32>
    %126 = arith.truncf %125 : vector<4x8x8xf32> to vector<4x8x8xbf16>
    "tpu.trace_start"() <{level = 10 : i32, message = "hqk,hkd->hqd"}> : () -> ()
    %cst_58 = arith.constant dense<0.000000e+00> : vector<4x8x8xf32>
    %127 = tpu.matmul %126, %111, %cst_58 {dimension_numbers = #tpu.dot_dimension_numbers<[2], [1], [1], [2], [0, 0, 0, 1, 1, 2], [0], [0]>} : vector<4x8x8xbf16>, vector<4x8x8xbf16>, vector<4x8x8xf32> -> vector<4x8x8xf32>
    "tpu.trace_stop"() : () -> ()
    %128 = arith.truncf %127 : vector<4x8x8xf32> to vector<4x8x8xbf16>
    %c1_59 = arith.constant 1 : index
    %c0_60 = arith.constant 0 : index
    %c0_61 = arith.constant 0 : index
    %c0_62 = arith.constant 0 : index
    %129 = vector.load %arg6[%c1_59, %c0_60, %c0_61, %c0_62] : memref<4x4x8x32xbf16, #tpu.memory_space<vmem>>, vector<1x4x8x32xbf16>
    %130 = vector.shape_cast %129 : vector<1x4x8x32xbf16> to vector<4x8x32xbf16>
    "tpu.trace_start"() <{level = 10 : i32, message = "hqd,hdf->hqf"}> : () -> ()
    %cst_63 = arith.constant dense<0.000000e+00> : vector<4x8x32xf32>
    %131 = tpu.matmul %128, %130, %cst_63 {dimension_numbers = #tpu.dot_dimension_numbers<[2], [1], [1], [2], [0, 0, 0, 1, 1, 2], [0], [0]>} : vector<4x8x8xbf16>, vector<4x8x32xbf16>, vector<4x8x32xf32> -> vector<4x8x32xf32>
    "tpu.trace_stop"() : () -> ()
    %cst_64 = arith.constant dense<0.000000e+00> : vector<8x32xf32>
    %132 = vector.multi_reduction <add>, %131, %cst_64 [0] : vector<4x8x32xf32> to vector<8x32xf32>
    %c1_65 = arith.constant 1 : index
    %c0_66 = arith.constant 0 : index
    %c0_67 = arith.constant 0 : index
    %133 = vector.load %arg7[%c1_65, %c0_66, %c0_67] : memref<4x1x32xf32, #tpu.memory_space<vmem>>, vector<1x1x32xf32>
    %134 = vector.shape_cast %133 : vector<1x1x32xf32> to vector<1x32xf32>
    %135 = vector.broadcast %134 : vector<1x32xf32> to vector<8x32xf32>
    %136 = arith.addf %132, %135 : vector<8x32xf32>
    %137 = arith.addf %136, %88 : vector<8x32xf32>
    %cst_68 = arith.constant dense<0.000000e+00> : vector<8xf32>
    %138 = vector.multi_reduction <add>, %137, %cst_68 [1] : vector<8x32xf32> to vector<8xf32>
    %139 = vector.shape_cast %138 : vector<8xf32> to vector<8x1xf32>
    %cst_69 = arith.constant 3.200000e+01 : f32
    %140 = vector.broadcast %cst_69 : f32 to vector<8x1xf32>
    %141 = arith.divf %139, %140 : vector<8x1xf32>
    %142 = vector.broadcast %141 : vector<8x1xf32> to vector<8x32xf32>
    %143 = arith.subf %137, %142 : vector<8x32xf32>
    %144 = arith.mulf %143, %143 : vector<8x32xf32>
    %cst_70 = arith.constant dense<0.000000e+00> : vector<8xf32>
    %145 = vector.multi_reduction <add>, %144, %cst_70 [1] : vector<8x32xf32> to vector<8xf32>
    %146 = vector.shape_cast %145 : vector<8xf32> to vector<8x1xf32>
    %cst_71 = arith.constant 3.200000e+01 : f32
    %147 = vector.broadcast %cst_71 : f32 to vector<8x1xf32>
    %148 = arith.divf %146, %147 : vector<8x1xf32>
    %149 = vector.broadcast %141 : vector<8x1xf32> to vector<8x32xf32>
    %150 = arith.subf %137, %149 : vector<8x32xf32>
    %cst_72 = arith.constant 9.99999974E-6 : f32
    %151 = vector.broadcast %cst_72 : f32 to vector<8x1xf32>
    %152 = arith.addf %148, %151 : vector<8x1xf32>
    %153 = math.rsqrt %152 : vector<8x1xf32>
    %154 = vector.broadcast %153 : vector<8x1xf32> to vector<8x32xf32>
    %155 = arith.mulf %150, %154 : vector<8x32xf32>
    %c1_73 = arith.constant 1 : index
    %c0_74 = arith.constant 0 : index
    %c0_75 = arith.constant 0 : index
    %156 = vector.load %arg8[%c1_73, %c0_74, %c0_75] : memref<6x1x32xf32, #tpu.memory_space<vmem>>, vector<1x1x32xf32>
    %157 = vector.shape_cast %156 : vector<1x1x32xf32> to vector<1x32xf32>
    %158 = vector.broadcast %157 : vector<1x32xf32> to vector<8x32xf32>
    %159 = arith.mulf %155, %158 : vector<8x32xf32>
    %c1_76 = arith.constant 1 : index
    %c0_77 = arith.constant 0 : index
    %c0_78 = arith.constant 0 : index
    %160 = vector.load %arg9[%c1_76, %c0_77, %c0_78] : memref<6x1x32xf32, #tpu.memory_space<vmem>>, vector<1x1x32xf32>
    %161 = vector.shape_cast %160 : vector<1x1x32xf32> to vector<1x32xf32>
    %162 = vector.broadcast %161 : vector<1x32xf32> to vector<8x32xf32>
    %163 = arith.addf %159, %162 : vector<8x32xf32>
    %164 = arith.truncf %163 : vector<8x32xf32> to vector<8x32xbf16>
    %c0_79 = arith.constant 0 : index
    %c0_80 = arith.constant 0 : index
    %c0_81 = arith.constant 0 : index
    %165 = vector.load %arg10[%c0_79, %c0_80, %c0_81] : memref<2x32x64xbf16, #tpu.memory_space<vmem>>, vector<1x32x64xbf16>
    %166 = vector.shape_cast %165 : vector<1x32x64xbf16> to vector<32x64xbf16>
    %cst_82 = arith.constant dense<0.000000e+00> : vector<8x64xf32>
    %167 = tpu.matmul %164, %166, %cst_82 {dimension_numbers = #tpu.dot_dimension_numbers<[1], [0], [0], [1], [0, 0, 1, 1], [], []>} : vector<8x32xbf16>, vector<32x64xbf16>, vector<8x64xf32> -> vector<8x64xf32>
    %c0_83 = arith.constant 0 : index
    %c0_84 = arith.constant 0 : index
    %c0_85 = arith.constant 0 : index
    %168 = vector.load %arg11[%c0_83, %c0_84, %c0_85] : memref<2x1x64xf32, #tpu.memory_space<vmem>>, vector<1x1x64xf32>
    %169 = vector.shape_cast %168 : vector<1x1x64xf32> to vector<1x64xf32>
    %170 = vector.broadcast %169 : vector<1x64xf32> to vector<8x64xf32>
    %171 = arith.addf %167, %170 : vector<8x64xf32>
    %cst_86 = arith.constant 0.000000e+00 : f32
    %172 = vector.broadcast %cst_86 : f32 to vector<8x64xf32>
    %173 = arith.maximumf %171, %172 : vector<8x64xf32>
    %174 = arith.truncf %173 : vector<8x64xf32> to vector<8x64xbf16>
    %c0_87 = arith.constant 0 : index
    %c0_88 = arith.constant 0 : index
    %c0_89 = arith.constant 0 : index
    %175 = vector.load %arg12[%c0_87, %c0_88, %c0_89] : memref<2x64x32xbf16, #tpu.memory_space<vmem>>, vector<1x64x32xbf16>
    %176 = vector.shape_cast %175 : vector<1x64x32xbf16> to vector<64x32xbf16>
    %cst_90 = arith.constant dense<0.000000e+00> : vector<8x32xf32>
    %177 = tpu.matmul %174, %176, %cst_90 {dimension_numbers = #tpu.dot_dimension_numbers<[1], [0], [0], [1], [0, 0, 1, 1], [], []>} : vector<8x64xbf16>, vector<64x32xbf16>, vector<8x32xf32> -> vector<8x32xf32>
    %c0_91 = arith.constant 0 : index
    %c0_92 = arith.constant 0 : index
    %c0_93 = arith.constant 0 : index
    %178 = vector.load %arg13[%c0_91, %c0_92, %c0_93] : memref<2x1x32xf32, #tpu.memory_space<vmem>>, vector<1x1x32xf32>
    %179 = vector.shape_cast %178 : vector<1x1x32xf32> to vector<1x32xf32>
    %180 = vector.broadcast %179 : vector<1x32xf32> to vector<8x32xf32>
    %181 = arith.addf %177, %180 : vector<8x32xf32>
    %182 = arith.addf %181, %163 : vector<8x32xf32>
    %cst_94 = arith.constant dense<0.000000e+00> : vector<8xf32>
    %183 = vector.multi_reduction <add>, %182, %cst_94 [1] : vector<8x32xf32> to vector<8xf32>
    %184 = vector.shape_cast %183 : vector<8xf32> to vector<8x1xf32>
    %cst_95 = arith.constant 3.200000e+01 : f32
    %185 = vector.broadcast %cst_95 : f32 to vector<8x1xf32>
    %186 = arith.divf %184, %185 : vector<8x1xf32>
    %187 = vector.broadcast %186 : vector<8x1xf32> to vector<8x32xf32>
    %188 = arith.subf %182, %187 : vector<8x32xf32>
    %189 = arith.mulf %188, %188 : vector<8x32xf32>
    %cst_96 = arith.constant dense<0.000000e+00> : vector<8xf32>
    %190 = vector.multi_reduction <add>, %189, %cst_96 [1] : vector<8x32xf32> to vector<8xf32>
    %191 = vector.shape_cast %190 : vector<8xf32> to vector<8x1xf32>
    %cst_97 = arith.constant 3.200000e+01 : f32
    %192 = vector.broadcast %cst_97 : f32 to vector<8x1xf32>
    %193 = arith.divf %191, %192 : vector<8x1xf32>
    %194 = vector.broadcast %186 : vector<8x1xf32> to vector<8x32xf32>
    %195 = arith.subf %182, %194 : vector<8x32xf32>
    %cst_98 = arith.constant 9.99999974E-6 : f32
    %196 = vector.broadcast %cst_98 : f32 to vector<8x1xf32>
    %197 = arith.addf %193, %196 : vector<8x1xf32>
    %198 = math.rsqrt %197 : vector<8x1xf32>
    %199 = vector.broadcast %198 : vector<8x1xf32> to vector<8x32xf32>
    %200 = arith.mulf %195, %199 : vector<8x32xf32>
    %c2_99 = arith.constant 2 : index
    %c0_100 = arith.constant 0 : index
    %c0_101 = arith.constant 0 : index
    %201 = vector.load %arg8[%c2_99, %c0_100, %c0_101] : memref<6x1x32xf32, #tpu.memory_space<vmem>>, vector<1x1x32xf32>
    %202 = vector.shape_cast %201 : vector<1x1x32xf32> to vector<1x32xf32>
    %203 = vector.broadcast %202 : vector<1x32xf32> to vector<8x32xf32>
    %204 = arith.mulf %200, %203 : vector<8x32xf32>
    %c2_102 = arith.constant 2 : index
    %c0_103 = arith.constant 0 : index
    %c0_104 = arith.constant 0 : index
    %205 = vector.load %arg9[%c2_102, %c0_103, %c0_104] : memref<6x1x32xf32, #tpu.memory_space<vmem>>, vector<1x1x32xf32>
    %206 = vector.shape_cast %205 : vector<1x1x32xf32> to vector<1x32xf32>
    %207 = vector.broadcast %206 : vector<1x32xf32> to vector<8x32xf32>
    %208 = arith.addf %204, %207 : vector<8x32xf32>
    %209 = vector.extract_strided_slice %208 {offsets = [0, 0], sizes = [8, 8], strides = [1, 1]} : vector<8x32xf32> to vector<8x8xf32>
    %210 = vector.extract_strided_slice %208 {offsets = [0, 8], sizes = [8, 8], strides = [1, 1]} : vector<8x32xf32> to vector<8x8xf32>
    %211 = vector.extract_strided_slice %208 {offsets = [0, 16], sizes = [8, 8], strides = [1, 1]} : vector<8x32xf32> to vector<8x8xf32>
    %212 = vector.extract_strided_slice %208 {offsets = [0, 24], sizes = [8, 8], strides = [1, 1]} : vector<8x32xf32> to vector<8x8xf32>
    %213 = tpu.concatenate %209, %210, %211, %212 in 0 : vector<8x8xf32>, vector<8x8xf32>, vector<8x8xf32>, vector<8x8xf32> -> vector<32x8xf32>
    %214 = arith.truncf %213 : vector<32x8xf32> to vector<32x8xbf16>
    %c6 = arith.constant 6 : index
    %c0_105 = arith.constant 0 : index
    %c0_106 = arith.constant 0 : index
    %215 = vector.load %arg5[%c6, %c0_105, %c0_106] : memref<12x8x8xbf16, #tpu.memory_space<vmem>>, vector<1x8x8xbf16>
    %216 = vector.shape_cast %215 : vector<1x8x8xbf16> to vector<8x8xbf16>
    %c7 = arith.constant 7 : index
    %c0_107 = arith.constant 0 : index
    %c0_108 = arith.constant 0 : index
    %217 = vector.load %arg5[%c7, %c0_107, %c0_108] : memref<12x8x8xbf16, #tpu.memory_space<vmem>>, vector<1x8x8xbf16>
    %218 = vector.shape_cast %217 : vector<1x8x8xbf16> to vector<8x8xbf16>
    %c8 = arith.constant 8 : index
    %c0_109 = arith.constant 0 : index
    %c0_110 = arith.constant 0 : index
    %219 = vector.load %arg5[%c8, %c0_109, %c0_110] : memref<12x8x8xbf16, #tpu.memory_space<vmem>>, vector<1x8x8xbf16>
    %220 = vector.shape_cast %219 : vector<1x8x8xbf16> to vector<8x8xbf16>
    %cst_111 = arith.constant dense<0.000000e+00> : vector<32x8xf32>
    %221 = tpu.matmul %214, %216, %cst_111 {dimension_numbers = #tpu.dot_dimension_numbers<[1], [0], [0], [1], [0, 0, 1, 1], [], []>} : vector<32x8xbf16>, vector<8x8xbf16>, vector<32x8xf32> -> vector<32x8xf32>
    %cst_112 = arith.constant 0.176776692 : f32
    %222 = vector.broadcast %cst_112 : f32 to vector<32x8xf32>
    %223 = arith.mulf %221, %222 : vector<32x8xf32>
    %224 = vector.shape_cast %223 : vector<32x8xf32> to vector<4x8x8xf32>
    %225 = arith.truncf %224 : vector<4x8x8xf32> to vector<4x8x8xbf16>
    %cst_113 = arith.constant dense<0.000000e+00> : vector<32x8xf32>
    %226 = tpu.matmul %214, %218, %cst_113 {dimension_numbers = #tpu.dot_dimension_numbers<[1], [0], [0], [1], [0, 0, 1, 1], [], []>} : vector<32x8xbf16>, vector<8x8xbf16>, vector<32x8xf32> -> vector<32x8xf32>
    %227 = vector.shape_cast %226 : vector<32x8xf32> to vector<4x8x8xf32>
    %228 = arith.truncf %227 : vector<4x8x8xf32> to vector<4x8x8xbf16>
    %cst_114 = arith.constant dense<0.000000e+00> : vector<32x8xf32>
    %229 = tpu.matmul %214, %220, %cst_114 {dimension_numbers = #tpu.dot_dimension_numbers<[1], [0], [0], [1], [0, 0, 1, 1], [], []>} : vector<32x8xbf16>, vector<8x8xbf16>, vector<32x8xf32> -> vector<32x8xf32>
    %230 = vector.shape_cast %229 : vector<32x8xf32> to vector<4x8x8xf32>
    %231 = arith.truncf %230 : vector<4x8x8xf32> to vector<4x8x8xbf16>
    "tpu.trace_start"() <{level = 10 : i32, message = "hqd,hkd->hqk"}> : () -> ()
    %cst_115 = arith.constant dense<0.000000e+00> : vector<4x8x8xf32>
    %232 = tpu.matmul %225, %228, %cst_115 {dimension_numbers = #tpu.dot_dimension_numbers<[2], [2], [1], [1], [0, 0, 0, 1, 1, 1], [0], [0]>} : vector<4x8x8xbf16>, vector<4x8x8xbf16>, vector<4x8x8xf32> -> vector<4x8x8xf32>
    "tpu.trace_stop"() : () -> ()
    %233 = vector.shape_cast %3 : vector<8x8xf32> to vector<1x8x8xf32>
    %234 = vector.broadcast %233 : vector<1x8x8xf32> to vector<4x8x8xf32>
    %235 = arith.addf %232, %234 : vector<4x8x8xf32>
    %cst_116 = arith.constant dense<0xFF800000> : vector<4x8xf32>
    %236 = vector.multi_reduction <maximumf>, %235, %cst_116 [2] : vector<4x8x8xf32> to vector<4x8xf32>
    %237 = vector.shape_cast %236 : vector<4x8xf32> to vector<4x8x1xf32>
    %238 = vector.broadcast %237 : vector<4x8x1xf32> to vector<4x8x8xf32>
    %239 = arith.subf %235, %238 : vector<4x8x8xf32>
    %240 = math.exp %239 : vector<4x8x8xf32>
    %cst_117 = arith.constant dense<0.000000e+00> : vector<4x8xf32>
    %241 = vector.multi_reduction <add>, %240, %cst_117 [2] : vector<4x8x8xf32> to vector<4x8xf32>
    %242 = vector.shape_cast %241 : vector<4x8xf32> to vector<4x8x1xf32>
    %243 = tpu.reciprocal %242 {approx = true} : vector<4x8x1xf32> -> vector<4x8x1xf32>
    %244 = vector.broadcast %243 : vector<4x8x1xf32> to vector<4x8x8xf32>
    %245 = arith.mulf %240, %244 : vector<4x8x8xf32>
    %246 = arith.truncf %245 : vector<4x8x8xf32> to vector<4x8x8xbf16>
    "tpu.trace_start"() <{level = 10 : i32, message = "hqk,hkd->hqd"}> : () -> ()
    %cst_118 = arith.constant dense<0.000000e+00> : vector<4x8x8xf32>
    %247 = tpu.matmul %246, %231, %cst_118 {dimension_numbers = #tpu.dot_dimension_numbers<[2], [1], [1], [2], [0, 0, 0, 1, 1, 2], [0], [0]>} : vector<4x8x8xbf16>, vector<4x8x8xbf16>, vector<4x8x8xf32> -> vector<4x8x8xf32>
    "tpu.trace_stop"() : () -> ()
    %248 = arith.truncf %247 : vector<4x8x8xf32> to vector<4x8x8xbf16>
    %c2_119 = arith.constant 2 : index
    %c0_120 = arith.constant 0 : index
    %c0_121 = arith.constant 0 : index
    %c0_122 = arith.constant 0 : index
    %249 = vector.load %arg6[%c2_119, %c0_120, %c0_121, %c0_122] : memref<4x4x8x32xbf16, #tpu.memory_space<vmem>>, vector<1x4x8x32xbf16>
    %250 = vector.shape_cast %249 : vector<1x4x8x32xbf16> to vector<4x8x32xbf16>
    "tpu.trace_start"() <{level = 10 : i32, message = "hqd,hdf->hqf"}> : () -> ()
    %cst_123 = arith.constant dense<0.000000e+00> : vector<4x8x32xf32>
    %251 = tpu.matmul %248, %250, %cst_123 {dimension_numbers = #tpu.dot_dimension_numbers<[2], [1], [1], [2], [0, 0, 0, 1, 1, 2], [0], [0]>} : vector<4x8x8xbf16>, vector<4x8x32xbf16>, vector<4x8x32xf32> -> vector<4x8x32xf32>
    "tpu.trace_stop"() : () -> ()
    %cst_124 = arith.constant dense<0.000000e+00> : vector<8x32xf32>
    %252 = vector.multi_reduction <add>, %251, %cst_124 [0] : vector<4x8x32xf32> to vector<8x32xf32>
    %c2_125 = arith.constant 2 : index
    %c0_126 = arith.constant 0 : index
    %c0_127 = arith.constant 0 : index
    %253 = vector.load %arg7[%c2_125, %c0_126, %c0_127] : memref<4x1x32xf32, #tpu.memory_space<vmem>>, vector<1x1x32xf32>
    %254 = vector.shape_cast %253 : vector<1x1x32xf32> to vector<1x32xf32>
    %255 = vector.broadcast %254 : vector<1x32xf32> to vector<8x32xf32>
    %256 = arith.addf %252, %255 : vector<8x32xf32>
    %257 = arith.addf %256, %208 : vector<8x32xf32>
    %cst_128 = arith.constant dense<0.000000e+00> : vector<8xf32>
    %258 = vector.multi_reduction <add>, %257, %cst_128 [1] : vector<8x32xf32> to vector<8xf32>
    %259 = vector.shape_cast %258 : vector<8xf32> to vector<8x1xf32>
    %cst_129 = arith.constant 3.200000e+01 : f32
    %260 = vector.broadcast %cst_129 : f32 to vector<8x1xf32>
    %261 = arith.divf %259, %260 : vector<8x1xf32>
    %262 = vector.broadcast %261 : vector<8x1xf32> to vector<8x32xf32>
    %263 = arith.subf %257, %262 : vector<8x32xf32>
    %264 = arith.mulf %263, %263 : vector<8x32xf32>
    %cst_130 = arith.constant dense<0.000000e+00> : vector<8xf32>
    %265 = vector.multi_reduction <add>, %264, %cst_130 [1] : vector<8x32xf32> to vector<8xf32>
    %266 = vector.shape_cast %265 : vector<8xf32> to vector<8x1xf32>
    %cst_131 = arith.constant 3.200000e+01 : f32
    %267 = vector.broadcast %cst_131 : f32 to vector<8x1xf32>
    %268 = arith.divf %266, %267 : vector<8x1xf32>
    %269 = vector.broadcast %261 : vector<8x1xf32> to vector<8x32xf32>
    %270 = arith.subf %257, %269 : vector<8x32xf32>
    %cst_132 = arith.constant 9.99999974E-6 : f32
    %271 = vector.broadcast %cst_132 : f32 to vector<8x1xf32>
    %272 = arith.addf %268, %271 : vector<8x1xf32>
    %273 = math.rsqrt %272 : vector<8x1xf32>
    %274 = vector.broadcast %273 : vector<8x1xf32> to vector<8x32xf32>
    %275 = arith.mulf %270, %274 : vector<8x32xf32>
    %c3_133 = arith.constant 3 : index
    %c0_134 = arith.constant 0 : index
    %c0_135 = arith.constant 0 : index
    %276 = vector.load %arg8[%c3_133, %c0_134, %c0_135] : memref<6x1x32xf32, #tpu.memory_space<vmem>>, vector<1x1x32xf32>
    %277 = vector.shape_cast %276 : vector<1x1x32xf32> to vector<1x32xf32>
    %278 = vector.broadcast %277 : vector<1x32xf32> to vector<8x32xf32>
    %279 = arith.mulf %275, %278 : vector<8x32xf32>
    %c3_136 = arith.constant 3 : index
    %c0_137 = arith.constant 0 : index
    %c0_138 = arith.constant 0 : index
    %280 = vector.load %arg9[%c3_136, %c0_137, %c0_138] : memref<6x1x32xf32, #tpu.memory_space<vmem>>, vector<1x1x32xf32>
    %281 = vector.shape_cast %280 : vector<1x1x32xf32> to vector<1x32xf32>
    %282 = vector.broadcast %281 : vector<1x32xf32> to vector<8x32xf32>
    %283 = arith.addf %279, %282 : vector<8x32xf32>
    %284 = vector.extract_strided_slice %283 {offsets = [0, 0], sizes = [8, 8], strides = [1, 1]} : vector<8x32xf32> to vector<8x8xf32>
    %285 = vector.extract_strided_slice %283 {offsets = [0, 8], sizes = [8, 8], strides = [1, 1]} : vector<8x32xf32> to vector<8x8xf32>
    %286 = vector.extract_strided_slice %283 {offsets = [0, 16], sizes = [8, 8], strides = [1, 1]} : vector<8x32xf32> to vector<8x8xf32>
    %287 = vector.extract_strided_slice %283 {offsets = [0, 24], sizes = [8, 8], strides = [1, 1]} : vector<8x32xf32> to vector<8x8xf32>
    %288 = tpu.concatenate %284, %285, %286, %287 in 0 : vector<8x8xf32>, vector<8x8xf32>, vector<8x8xf32>, vector<8x8xf32> -> vector<32x8xf32>
    %289 = arith.truncf %288 : vector<32x8xf32> to vector<32x8xbf16>
    %c9 = arith.constant 9 : index
    %c0_139 = arith.constant 0 : index
    %c0_140 = arith.constant 0 : index
    %290 = vector.load %arg5[%c9, %c0_139, %c0_140] : memref<12x8x8xbf16, #tpu.memory_space<vmem>>, vector<1x8x8xbf16>
    %291 = vector.shape_cast %290 : vector<1x8x8xbf16> to vector<8x8xbf16>
    %c10 = arith.constant 10 : index
    %c0_141 = arith.constant 0 : index
    %c0_142 = arith.constant 0 : index
    %292 = vector.load %arg5[%c10, %c0_141, %c0_142] : memref<12x8x8xbf16, #tpu.memory_space<vmem>>, vector<1x8x8xbf16>
    %293 = vector.shape_cast %292 : vector<1x8x8xbf16> to vector<8x8xbf16>
    %c11 = arith.constant 11 : index
    %c0_143 = arith.constant 0 : index
    %c0_144 = arith.constant 0 : index
    %294 = vector.load %arg5[%c11, %c0_143, %c0_144] : memref<12x8x8xbf16, #tpu.memory_space<vmem>>, vector<1x8x8xbf16>
    %295 = vector.shape_cast %294 : vector<1x8x8xbf16> to vector<8x8xbf16>
    %cst_145 = arith.constant dense<0.000000e+00> : vector<32x8xf32>
    %296 = tpu.matmul %289, %291, %cst_145 {dimension_numbers = #tpu.dot_dimension_numbers<[1], [0], [0], [1], [0, 0, 1, 1], [], []>} : vector<32x8xbf16>, vector<8x8xbf16>, vector<32x8xf32> -> vector<32x8xf32>
    %cst_146 = arith.constant 0.176776692 : f32
    %297 = vector.broadcast %cst_146 : f32 to vector<32x8xf32>
    %298 = arith.mulf %296, %297 : vector<32x8xf32>
    %299 = vector.shape_cast %298 : vector<32x8xf32> to vector<4x8x8xf32>
    %300 = arith.truncf %299 : vector<4x8x8xf32> to vector<4x8x8xbf16>
    %cst_147 = arith.constant dense<0.000000e+00> : vector<32x8xf32>
    %301 = tpu.matmul %13, %293, %cst_147 {dimension_numbers = #tpu.dot_dimension_numbers<[1], [0], [0], [1], [0, 0, 1, 1], [], []>} : vector<32x8xbf16>, vector<8x8xbf16>, vector<32x8xf32> -> vector<32x8xf32>
    %302 = vector.shape_cast %301 : vector<32x8xf32> to vector<4x8x8xf32>
    %303 = arith.truncf %302 : vector<4x8x8xf32> to vector<4x8x8xbf16>
    %cst_148 = arith.constant dense<0.000000e+00> : vector<32x8xf32>
    %304 = tpu.matmul %13, %295, %cst_148 {dimension_numbers = #tpu.dot_dimension_numbers<[1], [0], [0], [1], [0, 0, 1, 1], [], []>} : vector<32x8xbf16>, vector<8x8xbf16>, vector<32x8xf32> -> vector<32x8xf32>
    %305 = vector.shape_cast %304 : vector<32x8xf32> to vector<4x8x8xf32>
    %306 = arith.truncf %305 : vector<4x8x8xf32> to vector<4x8x8xbf16>
    "tpu.trace_start"() <{level = 10 : i32, message = "hqd,hkd->hqk"}> : () -> ()
    %cst_149 = arith.constant dense<0.000000e+00> : vector<4x8x8xf32>
    %307 = tpu.matmul %300, %303, %cst_149 {dimension_numbers = #tpu.dot_dimension_numbers<[2], [2], [1], [1], [0, 0, 0, 1, 1, 1], [0], [0]>} : vector<4x8x8xbf16>, vector<4x8x8xbf16>, vector<4x8x8xf32> -> vector<4x8x8xf32>
    "tpu.trace_stop"() : () -> ()
    %308 = vector.shape_cast %5 : vector<8x8xf32> to vector<1x8x8xf32>
    %309 = vector.broadcast %308 : vector<1x8x8xf32> to vector<4x8x8xf32>
    %310 = arith.addf %307, %309 : vector<4x8x8xf32>
    %cst_150 = arith.constant dense<0xFF800000> : vector<4x8xf32>
    %311 = vector.multi_reduction <maximumf>, %310, %cst_150 [2] : vector<4x8x8xf32> to vector<4x8xf32>
    %312 = vector.shape_cast %311 : vector<4x8xf32> to vector<4x8x1xf32>
    %313 = vector.broadcast %312 : vector<4x8x1xf32> to vector<4x8x8xf32>
    %314 = arith.subf %310, %313 : vector<4x8x8xf32>
    %315 = math.exp %314 : vector<4x8x8xf32>
    %cst_151 = arith.constant dense<0.000000e+00> : vector<4x8xf32>
    %316 = vector.multi_reduction <add>, %315, %cst_151 [2] : vector<4x8x8xf32> to vector<4x8xf32>
    %317 = vector.shape_cast %316 : vector<4x8xf32> to vector<4x8x1xf32>
    %318 = tpu.reciprocal %317 {approx = true} : vector<4x8x1xf32> -> vector<4x8x1xf32>
    %319 = vector.broadcast %318 : vector<4x8x1xf32> to vector<4x8x8xf32>
    %320 = arith.mulf %315, %319 : vector<4x8x8xf32>
    %321 = arith.truncf %320 : vector<4x8x8xf32> to vector<4x8x8xbf16>
    "tpu.trace_start"() <{level = 10 : i32, message = "hqk,hkd->hqd"}> : () -> ()
    %cst_152 = arith.constant dense<0.000000e+00> : vector<4x8x8xf32>
    %322 = tpu.matmul %321, %306, %cst_152 {dimension_numbers = #tpu.dot_dimension_numbers<[2], [1], [1], [2], [0, 0, 0, 1, 1, 2], [0], [0]>} : vector<4x8x8xbf16>, vector<4x8x8xbf16>, vector<4x8x8xf32> -> vector<4x8x8xf32>
    "tpu.trace_stop"() : () -> ()
    %323 = arith.truncf %322 : vector<4x8x8xf32> to vector<4x8x8xbf16>
    %c3_153 = arith.constant 3 : index
    %c0_154 = arith.constant 0 : index
    %c0_155 = arith.constant 0 : index
    %c0_156 = arith.constant 0 : index
    %324 = vector.load %arg6[%c3_153, %c0_154, %c0_155, %c0_156] : memref<4x4x8x32xbf16, #tpu.memory_space<vmem>>, vector<1x4x8x32xbf16>
    %325 = vector.shape_cast %324 : vector<1x4x8x32xbf16> to vector<4x8x32xbf16>
    "tpu.trace_start"() <{level = 10 : i32, message = "hqd,hdf->hqf"}> : () -> ()
    %cst_157 = arith.constant dense<0.000000e+00> : vector<4x8x32xf32>
    %326 = tpu.matmul %323, %325, %cst_157 {dimension_numbers = #tpu.dot_dimension_numbers<[2], [1], [1], [2], [0, 0, 0, 1, 1, 2], [0], [0]>} : vector<4x8x8xbf16>, vector<4x8x32xbf16>, vector<4x8x32xf32> -> vector<4x8x32xf32>
    "tpu.trace_stop"() : () -> ()
    %cst_158 = arith.constant dense<0.000000e+00> : vector<8x32xf32>
    %327 = vector.multi_reduction <add>, %326, %cst_158 [0] : vector<4x8x32xf32> to vector<8x32xf32>
    %c3_159 = arith.constant 3 : index
    %c0_160 = arith.constant 0 : index
    %c0_161 = arith.constant 0 : index
    %328 = vector.load %arg7[%c3_159, %c0_160, %c0_161] : memref<4x1x32xf32, #tpu.memory_space<vmem>>, vector<1x1x32xf32>
    %329 = vector.shape_cast %328 : vector<1x1x32xf32> to vector<1x32xf32>
    %330 = vector.broadcast %329 : vector<1x32xf32> to vector<8x32xf32>
    %331 = arith.addf %327, %330 : vector<8x32xf32>
    %332 = arith.addf %331, %283 : vector<8x32xf32>
    %cst_162 = arith.constant dense<0.000000e+00> : vector<8xf32>
    %333 = vector.multi_reduction <add>, %332, %cst_162 [1] : vector<8x32xf32> to vector<8xf32>
    %334 = vector.shape_cast %333 : vector<8xf32> to vector<8x1xf32>
    %cst_163 = arith.constant 3.200000e+01 : f32
    %335 = vector.broadcast %cst_163 : f32 to vector<8x1xf32>
    %336 = arith.divf %334, %335 : vector<8x1xf32>
    %337 = vector.broadcast %336 : vector<8x1xf32> to vector<8x32xf32>
    %338 = arith.subf %332, %337 : vector<8x32xf32>
    %339 = arith.mulf %338, %338 : vector<8x32xf32>
    %cst_164 = arith.constant dense<0.000000e+00> : vector<8xf32>
    %340 = vector.multi_reduction <add>, %339, %cst_164 [1] : vector<8x32xf32> to vector<8xf32>
    %341 = vector.shape_cast %340 : vector<8xf32> to vector<8x1xf32>
    %cst_165 = arith.constant 3.200000e+01 : f32
    %342 = vector.broadcast %cst_165 : f32 to vector<8x1xf32>
    %343 = arith.divf %341, %342 : vector<8x1xf32>
    %344 = vector.broadcast %336 : vector<8x1xf32> to vector<8x32xf32>
    %345 = arith.subf %332, %344 : vector<8x32xf32>
    %cst_166 = arith.constant 9.99999974E-6 : f32
    %346 = vector.broadcast %cst_166 : f32 to vector<8x1xf32>
    %347 = arith.addf %343, %346 : vector<8x1xf32>
    %348 = math.rsqrt %347 : vector<8x1xf32>
    %349 = vector.broadcast %348 : vector<8x1xf32> to vector<8x32xf32>
    %350 = arith.mulf %345, %349 : vector<8x32xf32>
    %c4_167 = arith.constant 4 : index
    %c0_168 = arith.constant 0 : index
    %c0_169 = arith.constant 0 : index
    %351 = vector.load %arg8[%c4_167, %c0_168, %c0_169] : memref<6x1x32xf32, #tpu.memory_space<vmem>>, vector<1x1x32xf32>
    %352 = vector.shape_cast %351 : vector<1x1x32xf32> to vector<1x32xf32>
    %353 = vector.broadcast %352 : vector<1x32xf32> to vector<8x32xf32>
    %354 = arith.mulf %350, %353 : vector<8x32xf32>
    %c4_170 = arith.constant 4 : index
    %c0_171 = arith.constant 0 : index
    %c0_172 = arith.constant 0 : index
    %355 = vector.load %arg9[%c4_170, %c0_171, %c0_172] : memref<6x1x32xf32, #tpu.memory_space<vmem>>, vector<1x1x32xf32>
    %356 = vector.shape_cast %355 : vector<1x1x32xf32> to vector<1x32xf32>
    %357 = vector.broadcast %356 : vector<1x32xf32> to vector<8x32xf32>
    %358 = arith.addf %354, %357 : vector<8x32xf32>
    %359 = arith.truncf %358 : vector<8x32xf32> to vector<8x32xbf16>
    %c1_173 = arith.constant 1 : index
    %c0_174 = arith.constant 0 : index
    %c0_175 = arith.constant 0 : index
    %360 = vector.load %arg10[%c1_173, %c0_174, %c0_175] : memref<2x32x64xbf16, #tpu.memory_space<vmem>>, vector<1x32x64xbf16>
    %361 = vector.shape_cast %360 : vector<1x32x64xbf16> to vector<32x64xbf16>
    %cst_176 = arith.constant dense<0.000000e+00> : vector<8x64xf32>
    %362 = tpu.matmul %359, %361, %cst_176 {dimension_numbers = #tpu.dot_dimension_numbers<[1], [0], [0], [1], [0, 0, 1, 1], [], []>} : vector<8x32xbf16>, vector<32x64xbf16>, vector<8x64xf32> -> vector<8x64xf32>
    %c1_177 = arith.constant 1 : index
    %c0_178 = arith.constant 0 : index
    %c0_179 = arith.constant 0 : index
    %363 = vector.load %arg11[%c1_177, %c0_178, %c0_179] : memref<2x1x64xf32, #tpu.memory_space<vmem>>, vector<1x1x64xf32>
    %364 = vector.shape_cast %363 : vector<1x1x64xf32> to vector<1x64xf32>
    %365 = vector.broadcast %364 : vector<1x64xf32> to vector<8x64xf32>
    %366 = arith.addf %362, %365 : vector<8x64xf32>
    %cst_180 = arith.constant 0.000000e+00 : f32
    %367 = vector.broadcast %cst_180 : f32 to vector<8x64xf32>
    %368 = arith.maximumf %366, %367 : vector<8x64xf32>
    %369 = arith.truncf %368 : vector<8x64xf32> to vector<8x64xbf16>
    %c1_181 = arith.constant 1 : index
    %c0_182 = arith.constant 0 : index
    %c0_183 = arith.constant 0 : index
    %370 = vector.load %arg12[%c1_181, %c0_182, %c0_183] : memref<2x64x32xbf16, #tpu.memory_space<vmem>>, vector<1x64x32xbf16>
    %371 = vector.shape_cast %370 : vector<1x64x32xbf16> to vector<64x32xbf16>
    %cst_184 = arith.constant dense<0.000000e+00> : vector<8x32xf32>
    %372 = tpu.matmul %369, %371, %cst_184 {dimension_numbers = #tpu.dot_dimension_numbers<[1], [0], [0], [1], [0, 0, 1, 1], [], []>} : vector<8x64xbf16>, vector<64x32xbf16>, vector<8x32xf32> -> vector<8x32xf32>
    %c1_185 = arith.constant 1 : index
    %c0_186 = arith.constant 0 : index
    %c0_187 = arith.constant 0 : index
    %373 = vector.load %arg13[%c1_185, %c0_186, %c0_187] : memref<2x1x32xf32, #tpu.memory_space<vmem>>, vector<1x1x32xf32>
    %374 = vector.shape_cast %373 : vector<1x1x32xf32> to vector<1x32xf32>
    %375 = vector.broadcast %374 : vector<1x32xf32> to vector<8x32xf32>
    %376 = arith.addf %372, %375 : vector<8x32xf32>
    %377 = arith.addf %376, %358 : vector<8x32xf32>
    %cst_188 = arith.constant dense<0.000000e+00> : vector<8xf32>
    %378 = vector.multi_reduction <add>, %377, %cst_188 [1] : vector<8x32xf32> to vector<8xf32>
    %379 = vector.shape_cast %378 : vector<8xf32> to vector<8x1xf32>
    %cst_189 = arith.constant 3.200000e+01 : f32
    %380 = vector.broadcast %cst_189 : f32 to vector<8x1xf32>
    %381 = arith.divf %379, %380 : vector<8x1xf32>
    %382 = vector.broadcast %381 : vector<8x1xf32> to vector<8x32xf32>
    %383 = arith.subf %377, %382 : vector<8x32xf32>
    %384 = arith.mulf %383, %383 : vector<8x32xf32>
    %cst_190 = arith.constant dense<0.000000e+00> : vector<8xf32>
    %385 = vector.multi_reduction <add>, %384, %cst_190 [1] : vector<8x32xf32> to vector<8xf32>
    %386 = vector.shape_cast %385 : vector<8xf32> to vector<8x1xf32>
    %cst_191 = arith.constant 3.200000e+01 : f32
    %387 = vector.broadcast %cst_191 : f32 to vector<8x1xf32>
    %388 = arith.divf %386, %387 : vector<8x1xf32>
    %389 = vector.broadcast %381 : vector<8x1xf32> to vector<8x32xf32>
    %390 = arith.subf %377, %389 : vector<8x32xf32>
    %cst_192 = arith.constant 9.99999974E-6 : f32
    %391 = vector.broadcast %cst_192 : f32 to vector<8x1xf32>
    %392 = arith.addf %388, %391 : vector<8x1xf32>
    %393 = math.rsqrt %392 : vector<8x1xf32>
    %394 = vector.broadcast %393 : vector<8x1xf32> to vector<8x32xf32>
    %395 = arith.mulf %390, %394 : vector<8x32xf32>
    %c5_193 = arith.constant 5 : index
    %c0_194 = arith.constant 0 : index
    %c0_195 = arith.constant 0 : index
    %396 = vector.load %arg8[%c5_193, %c0_194, %c0_195] : memref<6x1x32xf32, #tpu.memory_space<vmem>>, vector<1x1x32xf32>
    %397 = vector.shape_cast %396 : vector<1x1x32xf32> to vector<1x32xf32>
    %398 = vector.broadcast %397 : vector<1x32xf32> to vector<8x32xf32>
    %399 = arith.mulf %395, %398 : vector<8x32xf32>
    %c5_196 = arith.constant 5 : index
    %c0_197 = arith.constant 0 : index
    %c0_198 = arith.constant 0 : index
    %400 = vector.load %arg9[%c5_196, %c0_197, %c0_198] : memref<6x1x32xf32, #tpu.memory_space<vmem>>, vector<1x1x32xf32>
    %401 = vector.shape_cast %400 : vector<1x1x32xf32> to vector<1x32xf32>
    %402 = vector.broadcast %401 : vector<1x32xf32> to vector<8x32xf32>
    %403 = arith.addf %399, %402 : vector<8x32xf32>
    %404 = arith.truncf %403 : vector<8x32xf32> to vector<8x32xbf16>
    %c0_199 = arith.constant 0 : index
    %c0_200 = arith.constant 0 : index
    %405 = vector.load %arg14[%c0_199, %c0_200] : memref<32x128xbf16, #tpu.memory_space<vmem>>, vector<32x128xbf16>
    %cst_201 = arith.constant dense<0.000000e+00> : vector<8x128xf32>
    %406 = tpu.matmul %404, %405, %cst_201 {dimension_numbers = #tpu.dot_dimension_numbers<[1], [0], [0], [1], [0, 0, 1, 1], [], []>} : vector<8x32xbf16>, vector<32x128xbf16>, vector<8x128xf32> -> vector<8x128xf32>
    %c0_202 = arith.constant 0 : index
    %c0_203 = arith.constant 0 : index
    %407 = vector.load %arg15[%c0_202, %c0_203] : memref<1x128xf32, #tpu.memory_space<vmem>>, vector<1x128xf32>
    %408 = vector.broadcast %407 : vector<1x128xf32> to vector<8x128xf32>
    %409 = arith.addf %406, %408 : vector<8x128xf32>
    %c0_204 = arith.constant 0 : index
    %c0_205 = arith.constant 0 : index
    %c0_206 = arith.constant 0 : index
    %410 = vector.load %arg16[%c0_204, %c0_205, %c0_206] : memref<1x8x128xf32, #tpu.memory_space<vmem>>, vector<1x8x128xf32>
    %411 = vector.shape_cast %410 : vector<1x8x128xf32> to vector<8x128xf32>
    %412 = vector.shape_cast %409 : vector<8x128xf32> to vector<1x8x128xf32>
    tpu.vector_store %arg16[%c0_204, %c0_205, %c0_206], %412 {strides = array<i32>} : memref<1x8x128xf32, #tpu.memory_space<vmem>>, vector<1x8x128xf32>,
    return
  }
  func.func @transform_0(%arg0: i32) -> (i32, i32, i32) {
    %c0_i32 = arith.constant 0 : i32
    %c0_i32_0 = arith.constant 0 : i32
    %c0_i32_1 = arith.constant 0 : i32
    return %arg0, %c0_i32, %c0_i32_0 : i32, i32, i32
  }
  func.func @transform_1(%arg0: i32) -> (i32, i32, i32) {
    %c0_i32 = arith.constant 0 : i32
    %c0_i32_0 = arith.constant 0 : i32
    %c0_i32_1 = arith.constant 0 : i32
    return %arg0, %c0_i32, %c0_i32_0 : i32, i32, i32
  }
  func.func @transform_2(%arg0: i32) -> (i32, i32, i32) {
    %c0_i32 = arith.constant 0 : i32
    %c0_i32_0 = arith.constant 0 : i32
    %c0_i32_1 = arith.constant 0 : i32
    return %arg0, %c0_i32, %c0_i32_0 : i32, i32, i32
  }
  func.func @transform_3(%arg0: i32) -> (i32, i32, i32) {
    %c0_i32 = arith.constant 0 : i32
    %c0_i32_0 = arith.constant 0 : i32
    %c0_i32_1 = arith.constant 0 : i32
    return %arg0, %c0_i32, %c0_i32_0 : i32, i32, i32
  }
  func.func @transform_4(%arg0: i32) -> (i32, i32, i32) {
    %c0_i32 = arith.constant 0 : i32
    %c0_i32_0 = arith.constant 0 : i32
    %c0_i32_1 = arith.constant 0 : i32
    %c0_i32_2 = arith.constant 0 : i32
    return %c0_i32, %c0_i32_0, %c0_i32_1 : i32, i32, i32
  }
  func.func @transform_5(%arg0: i32) -> (i32, i32, i32, i32) {
    %c0_i32 = arith.constant 0 : i32
    %c0_i32_0 = arith.constant 0 : i32
    %c0_i32_1 = arith.constant 0 : i32
    %c0_i32_2 = arith.constant 0 : i32
    %c0_i32_3 = arith.constant 0 : i32
    return %c0_i32, %c0_i32_0, %c0_i32_1, %c0_i32_2 : i32, i32, i32, i32
  }
  func.func @transform_6(%arg0: i32) -> (i32, i32, i32) {
    %c0_i32 = arith.constant 0 : i32
    %c0_i32_0 = arith.constant 0 : i32
    %c0_i32_1 = arith.constant 0 : i32
    %c0_i32_2 = arith.constant 0 : i32
    return %c0_i32, %c0_i32_0, %c0_i32_1 : i32, i32, i32
  }
  func.func @transform_7(%arg0: i32) -> (i32, i32, i32) {
    %c0_i32 = arith.constant 0 : i32
    %c0_i32_0 = arith.constant 0 : i32
    %c0_i32_1 = arith.constant 0 : i32
    %c0_i32_2 = arith.constant 0 : i32
    return %c0_i32, %c0_i32_0, %c0_i32_1 : i32, i32, i32
  }
  func.func @transform_8(%arg0: i32) -> (i32, i32, i32) {
    %c0_i32 = arith.constant 0 : i32
    %c0_i32_0 = arith.constant 0 : i32
    %c0_i32_1 = arith.constant 0 : i32
    %c0_i32_2 = arith.constant 0 : i32
    return %c0_i32, %c0_i32_0, %c0_i32_1 : i32, i32, i32
  }
  func.func @transform_9(%arg0: i32) -> (i32, i32, i32) {
    %c0_i32 = arith.constant 0 : i32
    %c0_i32_0 = arith.constant 0 : i32
    %c0_i32_1 = arith.constant 0 : i32
    %c0_i32_2 = arith.constant 0 : i32
    return %c0_i32, %c0_i32_0, %c0_i32_1 : i32, i32, i32
  }
  func.func @transform_10(%arg0: i32) -> (i32, i32, i32) {
    %c0_i32 = arith.constant 0 : i32
    %c0_i32_0 = arith.constant 0 : i32
    %c0_i32_1 = arith.constant 0 : i32
    %c0_i32_2 = arith.constant 0 : i32
    return %c0_i32, %c0_i32_0, %c0_i32_1 : i32, i32, i32
  }
  func.func @transform_11(%arg0: i32) -> (i32, i32, i32) {
    %c0_i32 = arith.constant 0 : i32
    %c0_i32_0 = arith.constant 0 : i32
    %c0_i32_1 = arith.constant 0 : i32
    %c0_i32_2 = arith.constant 0 : i32
    return %c0_i32, %c0_i32_0, %c0_i32_1 : i32, i32, i32
  }
  func.func @transform_12(%arg0: i32) -> (i32, i32, i32) {
    %c0_i32 = arith.constant 0 : i32
    %c0_i32_0 = arith.constant 0 : i32
    %c0_i32_1 = arith.constant 0 : i32
    %c0_i32_2 = arith.constant 0 : i32
    return %c0_i32, %c0_i32_0, %c0_i32_1 : i32, i32, i32
  }
  func.func @transform_13(%arg0: i32) -> (i32, i32) {
    %c0_i32 = arith.constant 0 : i32
    %c0_i32_0 = arith.constant 0 : i32
    %c0_i32_1 = arith.constant 0 : i32
    return %c0_i32, %c0_i32_0 : i32, i32
  }
  func.func @transform_14(%arg0: i32) -> (i32, i32) {
    %c0_i32 = arith.constant 0 : i32
    %c0_i32_0 = arith.constant 0 : i32
    %c0_i32_1 = arith.constant 0 : i32
    return %c0_i32, %c0_i32_0 : i32, i32
  }
  func.func @transform_15(%arg0: i32) -> (i32, i32, i32) {
    %c0_i32 = arith.constant 0 : i32
    %c0_i32_0 = arith.constant 0 : i32
    %c0_i32_1 = arith.constant 0 : i32
    return %arg0, %c0_i32, %c0_i32_0 : i32, i32, i32
  }
}

module attributes {stable_mosaic.version = 11 : i64} {
  func.func @fused_decoder_kernel(%arg0: i32, %arg1: memref<1x8x32xf32, #tpu.memory_space<vmem>>, %arg2: memref<1x8x32xf32, #tpu.memory_space<vmem>>, %arg3: memref<1x8x8xf32, #tpu.memory_space<vmem>>, %arg4: memref<1x8x8xf32, #tpu.memory_space<vmem>>, %arg5: memref<12x8x8xbf16, #tpu.memory_space<vmem>>, %arg6: memref<4x4x8x32xbf16, #tpu.memory_space<vmem>>, %arg7: memref<4x1x32xf32, #tpu.memory_space<vmem>>, %arg8: memref<6x1x32xf32, #tpu.memory_space<vmem>>, %arg9: memref<6x1x32xf32, #tpu.memory_space<vmem>>, %arg10: memref<2x32x64xbf16, #tpu.memory_space<vmem>>, %arg11: memref<2x1x64xf32, #tpu.memory_space<vmem>>, %arg12: memref<2x64x32xbf16, #tpu.memory_space<vmem>>, %arg13: memref<2x1x32xf32, #tpu.memory_space<vmem>>, %arg14: memref<32x128xbf16, #tpu.memory_space<vmem>>, %arg15: memref<1x128xf32, #tpu.memory_space<vmem>>, %arg16: memref<1x8x128xf32, #tpu.memory_space<vmem>>) attributes {dimension_semantics = [#tpu.dimension_semantics<parallel>], iteration_bounds = array<i64: 2>, scalar_prefetch = 0 : i64, scratch_operands = 0 : i64, tpu.core_type = #tpu.core_type<tc>, window_params = [{transform_indices = @transform_0, window_bounds = array<i64: 1, 8, 32>}, {transform_indices = @transform_1, window_bounds = array<i64: 1, 8, 32>}, {transform_indices = @transform_2, window_bounds = array<i64: 1, 8, 8>}, {transform_indices = @transform_3, window_bounds = array<i64: 1, 8, 8>}, {pipeline_mode = #tpu.pipeline_mode<synchronous>, transform_indices = @transform_4, window_bounds = array<i64: 12, 8, 8>}, {pipeline_mode = #tpu.pipeline_mode<synchronous>, transform_indices = @transform_5, window_bounds = array<i64: 4, 4, 8, 32>}, {pipeline_mode = #tpu.pipeline_mode<synchronous>, transform_indices = @transform_6, window_bounds = array<i64: 4, 1, 32>}, {pipeline_mode = #tpu.pipeline_mode<synchronous>, transform_indices = @transform_7, window_bounds = array<i64: 6, 1, 32>}, {pipeline_mode = #tpu.pipeline_mode<synchronous>, transform_indices = @transform_8, window_bounds = array<i64: 6, 1, 32>}, {pipeline_mode = #tpu.pipeline_mode<synchronous>, transform_indices = @transform_9, window_bounds = array<i64: 2, 32, 64>}, {pipeline_mode = #tpu.pipeline_mode<synchronous>, transform_indices = @transform_10, window_bounds = array<i64: 2, 1, 64>}, {pipeline_mode = #tpu.pipeline_mode<synchronous>, transform_indices = @transform_11, window_bounds = array<i64: 2, 64, 32>}, {pipeline_mode = #tpu.pipeline_mode<synchronous>, transform_indices = @transform_12, window_bounds = array<i64: 2, 1, 32>}, {pipeline_mode = #tpu.pipeline_mode<synchronous>, transform_indices = @transform_13, window_bounds = array<i64: 32, 128>}, {pipeline_mode = #tpu.pipeline_mode<synchronous>, transform_indices = @transform_14, window_bounds = array<i64: 1, 128>}, {transform_indices = @transform_15, window_bounds = array<i64: 1, 8, 128>}]} {
    %c0 = arith.constant 0 : index
    %c0_0 = arith.constant 0 : index
    %c0_1 = arith.constant 0 : index
    %0 = vector.load %arg1[%c0, %c0_0, %c0_1] : memref<1x8x32xf32, #tpu.memory_space<vmem>>, vector<1x8x32xf32>
    %1 = vector.shape_cast %0 : vector<1x8x32xf32> to vector<8x32xf32>
    %c0_2 = arith.constant 0 : index
    %c0_3 = arith.constant 0 : index
    %c0_4 = arith.constant 0 : index
    %2 = vector.load %arg3[%c0_2, %c0_3, %c0_4] : memref<1x8x8xf32, #tpu.memory_space<vmem>>, vector<1x8x8xf32>
    %3 = vector.shape_cast %2 : vector<1x8x8xf32> to vector<8x8xf32>
    %c0_5 = arith.constant 0 : index
    %c0_6 = arith.constant 0 : index
    %c0_7 = arith.constant 0 : index
    %4 = vector.load %arg4[%c0_5, %c0_6, %c0_7] : memref<1x8x8xf32, #tpu.memory_space<vmem>>, vector<1x8x8xf32>
    %5 = vector.shape_cast %4 : vector<1x8x8xf32> to vector<8x8xf32>
    %c0_8 = arith.constant 0 : index
    %c0_9 = arith.constant 0 : index
    %c0_10 = arith.constant 0 : index
    %6 = vector.load %arg2[%c0_8, %c0_9, %c0_10] : memref<1x8x32xf32, #tpu.memory_space<vmem>>, vector<1x8x32xf32>
    %7 = vector.shape_cast %6 : vector<1x8x32xf32> to vector<8x32xf32>
    %8 = vector.extract_strided_slice %7 {offsets = [0, 0], sizes = [8, 8], strides = [1, 1]} : vector<8x32xf32> to vector<8x8xf32>
    %9 = vector.extract_strided_slice %7 {offsets = [0, 8], sizes = [8, 8], strides = [1, 1]} : vector<8x32xf32> to vector<8x8xf32>
    %10 = vector.extract_strided_slice %7 {offsets = [0, 16], sizes = [8, 8], strides = [1, 1]} : vector<8x32xf32> to vector<8x8xf32>
    %11 = vector.extract_strided_slice %7 {offsets = [0, 24], sizes = [8, 8], strides = [1, 1]} : vector<8x32xf32> to vector<8x8xf32>
    %12 = tpu.concatenate %8, %9, %10, %11 in 0 : vector<8x8xf32>, vector<8x8xf32>, vector<8x8xf32>, vector<8x8xf32> -> vector<32x8xf32>
    %13 = arith.truncf %12 : vector<32x8xf32> to vector<32x8xbf16>
    %14 = vector.extract_strided_slice %1 {offsets = [0, 0], sizes = [8, 8], strides = [1, 1]} : vector<8x32xf32> to vector<8x8xf32>
    %15 = vector.extract_strided_slice %1 {offsets = [0, 8], sizes = [8, 8], strides = [1, 1]} : vector<8x32xf32> to vector<8x8xf32>
    %16 = vector.extract_strided_slice %1 {offsets = [0, 16], sizes = [8, 8], strides = [1, 1]} : vector<8x32xf32> to vector<8x8xf32>
    %17 = vector.extract_strided_slice %1 {offsets = [0, 24], sizes = [8, 8], strides = [1, 1]} : vector<8x32xf32> to vector<8x8xf32>
    %18 = tpu.concatenate %14, %15, %16, %17 in 0 : vector<8x8xf32>, vector<8x8xf32>, vector<8x8xf32>, vector<8x8xf32> -> vector<32x8xf32>
    %19 = arith.truncf %18 : vector<32x8xf32> to vector<32x8xbf16>
    %c0_11 = arith.constant 0 : index
    %c0_12 = arith.constant 0 : index
    %c0_13 = arith.constant 0 : index
    %20 = vector.load %arg5[%c0_11, %c0_12, %c0_13] : memref<12x8x8xbf16, #tpu.memory_space<vmem>>, vector<1x8x8xbf16>
    %21 = vector.shape_cast %20 : vector<1x8x8xbf16> to vector<8x8xbf16>
    %c1 = arith.constant 1 : index
    %c0_14 = arith.constant 0 : index
    %c0_15 = arith.constant 0 : index
    %22 = vector.load %arg5[%c1, %c0_14, %c0_15] : memref<12x8x8xbf16, #tpu.memory_space<vmem>>, vector<1x8x8xbf16>
    %23 = vector.shape_cast %22 : vector<1x8x8xbf16> to vector<8x8xbf16>
    %c2 = arith.constant 2 : index
    %c0_16 = arith.constant 0 : index
    %c0_17 = arith.constant 0 : index
    %24 = vector.load %arg5[%c2, %c0_16, %c0_17] : memref<12x8x8xbf16, #tpu.memory_space<vmem>>, vector<1x8x8xbf16>
    %25 = vector.shape_cast %24 : vector<1x8x8xbf16> to vector<8x8xbf16>
    %cst = arith.constant dense<0.000000e+00> : vector<32x8xf32>
    %26 = tpu.matmul %19, %21, %cst {dimension_numbers = #tpu.dot_dimension_numbers<[1], [0], [0], [1], [0, 0, 1, 1], [], []>} : vector<32x8xbf16>, vector<8x8xbf16>, vector<32x8xf32> -> vector<32x8xf32>
    %cst_18 = arith.constant 0.176776692 : f32
    %27 = vector.broadcast %cst_18 : f32 to vector<32x8xf32>
    %28 = arith.mulf %26, %27 : vector<32x8xf32>
    %29 = vector.shape_cast %28 : vector<32x8xf32> to vector<4x8x8xf32>
    %30 = arith.truncf %29 : vector<4x8x8xf32> to vector<4x8x8xbf16>
    %cst_19 = arith.constant dense<0.000000e+00> : vector<32x8xf32>
    %31 = tpu.matmul %19, %23, %cst_19 {dimension_numbers = #tpu.dot_dimension_numbers<[1], [0], [0], [1], [0, 0, 1, 1], [], []>} : vector<32x8xbf16>, vector<8x8xbf16>, vector<32x8xf32> -> vector<32x8xf32>
    %32 = vector.shape_cast %31 : vector<32x8xf32> to vector<4x8x8xf32>
    %33 = arith.truncf %32 : vector<4x8x8xf32> to vector<4x8x8xbf16>
    %cst_20 = arith.constant dense<0.000000e+00> : vector<32x8xf32>
    %34 = tpu.matmul %19, %25, %cst_20 {dimension_numbers = #tpu.dot_dimension_numbers<[1], [0], [0], [1], [0, 0, 1, 1], [], []>} : vector<32x8xbf16>, vector<8x8xbf16>, vector<32x8xf32> -> vector<32x8xf32>
    %35 = vector.shape_cast %34 : vector<32x8xf32> to vector<4x8x8xf32>
    %36 = arith.truncf %35 : vector<4x8x8xf32> to vector<4x8x8xbf16>
    "tpu.trace_start"() <{level = 10 : i32, message = "hqd,hkd->hqk"}> : () -> ()
    %cst_21 = arith.constant dense<0.000000e+00> : vector<4x8x8xf32>
    %37 = tpu.matmul %30, %33, %cst_21 {dimension_numbers = #tpu.dot_dimension_numbers<[2], [2], [1], [1], [0, 0, 0, 1, 1, 1], [0], [0]>} : vector<4x8x8xbf16>, vector<4x8x8xbf16>, vector<4x8x8xf32> -> vector<4x8x8xf32>
    "tpu.trace_stop"() : () -> ()
    %38 = vector.shape_cast %3 : vector<8x8xf32> to vector<1x8x8xf32>
    %39 = vector.broadcast %38 : vector<1x8x8xf32> to vector<4x8x8xf32>
    %40 = arith.addf %37, %39 : vector<4x8x8xf32>
    %cst_22 = arith.constant dense<0xFF800000> : vector<4x8xf32>
    %41 = vector.multi_reduction <maximumf>, %40, %cst_22 [2] : vector<4x8x8xf32> to vector<4x8xf32>
    %42 = vector.shape_cast %41 : vector<4x8xf32> to vector<4x8x1xf32>
    %43 = vector.broadcast %42 : vector<4x8x1xf32> to vector<4x8x8xf32>
    %44 = arith.subf %40, %43 : vector<4x8x8xf32>
    %45 = math.exp %44 : vector<4x8x8xf32>
    %cst_23 = arith.constant dense<0.000000e+00> : vector<4x8xf32>
    %46 = vector.multi_reduction <add>, %45, %cst_23 [2] : vector<4x8x8xf32> to vector<4x8xf32>
    %47 = vector.shape_cast %46 : vector<4x8xf32> to vector<4x8x1xf32>
    %48 = tpu.reciprocal %47 {approx = true} : vector<4x8x1xf32> -> vector<4x8x1xf32>
    %49 = vector.broadcast %48 : vector<4x8x1xf32> to vector<4x8x8xf32>
    %50 = arith.mulf %45, %49 : vector<4x8x8xf32>
    %51 = arith.truncf %50 : vector<4x8x8xf32> to vector<4x8x8xbf16>
    "tpu.trace_start"() <{level = 10 : i32, message = "hqk,hkd->hqd"}> : () -> ()
    %cst_24 = arith.constant dense<0.000000e+00> : vector<4x8x8xf32>
    %52 = tpu.matmul %51, %36, %cst_24 {dimension_numbers = #tpu.dot_dimension_numbers<[2], [1], [1], [2], [0, 0, 0, 1, 1, 2], [0], [0]>} : vector<4x8x8xbf16>, vector<4x8x8xbf16>, vector<4x8x8xf32> -> vector<4x8x8xf32>
    "tpu.trace_stop"() : () -> ()
    %53 = arith.truncf %52 : vector<4x8x8xf32> to vector<4x8x8xbf16>
    %c0_25 = arith.constant 0 : index
    %c0_26 = arith.constant 0 : index
    %c0_27 = arith.constant 0 : index
    %c0_28 = arith.constant 0 : index
    %54 = vector.load %arg6[%c0_25, %c0_26, %c0_27, %c0_28] : memref<4x4x8x32xbf16, #tpu.memory_space<vmem>>, vector<1x4x8x32xbf16>
    %55 = vector.shape_cast %54 : vector<1x4x8x32xbf16> to vector<4x8x32xbf16>
    "tpu.trace_start"() <{level = 10 : i32, message = "hqd,hdf->hqf"}> : () -> ()
    %cst_29 = arith.constant dense<0.000000e+00> : vector<4x8x32xf32>
    %56 = tpu.matmul %53, %55, %cst_29 {dimension_numbers = #tpu.dot_dimension_numbers<[2], [1], [1], [2], [0, 0, 0, 1, 1, 2], [0], [0]>} : vector<4x8x8xbf16>, vector<4x8x32xbf16>, vector<4x8x32xf32> -> vector<4x8x32xf32>
    "tpu.trace_stop"() : () -> ()
    %cst_30 = arith.constant dense<0.000000e+00> : vector<8x32xf32>
    %57 = vector.multi_reduction <add>, %56, %cst_30 [0] : vector<4x8x32xf32> to vector<8x32xf32>
    %c0_31 = arith.constant 0 : index
    %c0_32 = arith.constant 0 : index
    %c0_33 = arith.constant 0 : index
    %58 = vector.load %arg7[%c0_31, %c0_32, %c0_33] : memref<4x1x32xf32, #tpu.memory_space<vmem>>, vector<1x1x32xf32>
    %59 = vector.shape_cast %58 : vector<1x1x32xf32> to vector<1x32xf32>
    %60 = vector.broadcast %59 : vector<1x32xf32> to vector<8x32xf32>
    %61 = arith.addf %57, %60 : vector<8x32xf32>
    %62 = arith.addf %61, %1 : vector<8x32xf32>
    %cst_34 = arith.constant dense<0.000000e+00> : vector<8xf32>
    %63 = vector.multi_reduction <add>, %62, %cst_34 [1] : vector<8x32xf32> to vector<8xf32>
    %64 = vector.shape_cast %63 : vector<8xf32> to vector<8x1xf32>
    %cst_35 = arith.constant 3.200000e+01 : f32
    %65 = vector.broadcast %cst_35 : f32 to vector<8x1xf32>
    %66 = arith.divf %64, %65 : vector<8x1xf32>
    %67 = vector.broadcast %66 : vector<8x1xf32> to vector<8x32xf32>
    %68 = arith.subf %62, %67 : vector<8x32xf32>
    %69 = arith.mulf %68, %68 : vector<8x32xf32>
    %cst_36 = arith.constant dense<0.000000e+00> : vector<8xf32>
    %70 = vector.multi_reduction <add>, %69, %cst_36 [1] : vector<8x32xf32> to vector<8xf32>
    %71 = vector.shape_cast %70 : vector<8xf32> to vector<8x1xf32>
    %cst_37 = arith.constant 3.200000e+01 : f32
    %72 = vector.broadcast %cst_37 : f32 to vector<8x1xf32>
    %73 = arith.divf %71, %72 : vector<8x1xf32>
    %74 = vector.broadcast %66 : vector<8x1xf32> to vector<8x32xf32>
    %75 = arith.subf %62, %74 : vector<8x32xf32>
    %cst_38 = arith.constant 9.99999974E-6 : f32
    %76 = vector.broadcast %cst_38 : f32 to vector<8x1xf32>
    %77 = arith.addf %73, %76 : vector<8x1xf32>
    %78 = math.rsqrt %77 : vector<8x1xf32>
    %79 = vector.broadcast %78 : vector<8x1xf32> to vector<8x32xf32>
    %80 = arith.mulf %75, %79 : vector<8x32xf32>
    %c0_39 = arith.constant 0 : index
    %c0_40 = arith.constant 0 : index
    %c0_41 = arith.constant 0 : index
    %81 = vector.load %arg8[%c0_39, %c0_40, %c0_41] : memref<6x1x32xf32, #tpu.memory_space<vmem>>, vector<1x1x32xf32>
    %82 = vector.shape_cast %81 : vector<1x1x32xf32> to vector<1x32xf32>
    %83 = vector.broadcast %82 : vector<1x32xf32> to vector<8x32xf32>
    %84 = arith.mulf %80, %83 : vector<8x32xf32>
    %c0_42 = arith.constant 0 : index
    %c0_43 = arith.constant 0 : index
    %c0_44 = arith.constant 0 : index
    %85 = vector.load %arg9[%c0_42, %c0_43, %c0_44] : memref<6x1x32xf32, #tpu.memory_space<vmem>>, vector<1x1x32xf32>
    %86 = vector.shape_cast %85 : vector<1x1x32xf32> to vector<1x32xf32>
    %87 = vector.broadcast %86 : vector<1x32xf32> to vector<8x32xf32>
    %88 = arith.addf %84, %87 : vector<8x32xf32>
    %89 = vector.extract_strided_slice %88 {offsets = [0, 0], sizes = [8, 8], strides = [1, 1]} : vector<8x32xf32> to vector<8x8xf32>
    %90 = vector.extract_strided_slice %88 {offsets = [0, 8], sizes = [8, 8], strides = [1, 1]} : vector<8x32xf32> to vector<8x8xf32>
    %91 = vector.extract_strided_slice %88 {offsets = [0, 16], sizes = [8, 8], strides = [1, 1]} : vector<8x32xf32> to vector<8x8xf32>
    %92 = vector.extract_strided_slice %88 {offsets = [0, 24], sizes = [8, 8], strides = [1, 1]} : vector<8x32xf32> to vector<8x8xf32>
    %93 = tpu.concatenate %89, %90, %91, %92 in 0 : vector<8x8xf32>, vector<8x8xf32>, vector<8x8xf32>, vector<8x8xf32> -> vector<32x8xf32>
    %94 = arith.truncf %93 : vector<32x8xf32> to vector<32x8xbf16>
    %c3 = arith.constant 3 : index
    %c0_45 = arith.constant 0 : index
    %c0_46 = arith.constant 0 : index
    %95 = vector.load %arg5[%c3, %c0_45, %c0_46] : memref<12x8x8xbf16, #tpu.memory_space<vmem>>, vector<1x8x8xbf16>
    %96 = vector.shape_cast %95 : vector<1x8x8xbf16> to vector<8x8xbf16>
    %c4 = arith.constant 4 : index
    %c0_47 = arith.constant 0 : index
    %c0_48 = arith.constant 0 : index
    %97 = vector.load %arg5[%c4, %c0_47, %c0_48] : memref<12x8x8xbf16, #tpu.memory_space<vmem>>, vector<1x8x8xbf16>
    %98 = vector.shape_cast %97 : vector<1x8x8xbf16> to vector<8x8xbf16>
    %c5 = arith.constant 5 : index
    %c0_49 = arith.constant 0 : index
    %c0_50 = arith.constant 0 : index
    %99 = vector.load %arg5[%c5, %c0_49, %c0_50] : memref<12x8x8xbf16, #tpu.memory_space<vmem>>, vector<1x8x8xbf16>
    %100 = vector.shape_cast %99 : vector<1x8x8xbf16> to vector<8x8xbf16>
    %cst_51 = arith.constant dense<0.000000e+00> : vector<32x8xf32>
    %101 = tpu.matmul %94, %96, %cst_51 {dimension_numbers = #tpu.dot_dimension_numbers<[1], [0], [0], [1], [0, 0, 1, 1], [], []>} : vector<32x8xbf16>, vector<8x8xbf16>, vector<32x8xf32> -> vector<32x8xf32>
    %cst_52 = arith.constant 0.176776692 : f32
    %102 = vector.broadcast %cst_52 : f32 to vector<32x8xf32>
    %103 = arith.mulf %101, %102 : vector<32x8xf32>
    %104 = vector.shape_cast %103 : vector<32x8xf32> to vector<4x8x8xf32>
    %105 = arith.truncf %104 : vector<4x8x8xf32> to vector<4x8x8xbf16>
    %cst_53 = arith.constant dense<0.000000e+00> : vector<32x8xf32>
    %106 = tpu.matmul %13, %98, %cst_53 {dimension_numbers = #tpu.dot_dimension_numbers<[1], [0], [0], [1], [0, 0, 1, 1], [], []>} : vector<32x8xbf16>, vector<8x8xbf16>, vector<32x8xf32> -> vector<32x8xf32>
    %107 = vector.shape_cast %106 : vector<32x8xf32> to vector<4x8x8xf32>
    %108 = arith.truncf %107 : vector<4x8x8xf32> to vector<4x8x8xbf16>
    %cst_54 = arith.constant dense<0.000000e+00> : vector<32x8xf32>
    %109 = tpu.matmul %13, %100, %cst_54 {dimension_numbers = #tpu.dot_dimension_numbers<[1], [0], [0], [1], [0, 0, 1, 1], [], []>} : vector<32x8xbf16>, vector<8x8xbf16>, vector<32x8xf32> -> vector<32x8xf32>
    %110 = vector.shape_cast %109 : vector<32x8xf32> to vector<4x8x8xf32>
    %111 = arith.truncf %110 : vector<4x8x8xf32> to vector<4x8x8xbf16>
    "tpu.trace_start"() <{level = 10 : i32, message = "hqd,hkd->hqk"}> : () -> ()
    %cst_55 = arith.constant dense<0.000000e+00> : vector<4x8x8xf32>
    %112 = tpu.matmul %105, %108, %cst_55 {dimension_numbers = #tpu.dot_dimension_numbers<[2], [2], [1], [1], [0, 0, 0, 1, 1, 1], [0], [0]>} : vector<4x8x8xbf16>, vector<4x8x8xbf16>, vector<4x8x8xf32> -> vector<4x8x8xf32>
    "tpu.trace_stop"() : () -> ()
    %113 = vector.shape_cast %5 : vector<8x8xf32> to vector<1x8x8xf32>
    %114 = vector.broadcast %113 : vector<1x8x8xf32> to vector<4x8x8xf32>
    %115 = arith.addf %112, %114 : vector<4x8x8xf32>
    %cst_56 = arith.constant dense<0xFF800000> : vector<4x8xf32>
    %116 = vector.multi_reduction <maximumf>, %115, %cst_56 [2] : vector<4x8x8xf32> to vector<4x8xf32>
    %117 = vector.shape_cast %116 : vector<4x8xf32> to vector<4x8x1xf32>
    %118 = vector.broadcast %117 : vector<4x8x1xf32> to vector<4x8x8xf32>
    %119 = arith.subf %115, %118 : vector<4x8x8xf32>
    %120 = math.exp %119 : vector<4x8x8xf32>
    %cst_57 = arith.constant dense<0.000000e+00> : vector<4x8xf32>
    %121 = vector.multi_reduction <add>, %120, %cst_57 [2] : vector<4x8x8xf32> to vector<4x8xf32>
    %122 = vector.shape_cast %121 : vector<4x8xf32> to vector<4x8x1xf32>
    %123 = tpu.reciprocal %122 {approx = true} : vector<4x8x1xf32> -> vector<4x8x1xf32>
    %124 = vector.broadcast %123 : vector<4x8x1xf32> to vector<4x8x8xf32>
    %125 = arith.mulf %120, %124 : vector<4x8x8xf32>
    %126 = arith.truncf %125 : vector<4x8x8xf32> to vector<4x8x8xbf16>
    "tpu.trace_start"() <{level = 10 : i32, message = "hqk,hkd->hqd"}> : () -> ()
    %cst_58 = arith.constant dense<0.000000e+00> : vector<4x8x8xf32>
    %127 = tpu.matmul %126, %111, %cst_58 {dimension_numbers = #tpu.dot_dimension_numbers<[2], [1], [1], [2], [0, 0, 0, 1, 1, 2], [0], [0]>} : vector<4x8x8xbf16>, vector<4x8x8xbf16>, vector<4x8x8xf32> -> vector<4x8x8xf32>
    "tpu.trace_stop"() : () -> ()
    %128 = arith.truncf %127 : vector<4x8x8xf32> to vector<4x8x8xbf16>
    %c1_59 = arith.constant 1 : index
    %c0_60 = arith.constant 0 : index
    %c0_61 = arith.constant 0 : index
    %c0_62 = arith.constant 0 : index
    %129 = vector.load %arg6[%c1_59, %c0_60, %c0_61, %c0_62] : memref<4x4x8x32xbf16, #tpu.memory_space<vmem>>, vector<1x4x8x32xbf16>
    %130 = vector.shape_cast %129 : vector<1x4x8x32xbf16> to vector<4x8x32xbf16>
    "tpu.trace_start"() <{level = 10 : i32, message = "hqd,hdf->hqf"}> : () -> ()
    %cst_63 = arith.constant dense<0.000000e+00> : vector<4x8x32xf32>
    %131 = tpu.matmul %128, %130, %cst_63 {dimension_numbers = #tpu.dot_dimension_numbers<[2], [1], [1], [2], [0, 0, 0, 1, 1, 2], [0], [0]>} : vector<4x8x8xbf16>, vector<4x8x32xbf16>, vector<4x8x32xf32> -> vector<4x8x32xf32>
    "tpu.trace_stop"() : () -> ()
    %cst_64 = arith.constant dense<0.000000e+00> : vector<8x32xf32>
    %132 = vector.multi_reduction <add>, %131, %cst_64 [0] : vector<4x8x32xf32> to vector<8x32xf32>
    %c1_65 = arith.constant 1 : index
    %c0_66 = arith.constant 0 : index
    %c0_67 = arith.constant 0 : index
    %133 = vector.load %arg7[%c1_65, %c0_66, %c0_67] : memref<4x1x32xf32, #tpu.memory_space<vmem>>, vector<1x1x32xf32>
    %134 = vector.shape_cast %133 : vector<1x1x32xf32> to vector<1x32xf32>
    %135 = vector.broadcast %134 : vector<1x32xf32> to vector<8x32xf32>
    %136 = arith.addf %132, %135 : vector<8x32xf32>
    %137 = arith.addf %136, %88 : vector<8x32xf32>
    %cst_68 = arith.constant dense<0.000000e+00> : vector<8xf32>
    %138 = vector.multi_reduction <add>, %137, %cst_68 [1] : vector<8x32xf32> to vector<8xf32>
    %139 = vector.shape_cast %138 : vector<8xf32> to vector<8x1xf32>
    %cst_69 = arith.constant 3.200000e+01 : f32
    %140 = vector.broadcast %cst_69 : f32 to vector<8x1xf32>
    %141 = arith.divf %139, %140 : vector<8x1xf32>
    %142 = vector.broadcast %141 : vector<8x1xf32> to vector<8x32xf32>
    %143 = arith.subf %137, %142 : vector<8x32xf32>
    %144 = arith.mulf %143, %143 : vector<8x32xf32>
    %cst_70 = arith.constant dense<0.000000e+00> : vector<8xf32>
    %145 = vector.multi_reduction <add>, %144, %cst_70 [1] : vector<8x32xf32> to vector<8xf32>
    %146 = vector.shape_cast %145 : vector<8xf32> to vector<8x1xf32>
    %cst_71 = arith.constant 3.200000e+01 : f32
    %147 = vector.broadcast %cst_71 : f32 to vector<8x1xf32>
    %148 = arith.divf %146, %147 : vector<8x1xf32>
    %149 = vector.broadcast %141 : vector<8x1xf32> to vector<8x32xf32>
    %150 = arith.subf %137, %149 : vector<8x32xf32>
    %cst_72 = arith.constant 9.99999974E-6 : f32
    %151 = vector.broadcast %cst_72 : f32 to vector<8x1xf32>
    %152 = arith.addf %148, %151 : vector<8x1xf32>
    %153 = math.rsqrt %152 : vector<8x1xf32>
    %154 = vector.broadcast %153 : vector<8x1xf32> to vector<8x32xf32>
    %155 = arith.mulf %150, %154 : vector<8x32xf32>
    %c1_73 = arith.constant 1 : index
    %c0_74 = arith.constant 0 : index
    %c0_75 = arith.constant 0 : index
    %156 = vector.load %arg8[%c1_73, %c0_74, %c0_75] : memref<6x1x32xf32, #tpu.memory_space<vmem>>, vector<1x1x32xf32>
    %157 = vector.shape_cast %156 : vector<1x1x32xf32> to vector<1x32xf32>
    %158 = vector.broadcast %157 : vector<1x32xf32> to vector<8x32xf32>
    %159 = arith.mulf %155, %158 : vector<8x32xf32>
    %c1_76 = arith.constant 1 : index
    %c0_77 = arith.constant 0 : index
    %c0_78 = arith.constant 0 : index
    %160 = vector.load %arg9[%c1_76, %c0_77, %c0_78] : memref<6x1x32xf32, #tpu.memory_space<vmem>>, vector<1x1x32xf32>
    %161 = vector.shape_cast %160 : vector<1x1x32xf32> to vector<1x32xf32>
    %162 = vector.broadcast %161 : vector<1x32xf32> to vector<8x32xf32>
    %163 = arith.addf %159, %162 : vector<8x32xf32>
    %164 = arith.truncf %163 : vector<8x32xf32> to vector<8x32xbf16>
    %c0_79 = arith.constant 0 : index
    %c0_80 = arith.constant 0 : index
    %c0_81 = arith.constant 0 : index
    %165 = vector.load %arg10[%c0_79, %c0_80, %c0_81] : memref<2x32x64xbf16, #tpu.memory_space<vmem>>, vector<1x32x64xbf16>
    %166 = vector.shape_cast %165 : vector<1x32x64xbf16> to vector<32x64xbf16>
    %cst_82 = arith.constant dense<0.000000e+00> : vector<8x64xf32>
    %167 = tpu.matmul %164, %166, %cst_82 {dimension_numbers = #tpu.dot_dimension_numbers<[1], [0], [0], [1], [0, 0, 1, 1], [], []>} : vector<8x32xbf16>, vector<32x64xbf16>, vector<8x64xf32> -> vector<8x64xf32>
    %c0_83 = arith.constant 0 : index
    %c0_84 = arith.constant 0 : index
    %c0_85 = arith.constant 0 : index
    %168 = vector.load %arg11[%c0_83, %c0_84, %c0_85] : memref<2x1x64xf32, #tpu.memory_space<vmem>>, vector<1x1x64xf32>
    %169 = vector.shape_cast %168 : vector<1x1x64xf32> to vector<1x64xf32>
    %170 = vector.broadcast %169 : vector<1x64xf32> to vector<8x64xf32>
    %171 = arith.addf %167, %170 : vector<8x64xf32>
    %cst_86 = arith.constant 0.000000e+00 : f32
    %172 = vector.broadcast %cst_86 : f32 to vector<8x64xf32>
    %173 = arith.maximumf %171, %172 : vector<8x64xf32>
    %174 = arith.truncf %173 : vector<8x64xf32> to vector<8x64xbf16>
    %c0_87 = arith.constant 0 : index
    %c0_88 = arith.constant 0 : index
    %c0_89 = arith.constant 0 : index
    %175 = vector.load %arg12[%c0_87, %c0_88, %c0_89] : memref<2x64x32xbf16, #tpu.memory_space<vmem>>, vector<1x64x32xbf16>
    %176 = vector.shape_cast %175 : vector<1x64x32xbf16> to vector<64x32xbf16>
    %cst_90 = arith.constant dense<0.000000e+00> : vector<8x32xf32>
    %177 = tpu.matmul %174, %176, %cst_90 {dimension_numbers = #tpu.dot_dimension_numbers<[1], [0], [0], [1], [0, 0, 1, 1], [], []>} : vector<8x64xbf16>, vector<64x32xbf16>, vector<8x32xf32> -> vector<8x32xf32>
    %c0_91 = arith.constant 0 : index
    %c0_92 = arith.constant 0 : index
    %c0_93 = arith.constant 0 : index
    %178 = vector.load %arg13[%c0_91, %c0_92, %c0_93] : memref<2x1x32xf32, #tpu.memory_space<vmem>>, vector<1x1x32xf32>
    %179 = vector.shape_cast %178 : vector<1x1x32xf32> to vector<1x32xf32>
    %180 = vector.broadcast %179 : vector<1x32xf32> to vector<8x32xf32>
    %181 = arith.addf %177, %180 : vector<8x32xf32>
    %182 = arith.addf %181, %163 : vector<8x32xf32>
    %cst_94 = arith.constant dense<0.000000e+00> : vector<8xf32>
    %183 = vector.multi_reduction <add>, %182, %cst_94 [1] : vector<8x32xf32> to vector<8xf32>
    %184 = vector.shape_cast %183 : vector<8xf32> to vector<8x1xf32>
    %cst_95 = arith.constant 3.200000e+01 : f32
    %185 = vector.broadcast %cst_95 : f32 to vector<8x1xf32>
    %186 = arith.divf %184, %185 : vector<8x1xf32>
    %187 = vector.broadcast %186 : vector<8x1xf32> to vector<8x32xf32>
    %188 = arith.subf %182, %187 : vector<8x32xf32>
    %189 = arith.mulf %188, %188 : vector<8x32xf32>
    %cst_96 = arith.constant dense<0.000000e+00> : vector<8xf32>
    %190 = vector.multi_reduction <add>, %189, %cst_96 [1] : vector<8x32xf32> to vector<8xf32>
    %191 = vector.shape_cast %190 : vector<8xf32> to vector<8x1xf32>
    %cst_97 = arith.constant 3.200000e+01 : f32
    %192 = vector.broadcast %cst_97 : f32 to vector<8x1xf32>
    %193 = arith.divf %191, %192 : vector<8x1xf32>
    %194 = vector.broadcast %186 : vector<8x1xf32> to vector<8x32xf32>
    %195 = arith.subf %182, %194 : vector<8x32xf32>
    %cst_98 = arith.constant 9.99999974E-6 : f32
    %196 = vector.broadcast %cst_98 : f32 to vector<8x1xf32>
    %197 = arith.addf %193, %196 : vector<8x1xf32>
    %198 = math.rsqrt %197 : vector<8x1xf32>
    %199 = vector.broadcast %198 : vector<8x1xf32> to vector<8x32xf32>
    %200 = arith.mulf %195, %199 : vector<8x32xf32>
    %c2_99 = arith.constant 2 : index
    %c0_100 = arith.constant 0 : index
    %c0_101 = arith.constant 0 : index
    %201 = vector.load %arg8[%c2_99, %c0_100, %c0_101] : memref<6x1x32xf32, #tpu.memory_space<vmem>>, vector<1x1x32xf32>
    %202 = vector.shape_cast %201 : vector<1x1x32xf32> to vector<1x32xf32>
    %203 = vector.broadcast %202 : vector<1x32xf32> to vector<8x32xf32>
    %204 = arith.mulf %200, %203 : vector<8x32xf32>
    %c2_102 = arith.constant 2 : index
    %c0_103 = arith.constant 0 : index
    %c0_104 = arith.constant 0 : index
    %205 = vector.load %arg9[%c2_102, %c0_103, %c0_104] : memref<6x1x32xf32, #tpu.memory_space<vmem>>, vector<1x1x32xf32>
    %206 = vector.shape_cast %205 : vector<1x1x32xf32> to vector<1x32xf32>
    %207 = vector.broadcast %206 : vector<1x32xf32> to vector<8x32xf32>
    %208 = arith.addf %204, %207 : vector<8x32xf32>
    %209 = vector.extract_strided_slice %208 {offsets = [0, 0], sizes = [8, 8], strides = [1, 1]} : vector<8x32xf32> to vector<8x8xf32>
    %210 = vector.extract_strided_slice %208 {offsets = [0, 8], sizes = [8, 8], strides = [1, 1]} : vector<8x32xf32> to vector<8x8xf32>
    %211 = vector.extract_strided_slice %208 {offsets = [0, 16], sizes = [8, 8], strides = [1, 1]} : vector<8x32xf32> to vector<8x8xf32>
    %212 = vector.extract_strided_slice %208 {offsets = [0, 24], sizes = [8, 8], strides = [1, 1]} : vector<8x32xf32> to vector<8x8xf32>
    %213 = tpu.concatenate %209, %210, %211, %212 in 0 : vector<8x8xf32>, vector<8x8xf32>, vector<8x8xf32>, vector<8x8xf32> -> vector<32x8xf32>
    %214 = arith.truncf %213 : vector<32x8xf32> to vector<32x8xbf16>
    %c6 = arith.constant 6 : index
    %c0_105 = arith.constant 0 : index
    %c0_106 = arith.constant 0 : index
    %215 = vector.load %arg5[%c6, %c0_105, %c0_106] : memref<12x8x8xbf16, #tpu.memory_space<vmem>>, vector<1x8x8xbf16>
    %216 = vector.shape_cast %215 : vector<1x8x8xbf16> to vector<8x8xbf16>
    %c7 = arith.constant 7 : index
    %c0_107 = arith.constant 0 : index
    %c0_108 = arith.constant 0 : index
    %217 = vector.load %arg5[%c7, %c0_107, %c0_108] : memref<12x8x8xbf16, #tpu.memory_space<vmem>>, vector<1x8x8xbf16>
    %218 = vector.shape_cast %217 : vector<1x8x8xbf16> to vector<8x8xbf16>
    %c8 = arith.constant 8 : index
    %c0_109 = arith.constant 0 : index
    %c0_110 = arith.constant 0 : index
    %219 = vector.load %arg5[%c8, %c0_109, %c0_110] : memref<12x8x8xbf16, #tpu.memory_space<vmem>>, vector<1x8x8xbf16>
    %220 = vector.shape_cast %219 : vector<1x8x8xbf16> to vector<8x8xbf16>
    %cst_111 = arith.constant dense<0.000000e+00> : vector<32x8xf32>
    %221 = tpu.matmul %214, %216, %cst_111 {dimension_numbers = #tpu.dot_dimension_numbers<[1], [0], [0], [1], [0, 0, 1, 1], [], []>} : vector<32x8xbf16>, vector<8x8xbf16>, vector<32x8xf32> -> vector<32x8xf32>
    %cst_112 = arith.constant 0.176776692 : f32
    %222 = vector.broadcast %cst_112 : f32 to vector<32x8xf32>
    %223 = arith.mulf %221, %222 : vector<32x8xf32>
    %224 = vector.shape_cast %223 : vector<32x8xf32> to vector<4x8x8xf32>
    %225 = arith.truncf %224 : vector<4x8x8xf32> to vector<4x8x8xbf16>
    %cst_113 = arith.constant dense<0.000000e+00> : vector<32x8xf32>
    %226 = tpu.matmul %214, %218, %cst_113 {dimension_numbers = #tpu.dot_dimension_numbers<[1], [0], [0], [1], [0, 0, 1, 1], [], []>} : vector<32x8xbf16>, vector<8x8xbf16>, vector<32x8xf32> -> vector<32x8xf32>
    %227 = vector.shape_cast %226 : vector<32x8xf32> to vector<4x8x8xf32>
    %228 = arith.truncf %227 : vector<4x8x8xf32> to vector<4x8x8xbf16>
    %cst_114 = arith.constant dense<0.000000e+00> : vector<32x8xf32>
    %229 = tpu.matmul %214, %220, %cst_114 {dimension_numbers = #tpu.dot_dimension_numbers<[1], [0], [0], [1], [0, 0, 1, 1], [], []>} : vector<32x8xbf16>, vector<8x8xbf16>, vector<32x8xf32> -> vector<32x8xf32>
    %230 = vector.shape_cast %229 : vector<32x8xf32> to vector<4x8x8xf32>
    %231 = arith.truncf %230 : vector<4x8x8xf32> to vector<4x8x8xbf16>
    "tpu.trace_start"() <{level = 10 : i32, message = "hqd,hkd->hqk"}> : () -> ()
    %cst_115 = arith.constant dense<0.000000e+00> : vector<4x8x8xf32>
    %232 = tpu.matmul %225, %228, %cst_115 {dimension_numbers = #tpu.dot_dimension_numbers<[2], [2], [1], [1], [0, 0, 0, 1, 1, 1], [0], [0]>} : vector<4x8x8xbf16>, vector<4x8x8xbf16>, vector<4x8x8xf32> -> vector<4x8x8xf32>
    "tpu.trace_stop"() : () -> ()
    %233 = vector.shape_cast %3 : vector<8x8xf32> to vector<1x8x8xf32>
    %234 = vector.broadcast %233 : vector<1x8x8xf32> to vector<4x8x8xf32>
    %235 = arith.addf %232, %234 : vector<4x8x8xf32>
    %cst_116 = arith.constant dense<0xFF800000> : vector<4x8xf32>
    %236 = vector.multi_reduction <maximumf>, %235, %cst_116 [2] : vector<4x8x8xf32> to vector<4x8xf32>
    %237 = vector.shape_cast %236 : vector<4x8xf32> to vector<4x8x1xf32>
    %238 = vector.broadcast %237 : vector<4x8x1xf32> to vector<4x8x8xf32>
    %239 = arith.subf %235, %238 : vector<4x8x8xf32>
    %240 = math.exp %239 : vector<4x8x8xf32>
    %cst_117 = arith.constant dense<0.000000e+00> : vector<4x8xf32>
    %241 = vector.multi_reduction <add>, %240, %cst_117 [2] : vector<4x8x8xf32> to vector<4x8xf32>
    %242 = vector.shape_cast %241 : vector<4x8xf32> to vector<4x8x1xf32>
    %243 = tpu.reciprocal %242 {approx = true} : vector<4x8x1xf32> -> vector<4x8x1xf32>
    %244 = vector.broadcast %243 : vector<4x8x1xf32> to vector<4x8x8xf32>
    %245 = arith.mulf %240, %244 : vector<4x8x8xf32>
    %246 = arith.truncf %245 : vector<4x8x8xf32> to vector<4x8x8xbf16>
    "tpu.trace_start"() <{level = 10 : i32, message = "hqk,hkd->hqd"}> : () -> ()
    %cst_118 = arith.constant dense<0.000000e+00> : vector<4x8x8xf32>
    %247 = tpu.matmul %246, %231, %cst_118 {dimension_numbers = #tpu.dot_dimension_numbers<[2], [1], [1], [2], [0, 0, 0, 1, 1, 2], [0], [0]>} : vector<4x8x8xbf16>, vector<4x8x8xbf16>, vector<4x8x8xf32> -> vector<4x8x8xf32>
    "tpu.trace_stop"() : () -> ()
    %248 = arith.truncf %247 : vector<4x8x8xf32> to vector<4x8x8xbf16>
    %c2_119 = arith.constant 2 : index
    %c0_120 = arith.constant 0 : index
    %c0_121 = arith.constant 0 : index
    %c0_122 = arith.constant 0 : index
    %249 = vector.load %arg6[%c2_119, %c0_120, %c0_121, %c0_122] : memref<4x4x8x32xbf16, #tpu.memory_space<vmem>>, vector<1x4x8x32xbf16>
    %250 = vector.shape_cast %249 : vector<1x4x8x32xbf16> to vector<4x8x32xbf16>
    "tpu.trace_start"() <{level = 10 : i32, message = "hqd,hdf->hqf"}> : () -> ()
    %cst_123 = arith.constant dense<0.000000e+00> : vector<4x8x32xf32>
    %251 = tpu.matmul %248, %250, %cst_123 {dimension_numbers = #tpu.dot_dimension_numbers<[2], [1], [1], [2], [0, 0, 0, 1, 1, 2], [0], [0]>} : vector<4x8x8xbf16>, vector<4x8x32xbf16>, vector<4x8x32xf32> -> vector<4x8x32xf32>
    "tpu.trace_stop"() : () -> ()
    %cst_124 = arith.constant dense<0.000000e+00> : vector<8x32xf32>
    %252 = vector.multi_reduction <add>, %251, %cst_124 [0] : vector<4x8x32xf32> to vector<8x32xf32>
    %c2_125 = arith.constant 2 : index
    %c0_126 = arith.constant 0 : index
    %c0_127 = arith.constant 0 : index
    %253 = vector.load %arg7[%c2_125, %c0_126, %c0_127] : memref<4x1x32xf32, #tpu.memory_space<vmem>>, vector<1x1x32xf32>
    %254 = vector.shape_cast %253 : vector<1x1x32xf32> to vector<1x32xf32>
    %255 = vector.broadcast %254 : vector<1x32xf32> to vector<8x32xf32>
    %256 = arith.addf %252, %255 : vector<8x32xf32>
    %257 = arith.addf %256, %208 : vector<8x32xf32>
    %cst_128 = arith.constant dense<0.000000e+00> : vector<8xf32>
    %258 = vector.multi_reduction <add>, %257, %cst_128 [1] : vector<8x32xf32> to vector<8xf32>
    %259 = vector.shape_cast %258 : vector<8xf32> to vector<8x1xf32>
    %cst_129 = arith.constant 3.200000e+01 : f32
    %260 = vector.broadcast %cst_129 : f32 to vector<8x1xf32>
    %261 = arith.divf %259, %260 : vector<8x1xf32>
    %262 = vector.broadcast %261 : vector<8x1xf32> to vector<8x32xf32>
    %263 = arith.subf %257, %262 : vector<8x32xf32>
    %264 = arith.mulf %263, %263 : vector<8x32xf32>
    %cst_130 = arith.constant dense<0.000000e+00> : vector<8xf32>
    %265 = vector.multi_reduction <add>, %264, %cst_130 [1] : vector<8x32xf32> to vector<8xf32>
    %266 = vector.shape_cast %265 : vector<8xf32> to vector<8x1xf32>
    %cst_131 = arith.constant 3.200000e+01 : f32
    %267 = vector.broadcast %cst_131 : f32 to vector<8x1xf32>
    %268 = arith.divf %266, %267 : vector<8x1xf32>
    %269 = vector.broadcast %261 : vector<8x1xf32> to vector<8x32xf32>
    %270 = arith.subf %257, %269 : vector<8x32xf32>
    %cst_132 = arith.constant 9.99999974E-6 : f32
    %271 = vector.broadcast %cst_132 : f32 to vector<8x1xf32>
    %272 = arith.addf %268, %271 : vector<8x1xf32>
    %273 = math.rsqrt %272 : vector<8x1xf32>
    %274 = vector.broadcast %273 : vector<8x1xf32> to vector<8x32xf32>
    %275 = arith.mulf %270, %274 : vector<8x32xf32>
    %c3_133 = arith.constant 3 : index
    %c0_134 = arith.constant 0 : index
    %c0_135 = arith.constant 0 : index
    %276 = vector.load %arg8[%c3_133, %c0_134, %c0_135] : memref<6x1x32xf32, #tpu.memory_space<vmem>>, vector<1x1x32xf32>
    %277 = vector.shape_cast %276 : vector<1x1x32xf32> to vector<1x32xf32>
    %278 = vector.broadcast %277 : vector<1x32xf32> to vector<8x32xf32>
    %279 = arith.mulf %275, %278 : vector<8x32xf32>
    %c3_136 = arith.constant 3 : index
    %c0_137 = arith.constant 0 : index
    %c0_138 = arith.constant 0 : index
    %280 = vector.load %arg9[%c3_136, %c0_137, %c0_138] : memref<6x1x32xf32, #tpu.memory_space<vmem>>, vector<1x1x32xf32>
    %281 = vector.shape_cast %280 : vector<1x1x32xf32> to vector<1x32xf32>
    %282 = vector.broadcast %281 : vector<1x32xf32> to vector<8x32xf32>
    %283 = arith.addf %279, %282 : vector<8x32xf32>
    %284 = vector.extract_strided_slice %283 {offsets = [0, 0], sizes = [8, 8], strides = [1, 1]} : vector<8x32xf32> to vector<8x8xf32>
    %285 = vector.extract_strided_slice %283 {offsets = [0, 8], sizes = [8, 8], strides = [1, 1]} : vector<8x32xf32> to vector<8x8xf32>
    %286 = vector.extract_strided_slice %283 {offsets = [0, 16], sizes = [8, 8], strides = [1, 1]} : vector<8x32xf32> to vector<8x8xf32>
    %287 = vector.extract_strided_slice %283 {offsets = [0, 24], sizes = [8, 8], strides = [1, 1]} : vector<8x32xf32> to vector<8x8xf32>
    %288 = tpu.concatenate %284, %285, %286, %287 in 0 : vector<8x8xf32>, vector<8x8xf32>, vector<8x8xf32>, vector<8x8xf32> -> vector<32x8xf32>
    %289 = arith.truncf %288 : vector<32x8xf32> to vector<32x8xbf16>
    %c9 = arith.constant 9 : index
    %c0_139 = arith.constant 0 : index
    %c0_140 = arith.constant 0 : index
    %290 = vector.load %arg5[%c9, %c0_139, %c0_140] : memref<12x8x8xbf16, #tpu.memory_space<vmem>>, vector<1x8x8xbf16>
    %291 = vector.shape_cast %290 : vector<1x8x8xbf16> to vector<8x8xbf16>
    %c10 = arith.constant 10 : index
    %c0_141 = arith.constant 0 : index
    %c0_142 = arith.constant 0 : index
    %292 = vector.load %arg5[%c10, %c0_141, %c0_142] : memref<12x8x8xbf16, #tpu.memory_space<vmem>>, vector<1x8x8xbf16>
    %293 = vector.shape_cast %292 : vector<1x8x8xbf16> to vector<8x8xbf16>
    %c11 = arith.constant 11 : index
    %c0_143 = arith.constant 0 : index
    %c0_144 = arith.constant 0 : index
    %294 = vector.load %arg5[%c11, %c0_143, %c0_144] : memref<12x8x8xbf16, #tpu.memory_space<vmem>>, vector<1x8x8xbf16>
    %295 = vector.shape_cast %294 : vector<1x8x8xbf16> to vector<8x8xbf16>
    %cst_145 = arith.constant dense<0.000000e+00> : vector<32x8xf32>
    %296 = tpu.matmul %289, %291, %cst_145 {dimension_numbers = #tpu.dot_dimension_numbers<[1], [0], [0], [1], [0, 0, 1, 1], [], []>} : vector<32x8xbf16>, vector<8x8xbf16>, vector<32x8xf32> -> vector<32x8xf32>
    %cst_146 = arith.constant 0.176776692 : f32
    %297 = vector.broadcast %cst_146 : f32 to vector<32x8xf32>
    %298 = arith.mulf %296, %297 : vector<32x8xf32>
    %299 = vector.shape_cast %298 : vector<32x8xf32> to vector<4x8x8xf32>
    %300 = arith.truncf %299 : vector<4x8x8xf32> to vector<4x8x8xbf16>
    %cst_147 = arith.constant dense<0.000000e+00> : vector<32x8xf32>
    %301 = tpu.matmul %13, %293, %cst_147 {dimension_numbers = #tpu.dot_dimension_numbers<[1], [0], [0], [1], [0, 0, 1, 1], [], []>} : vector<32x8xbf16>, vector<8x8xbf16>, vector<32x8xf32> -> vector<32x8xf32>
    %302 = vector.shape_cast %301 : vector<32x8xf32> to vector<4x8x8xf32>
    %303 = arith.truncf %302 : vector<4x8x8xf32> to vector<4x8x8xbf16>
    %cst_148 = arith.constant dense<0.000000e+00> : vector<32x8xf32>
    %304 = tpu.matmul %13, %295, %cst_148 {dimension_numbers = #tpu.dot_dimension_numbers<[1], [0], [0], [1], [0, 0, 1, 1], [], []>} : vector<32x8xbf16>, vector<8x8xbf16>, vector<32x8xf32> -> vector<32x8xf32>
    %305 = vector.shape_cast %304 : vector<32x8xf32> to vector<4x8x8xf32>
    %306 = arith.truncf %305 : vector<4x8x8xf32> to vector<4x8x8xbf16>
    "tpu.trace_start"() <{level = 10 : i32, message = "hqd,hkd->hqk"}> : () -> ()
    %cst_149 = arith.constant dense<0.000000e+00> : vector<4x8x8xf32>
    %307 = tpu.matmul %300, %303, %cst_149 {dimension_numbers = #tpu.dot_dimension_numbers<[2], [2], [1], [1], [0, 0, 0, 1, 1, 1], [0], [0]>} : vector<4x8x8xbf16>, vector<4x8x8xbf16>, vector<4x8x8xf32> -> vector<4x8x8xf32>
    "tpu.trace_stop"() : () -> ()
    %308 = vector.shape_cast %5 : vector<8x8xf32> to vector<1x8x8xf32>
    %309 = vector.broadcast %308 : vector<1x8x8xf32> to vector<4x8x8xf32>
    %310 = arith.addf %307, %309 : vector<4x8x8xf32>
    %cst_150 = arith.constant dense<0xFF800000> : vector<4x8xf32>
    %311 = vector.multi_reduction <maximumf>, %310, %cst_150 [2] : vector<4x8x8xf32> to vector<4x8xf32>
    %312 = vector.shape_cast %311 : vector<4x8xf32> to vector<4x8x1xf32>
    %313 = vector.broadcast %312 : vector<4x8x1xf32> to vector<4x8x8xf32>
    %314 = arith.subf %310, %313 : vector<4x8x8xf32>
    %315 = math.exp %314 : vector<4x8x8xf32>
    %cst_151 = arith.constant dense<0.000000e+00> : vector<4x8xf32>
    %316 = vector.multi_reduction <add>, %315, %cst_151 [2] : vector<4x8x8xf32> to vector<4x8xf32>
    %317 = vector.shape_cast %316 : vector<4x8xf32> to vector<4x8x1xf32>
    %318 = tpu.reciprocal %317 {approx = true} : vector<4x8x1xf32> -> vector<4x8x1xf32>
    %319 = vector.broadcast %318 : vector<4x8x1xf32> to vector<4x8x8xf32>
    %320 = arith.mulf %315, %319 : vector<4x8x8xf32>
    %321 = arith.truncf %320 : vector<4x8x8xf32> to vector<4x8x8xbf16>
    "tpu.trace_start"() <{level = 10 : i32, message = "hqk,hkd->hqd"}> : () -> ()
    %cst_152 = arith.constant dense<0.000000e+00> : vector<4x8x8xf32>
    %322 = tpu.matmul %321, %306, %cst_152 {dimension_numbers = #tpu.dot_dimension_numbers<[2], [1], [1], [2], [0, 0, 0, 1, 1, 2], [0], [0]>} : vector<4x8x8xbf16>, vector<4x8x8xbf16>, vector<4x8x8xf32> -> vector<4x8x8xf32>
    "tpu.trace_stop"() : () -> ()
    %323 = arith.truncf %322 : vector<4x8x8xf32> to vector<4x8x8xbf16>
    %c3_153 = arith.constant 3 : index
    %c0_154 = arith.constant 0 : index
    %c0_155 = arith.constant 0 : index
    %c0_156 = arith.constant 0 : index
    %324 = vector.load %arg6[%c3_153, %c0_154, %c0_155, %c0_156] : memref<4x4x8x32xbf16, #tpu.memory_space<vmem>>, vector<1x4x8x32xbf16>
    %325 = vector.shape_cast %324 : vector<1x4x8x32xbf16> to vector<4x8x32xbf16>
    "tpu.trace_start"() <{level = 10 : i32, message = "hqd,hdf->hqf"}> : () -> ()
    %cst_157 = arith.constant dense<0.000000e+00> : vector<4x8x32xf32>
    %326 = tpu.matmul %323, %325, %cst_157 {dimension_numbers = #tpu.dot_dimension_numbers<[2], [1], [1], [2], [0, 0, 0, 1, 1, 2], [0], [0]>} : vector<4x8x8xbf16>, vector<4x8x32xbf16>, vector<4x8x32xf32> -> vector<4x8x32xf32>
    "tpu.trace_stop"() : () -> ()
    %cst_158 = arith.constant dense<0.000000e+00> : vector<8x32xf32>
    %327 = vector.multi_reduction <add>, %326, %cst_158 [0] : vector<4x8x32xf32> to vector<8x32xf32>
    %c3_159 = arith.constant 3 : index
    %c0_160 = arith.constant 0 : index
    %c0_161 = arith.constant 0 : index
    %328 = vector.load %arg7[%c3_159, %c0_160, %c0_161] : memref<4x1x32xf32, #tpu.memory_space<vmem>>, vector<1x1x32xf32>
    %329 = vector.shape_cast %328 : vector<1x1x32xf32> to vector<1x32xf32>
    %330 = vector.broadcast %329 : vector<1x32xf32> to vector<8x32xf32>
    %331 = arith.addf %327, %330 : vector<8x32xf32>
    %332 = arith.addf %331, %283 : vector<8x32xf32>
    %cst_162 = arith.constant dense<0.000000e+00> : vector<8xf32>
    %333 = vector.multi_reduction <add>, %332, %cst_162 [1] : vector<8x32xf32> to vector<8xf32>
    %334 = vector.shape_cast %333 : vector<8xf32> to vector<8x1xf32>
    %cst_163 = arith.constant 3.200000e+01 : f32
    %335 = vector.broadcast %cst_163 : f32 to vector<8x1xf32>
    %336 = arith.divf %334, %335 : vector<8x1xf32>
    %337 = vector.broadcast %336 : vector<8x1xf32> to vector<8x32xf32>
    %338 = arith.subf %332, %337 : vector<8x32xf32>
    %339 = arith.mulf %338, %338 : vector<8x32xf32>
    %cst_164 = arith.constant dense<0.000000e+00> : vector<8xf32>
    %340 = vector.multi_reduction <add>, %339, %cst_164 [1] : vector<8x32xf32> to vector<8xf32>
    %341 = vector.shape_cast %340 : vector<8xf32> to vector<8x1xf32>
    %cst_165 = arith.constant 3.200000e+01 : f32
    %342 = vector.broadcast %cst_165 : f32 to vector<8x1xf32>
    %343 = arith.divf %341, %342 : vector<8x1xf32>
    %344 = vector.broadcast %336 : vector<8x1xf32> to vector<8x32xf32>
    %345 = arith.subf %332, %344 : vector<8x32xf32>
    %cst_166 = arith.constant 9.99999974E-6 : f32
    %346 = vector.broadcast %cst_166 : f32 to vector<8x1xf32>
    %347 = arith.addf %343, %346 : vector<8x1xf32>
    %348 = math.rsqrt %347 : vector<8x1xf32>
    %349 = vector.broadcast %348 : vector<8x1xf32> to vector<8x32xf32>
    %350 = arith.mulf %345, %349 : vector<8x32xf32>
    %c4_167 = arith.constant 4 : index
    %c0_168 = arith.constant 0 : index
    %c0_169 = arith.constant 0 : index
    %351 = vector.load %arg8[%c4_167, %c0_168, %c0_169] : memref<6x1x32xf32, #tpu.memory_space<vmem>>, vector<1x1x32xf32>
    %352 = vector.shape_cast %351 : vector<1x1x32xf32> to vector<1x32xf32>
    %353 = vector.broadcast %352 : vector<1x32xf32> to vector<8x32xf32>
    %354 = arith.mulf %350, %353 : vector<8x32xf32>
    %c4_170 = arith.constant 4 : index
    %c0_171 = arith.constant 0 : index
    %c0_172 = arith.constant 0 : index
    %355 = vector.load %arg9[%c4_170, %c0_171, %c0_172] : memref<6x1x32xf32, #tpu.memory_space<vmem>>, vector<1x1x32xf32>
    %356 = vector.shape_cast %355 : vector<1x1x32xf32> to vector<1x32xf32>
    %357 = vector.broadcast %356 : vector<1x32xf32> to vector<8x32xf32>
    %358 = arith.addf %354, %357 : vector<8x32xf32>
    %359 = arith.truncf %358 : vector<8x32xf32> to vector<8x32xbf16>
    %c1_173 = arith.constant 1 : index
    %c0_174 = arith.constant 0 : index
    %c0_175 = arith.constant 0 : index
    %360 = vector.load %arg10[%c1_173, %c0_174, %c0_175] : memref<2x32x64xbf16, #tpu.memory_space<vmem>>, vector<1x32x64xbf16>
    %361 = vector.shape_cast %360 : vector<1x32x64xbf16> to vector<32x64xbf16>
    %cst_176 = arith.constant dense<0.000000e+00> : vector<8x64xf32>
    %362 = tpu.matmul %359, %361, %cst_176 {dimension_numbers = #tpu.dot_dimension_numbers<[1], [0], [0], [1], [0, 0, 1, 1], [], []>} : vector<8x32xbf16>, vector<32x64xbf16>, vector<8x64xf32> -> vector<8x64xf32>
    %c1_177 = arith.constant 1 : index
    %c0_178 = arith.constant 0 : index
    %c0_179 = arith.constant 0 : index
    %363 = vector.load %arg11[%c1_177, %c0_178, %c0_179] : memref<2x1x64xf32, #tpu.memory_space<vmem>>, vector<1x1x64xf32>
    %364 = vector.shape_cast %363 : vector<1x1x64xf32> to vector<1x64xf32>
    %365 = vector.broadcast %364 : vector<1x64xf32> to vector<8x64xf32>
    %366 = arith.addf %362, %365 : vector<8x64xf32>
    %cst_180 = arith.constant 0.000000e+00 : f32
    %367 = vector.broadcast %cst_180 : f32 to vector<8x64xf32>
    %368 = arith.maximumf %366, %367 : vector<8x64xf32>
    %369 = arith.truncf %368 : vector<8x64xf32> to vector<8x64xbf16>
    %c1_181 = arith.constant 1 : index
    %c0_182 = arith.constant 0 : index
    %c0_183 = arith.constant 0 : index
    %370 = vector.load %arg12[%c1_181, %c0_182, %c0_183] : memref<2x64x32xbf16, #tpu.memory_space<vmem>>, vector<1x64x32xbf16>
    %371 = vector.shape_cast %370 : vector<1x64x32xbf16> to vector<64x32xbf16>
    %cst_184 = arith.constant dense<0.000000e+00> : vector<8x32xf32>
    %372 = tpu.matmul %369, %371, %cst_184 {dimension_numbers = #tpu.dot_dimension_numbers<[1], [0], [0], [1], [0, 0, 1, 1], [], []>} : vector<8x64xbf16>, vector<64x32xbf16>, vector<8x32xf32> -> vector<8x32xf32>
    %c1_185 = arith.constant 1 : index
    %c0_186 = arith.constant 0 : index
    %c0_187 = arith.constant 0 : index
    %373 = vector.load %arg13[%c1_185, %c0_186, %c0_187] : memref<2x1x32xf32, #tpu.memory_space<vmem>>, vector<1x1x32xf32>
    %374 = vector.shape_cast %373 : vector<1x1x32xf32> to vector<1x32xf32>
    %375 = vector.broadcast %374 : vector<1x32xf32> to vector<8x32xf32>
    %376 = arith.addf %372, %375 : vector<8x32xf32>
    %377 = arith.addf %376, %358 : vector<8x32xf32>
    %cst_188 = arith.constant dense<0.000000e+00> : vector<8xf32>
    %378 = vector.multi_reduction <add>, %377, %cst_188 [1] : vector<8x32xf32> to vector<8xf32>
    %379 = vector.shape_cast %378 : vector<8xf32> to vector<8x1xf32>
    %cst_189 = arith.constant 3.200000e+01 : f32
    %380 = vector.broadcast %cst_189 : f32 to vector<8x1xf32>
    %381 = arith.divf %379, %380 : vector<8x1xf32>
    %382 = vector.broadcast %381 : vector<8x1xf32> to vector<8x32xf32>
    %383 = arith.subf %377, %382 : vector<8x32xf32>
    %384 = arith.mulf %383, %383 : vector<8x32xf32>
    %cst_190 = arith.constant dense<0.000000e+00> : vector<8xf32>
    %385 = vector.multi_reduction <add>, %384, %cst_190 [1] : vector<8x32xf32> to vector<8xf32>
    %386 = vector.shape_cast %385 : vector<8xf32> to vector<8x1xf32>
    %cst_191 = arith.constant 3.200000e+01 : f32
    %387 = vector.broadcast %cst_191 : f32 to vector<8x1xf32>
    %388 = arith.divf %386, %387 : vector<8x1xf32>
    %389 = vector.broadcast %381 : vector<8x1xf32> to vector<8x32xf32>
    %390 = arith.subf %377, %389 : vector<8x32xf32>
    %cst_192 = arith.constant 9.99999974E-6 : f32
    %391 = vector.broadcast %cst_192 : f32 to vector<8x1xf32>
    %392 = arith.addf %388, %391 : vector<8x1xf32>
    %393 = math.rsqrt %392 : vector<8x1xf32>
    %394 = vector.broadcast %393 : vector<8x1xf32> to vector<8x32xf32>
    %395 = arith.mulf %390, %394 : vector<8x32xf32>
    %c5_193 = arith.constant 5 : index
    %c0_194 = arith.constant 0 : index
    %c0_195 = arith.constant 0 : index
    %396 = vector.load %arg8[%c5_193, %c0_194, %c0_195] : memref<6x1x32xf32, #tpu.memory_space<vmem>>, vector<1x1x32xf32>
    %397 = vector.shape_cast %396 : vector<1x1x32xf32> to vector<1x32xf32>
    %398 = vector.broadcast %397 : vector<1x32xf32> to vector<8x32xf32>
    %399 = arith.mulf %395, %398 : vector<8x32xf32>
    %c5_196 = arith.constant 5 : index
    %c0_197 = arith.constant 0 : index
    %c0_198 = arith.constant 0 : index
    %400 = vector.load %arg9[%c5_196, %c0_197, %c0_198] : memref<6x1x32xf32, #tpu.memory_space<vmem>>, vector<1x1x32xf32>
    %401 = vector.shape_cast %400 : vector<1x1x32xf32> to vector<1x32xf32>
    %402 = vector.broadcast %401 : vector<1x32xf32> to vector<8x32xf32>
    %403 = arith.addf %399, %402 : vector<8x32xf32>
    %404 = arith.truncf %403 : vector<8x32xf32> to vector<8x32xbf16>
    %c0_199 = arith.constant 0 : index
    %c0_200 = arith.constant 0 : index
    %405 = vector.load %arg14[%c0_199, %c0_200] : memref<32x128xbf16, #tpu.memory_space<vmem>>, vector<32x128xbf16>
    %cst_201 = arith.constant dense<0.000000e+00> : vector<8x128xf32>
    %406 = tpu.matmul %404, %405, %cst_201 {dimension_numbers = #tpu.dot_dimension_numbers<[1], [0], [0], [1], [0, 0, 1, 1], [], []>} : vector<8x32xbf16>, vector<32x128xbf16>, vector<8x128xf32> -> vector<8x128xf32>
    %c0_202 = arith.constant 0 : index
    %c0_203 = arith.constant 0 : index
    %407 = vector.load %arg15[%c0_202, %c0_203] : memref<1x128xf32, #tpu.memory_space<vmem>>, vector<1x128xf32>
    %408 = vector.broadcast %407 : vector<1x128xf32> to vector<8x128xf32>
    %409 = arith.addf %406, %408 : vector<8x128xf32>
    %c0_204 = arith.constant 0 : index
    %c0_205 = arith.constant 0 : index
    %c0_206 = arith.constant 0 : index
    %410 = vector.load %arg16[%c0_204, %c0_205, %c0_206] : memref<1x8x128xf32, #tpu.memory_space<vmem>>, vector<1x8x128xf32>
    %411 = vector.shape_cast %410 : vector<1x8x128xf32> to vector<8x128xf32>
    %412 = vector.shape_cast %409 : vector<8x128xf32> to vector<1x8x128xf32>
    tpu.vector_store %arg16[%c0_204, %c0_205, %c0_206], %412 {strides = array<i32>} : memref<1x8x128xf32, #tpu.memory_space<vmem>>, vector<1x8x128xf32>,
    return
  }
  func.func @transform_0(%arg0: i32) -> (i32, i32, i32) {
    %c0_i32 = arith.constant 0 : i32
    %c0_i32_0 = arith.constant 0 : i32
    %c0_i32_1 = arith.constant 0 : i32
    return %arg0, %c0_i32, %c0_i32_0 : i32, i32, i32
  }
  func.func @transform_1(%arg0: i32) -> (i32, i32, i32) {
    %c0_i32 = arith.constant 0 : i32
    %c0_i32_0 = arith.constant 0 : i32
    %c0_i32_1 = arith.constant 0 : i32
    return %arg0, %c0_i32, %c0_i32_0 : i32, i32, i32
  }
  func.func @transform_2(%arg0: i32) -> (i32, i32, i32) {
    %c0_i32 = arith.constant 0 : i32
    %c0_i32_0 = arith.constant 0 : i32
    %c0_i32_1 = arith.constant 0 : i32
    return %arg0, %c0_i32, %c0_i32_0 : i32, i32, i32
  }
  func.func @transform_3(%arg0: i32) -> (i32, i32, i32) {
    %c0_i32 = arith.constant 0 : i32
    %c0_i32_0 = arith.constant 0 : i32
    %c0_i32_1 = arith.constant 0 : i32
    return %arg0, %c0_i32, %c0_i32_0 : i32, i32, i32
  }
  func.func @transform_4(%arg0: i32) -> (i32, i32, i32) {
    %c0_i32 = arith.constant 0 : i32
    %c0_i32_0 = arith.constant 0 : i32
    %c0_i32_1 = arith.constant 0 : i32
    %c0_i32_2 = arith.constant 0 : i32
    return %c0_i32, %c0_i32_0, %c0_i32_1 : i32, i32, i32
  }
  func.func @transform_5(%arg0: i32) -> (i32, i32, i32, i32) {
    %c0_i32 = arith.constant 0 : i32
    %c0_i32_0 = arith.constant 0 : i32
    %c0_i32_1 = arith.constant 0 : i32
    %c0_i32_2 = arith.constant 0 : i32
    %c0_i32_3 = arith.constant 0 : i32
    return %c0_i32, %c0_i32_0, %c0_i32_1, %c0_i32_2 : i32, i32, i32, i32
  }
  func.func @transform_6(%arg0: i32) -> (i32, i32, i32) {
    %c0_i32 = arith.constant 0 : i32
    %c0_i32_0 = arith.constant 0 : i32
    %c0_i32_1 = arith.constant 0 : i32
    %c0_i32_2 = arith.constant 0 : i32
    return %c0_i32, %c0_i32_0, %c0_i32_1 : i32, i32, i32
  }
  func.func @transform_7(%arg0: i32) -> (i32, i32, i32) {
    %c0_i32 = arith.constant 0 : i32
    %c0_i32_0 = arith.constant 0 : i32
    %c0_i32_1 = arith.constant 0 : i32
    %c0_i32_2 = arith.constant 0 : i32
    return %c0_i32, %c0_i32_0, %c0_i32_1 : i32, i32, i32
  }
  func.func @transform_8(%arg0: i32) -> (i32, i32, i32) {
    %c0_i32 = arith.constant 0 : i32
    %c0_i32_0 = arith.constant 0 : i32
    %c0_i32_1 = arith.constant 0 : i32
    %c0_i32_2 = arith.constant 0 : i32
    return %c0_i32, %c0_i32_0, %c0_i32_1 : i32, i32, i32
  }
  func.func @transform_9(%arg0: i32) -> (i32, i32, i32) {
    %c0_i32 = arith.constant 0 : i32
    %c0_i32_0 = arith.constant 0 : i32
    %c0_i32_1 = arith.constant 0 : i32
    %c0_i32_2 = arith.constant 0 : i32
    return %c0_i32, %c0_i32_0, %c0_i32_1 : i32, i32, i32
  }
  func.func @transform_10(%arg0: i32) -> (i32, i32, i32) {
    %c0_i32 = arith.constant 0 : i32
    %c0_i32_0 = arith.constant 0 : i32
    %c0_i32_1 = arith.constant 0 : i32
    %c0_i32_2 = arith.constant 0 : i32
    return %c0_i32, %c0_i32_0, %c0_i32_1 : i32, i32, i32
  }
  func.func @transform_11(%arg0: i32) -> (i32, i32, i32) {
    %c0_i32 = arith.constant 0 : i32
    %c0_i32_0 = arith.constant 0 : i32
    %c0_i32_1 = arith.constant 0 : i32
    %c0_i32_2 = arith.constant 0 : i32
    return %c0_i32, %c0_i32_0, %c0_i32_1 : i32, i32, i32
  }
  func.func @transform_12(%arg0: i32) -> (i32, i32, i32) {
    %c0_i32 = arith.constant 0 : i32
    %c0_i32_0 = arith.constant 0 : i32
    %c0_i32_1 = arith.constant 0 : i32
    %c0_i32_2 = arith.constant 0 : i32
    return %c0_i32, %c0_i32_0, %c0_i32_1 : i32, i32, i32
  }
  func.func @transform_13(%arg0: i32) -> (i32, i32) {
    %c0_i32 = arith.constant 0 : i32
    %c0_i32_0 = arith.constant 0 : i32
    %c0_i32_1 = arith.constant 0 : i32
    return %c0_i32, %c0_i32_0 : i32, i32
  }
  func.func @transform_14(%arg0: i32) -> (i32, i32) {
    %c0_i32 = arith.constant 0 : i32
    %c0_i32_0 = arith.constant 0 : i32
    %c0_i32_1 = arith.constant 0 : i32
    return %c0_i32, %c0_i32_0 : i32, i32
  }
  func.func @transform_15(%arg0: i32) -> (i32, i32, i32) {
    %c0_i32 = arith.constant 0 : i32
    %c0_i32_0 = arith.constant 0 : i32
    %c0_i32_1 = arith.constant 0 : i32
    return %arg0, %c0_i32, %c0_i32_0 : i32, i32, i32
  }
}

</mosaic_0001>

<bundles_post_ra>
// kernel: tpu_custom_call.1
= control target key start
LH: loop header
LB: loop body
LE: loop exit
PB: predicated region body
PF: predicated region fallthrough
CT: control target
= control target key end

     0   :  { %s4144_s0 = inlined_call_operand.vmem [shape: f32[2,8,32], index: 0, kind: input, shape index: {}]   ;;  %s4145_s1 = inlined_call_operand.vmem [shape: f32[2,8,32], index: 1, kind: input, shape index: {}]   ;;  %s4146_s2 = inlined_call_operand.vmem [shape: f32[2,8,8], index: 2, kind: input, shape index: {}]   ;;  %s4147_s3 = inlined_call_operand.hbm [shape: f32[2,8,8], index: 3, kind: input, shape index: {}]   ;;  %s4148_s4 = inlined_call_operand.vmem [shape: bf16[12,8,8], index: 4, kind: input, shape index: {}]   ;;  %s4149_s5 = inlined_call_operand.vmem [shape: bf16[4,4,8,32], index: 5, kind: input, shape index: {}]   ;;  %s4150_s6 = inlined_call_operand.hbm [shape: f32[4,1,32], index: 6, kind: input, shape index: {}]   ;;  %s4151_s7 = inlined_call_operand.hbm [shape: f32[6,1,32], index: 7, kind: input, shape index: {}]   ;;  %s4152_s8 = inlined_call_operand.vmem [shape: f32[6,1,32], index: 8, kind: input, shape index: {}]   ;;  %s4153_s9 = inlined_call_operand.vmem [shape: bf16[2,32,64], index: 9, kind: input, shape index: {}]   ;;  %s4154_s10 = inlined_call_operand.vmem [shape: f32[2,1,64], index: 10, kind: input, shape index: {}]   ;;  %s4155_s11 = inlined_call_operand.vmem [shape: bf16[2,64,32], index: 11, kind: input, shape index: {}]   ;;  %s4156_s12 = inlined_call_operand.vmem [shape: f32[2,1,32], index: 12, kind: input, shape index: {}]   ;;  %s4157_s13 = inlined_call_operand.hbm [shape: bf16[32,128], index: 13, kind: input, shape index: {}]   ;;  %s4158_s14 = inlined_call_operand.vmem [shape: f32[1,128], index: 14, kind: input, shape index: {}]   ;;  %s4159_s15 = inlined_call_operand.hbm [shape: f32[2,8,128], index: 15, kind: output, shape index: {}]  }
   0x1   :  { %4165 = sst [smem:[#allocation19_spill]] %s4150_s6 }
   0x2   :  { %4166 = sst [smem:[#allocation20_spill]] %s4151_s7 }
   0x3   :  { %4167 = sst [smem:[#allocation21_spill]] %s4157_s13 }
   0x4   :  { %4168 = sst [smem:[#allocation22_spill]] %s4158_s14 }
   0x5   :  { %4169 = sst [smem:[#allocation23_spill]] %s4159_s15 }
   0x6   :  { %20 = vsyncpa [#allocation3], 0 }
   0x7   :  { %22 = vsyncpa [#allocation3 + $0x1], 0 }
   0x8   :  { %23 = vsyncpa [#allocation6], 0 }
   0x9   :  { %24 = vsyncpa [#allocation9], 0 }
   0xa   :  { %25 = vsyncpa [#allocation4], 0 }
   0xb   :  { %27 = vsyncpa [#allocation4 + $0x1], 0  ;;  %s3525_s18 = smov 0   ;;  %s3527_s19 = smov 0  }
   0xc   :  { %s3529_s20 = smov 0   ;;  %s3531_s21 = smov 0  }
   0xd LB: > { %4170 = sst [smem:[#allocation15_spill]] %s3428_s20  ;;  %s3549_s25 = sadd.s32 4294967295, %s3432_s21   ;;  %s3432_s21 = sphi %s3531_s21, %s4187_s21   ;;  %s3428_s20 = sphi %s3529_s20, %s4189_s20   ;;  %s3424_s19 = sphi %s3527_s19, %s4191_s19   ;;  %s3420_s18 = sphi %s3525_s18, %s4190_s18  }
   0xe   : > { %s4171_s6 = sld [smem:[#allocation19_spill]]  ;;  %p2844_p0 = scmp.ge.s32.totalorder %s3432_s21, 1 }
   0xf   : > { %p132_p1 = scmp.eq.s32.totalorder %s3549_s25, 0  ;;  %p399_p2 = scmp.lt.s32.totalorder %s3432_s21, 3 }
  0x10   : > { %s3434_s27 = smov [#allocation5]   ;;  %s4173_s7 = sld [smem:[#allocation20_spill]] }
  0x11   : > { %p3554_p3 = pnand %p2844_p0, %p399_p2  ;;  %s418_s28 = sshll.u32 %s3434_s27, 4  ;;  %s419_s28 = int_to_ptr.vmem [resolvable:$true] %s418_s28 }
  0x12   : > { %s4175_s13 = sld [smem:[#allocation21_spill]]  ;;  %s3436_s29 = smov 16  }
  0x13   : > { %p3069_p4 = pneg %p3554_p3  ;;  %s3437_s30 = smov 1  }
  0x14   : > { %s416_s24 = sshll.u32 %s4171_s6, 4  ;;  %s3435_s6 = smov [#allocation7]   ;;  %s417_s24 = int_to_ptr.hbm [resolvable:$true] %s416_s24 }
  0x15   : > { %p3566_p6 = pnand %p3069_p4, %p132_p1  ;;  %s432_s14 = sshll.u32 %s3435_s6, 4  ;;  %s433_s14 = int_to_ptr.vmem [resolvable:$true] %s432_s14 }
  0x16   : > { %s430_s16 = sshll.u32 %s4173_s7, 4  ;;  %s3438_s22 = smov [#allocation8]   ;;  %s431_s16 = int_to_ptr.hbm [resolvable:$true] %s430_s16 }
  0x17   : > { %3072 = dma.hbm_to_vmem [thread:$0]  (!%p3566_p6), %s417_s24, 64, %s419_s28, [#allocation6], %s3436_s29, %s3436_s29, %s3437_s30  }
  0x18   : > { %s459_s27 = sshll.u32 %s4175_s13, 4  ;;  %s461_s23 = sshll.u32 %s3438_s22, 4  ;;  %s460_s27 = int_to_ptr.hbm [resolvable:$true] %s459_s27  ;;  %s462_s23 = int_to_ptr.vmem [resolvable:$true] %s461_s23 }
  0x19   : > { %3075 = dma.hbm_to_vmem [thread:$0]  (!%p3566_p6), %s431_s16, 96, %s433_s14, [#allocation6], %s3436_s29, %s3436_s29, %s3437_s30  }
  0x1a   : > { %s3439_s6 = smov 64   ;;  %s3440_s7 = smov 4  }
  0x1b   : > { %3078 = dma.hbm_to_vmem [thread:$0]  (!%p3566_p6), %s460_s27, 256, %s462_s23, [#allocation9], %s3439_s6, %s3439_s6, %s3440_s7  }
  0x1c   : > { %s2843_s13 = sadd.s32 4294967294, %s3432_s21   ;;  %s3581_s24 = sadd.s32 1, %s3432_s21  }
  0x1d   : > { %4176 = sst [smem:[#allocation16_spill]] %s3581_s24  ;;  %s118_s28 = sadd.s32 1, %s3428_s20 }
  0x1e   : > { %s115_s15 = ssub.s32 %s3432_s21, %s3581_s24  ;;  %p125_p7 = scmp.ne.s32.totalorder %s3428_s20, %s3424_s19 }
  0x1f   : > { %p116_p8 = scmp.eq.s32.totalorder %s115_s15, 0  ;;  %p126_p9 = scmp.eq.s32.totalorder %s3432_s21, 0 }
  0x20   : > { %p131_p10 = scmp.ne.s32.totalorder %s3424_s19, %s3420_s18  ;;  %p386_p11 = scmp.eq.s32.totalorder %s3549_s25, 1 }
  0x21   : > { %s3593_s14 = scalar_select %p116_p8, %s3428_s20, %s118_s28  }
  0x22   : > { %p3597_p12 = por %p132_p1, %p131_p10  ;;  %p3601_p13 = por %p386_p11, %p125_p7 }
  0x23   : > { %4177 = sst [smem:[#allocation17_spill]] %s3593_s14  ;;  %p392_p0 = scmp.eq.s32.totalorder %s2843_s13, 1 }
  0x24   : > { %p127_p2 = por %p126_p9, %p125_p7  ;;  %s499_s17 = sand.u32 1, %s3428_s20  }
  0x25   : > { %p3606_p4 = por %p392_p0, %p131_p10  ;;  %p3090_p6 = scmp.lt.s32.totalorder %s3432_s21, 2 }
  0x26   : > { %s2849_s15 = sshll.u32 %s499_s17, 3  ;;  %s2850_s29 = sshll.u32 %s3432_s21, 3 }
  0x27   : > { %s4180_s27 = scalar_select %p3606_p4, 1, 0 }
  0x28   : > { %s507_s23 = scalar_lea.hbm %s4147_s3, %s2850_s29  ;;  %s503_s28 = scalar_lea.vmem [#allocation2], %s2849_s15 }
  0x29   : > { %4181 = sst [smem:[#allocation18_spill]] %s4180_s27  ;;  %s509_s6 = sshll.u32 %s507_s23, 4  ;;  %s510_s6 = int_to_ptr.hbm [resolvable:$true] %s509_s6 }
  0x2a   : > { %s511_s14 = sshll.u32 %s503_s28, 4  ;;  %p3615_p8 = pnand %p3090_p6, %p127_p2  ;;  %s512_s14 = int_to_ptr.vmem [resolvable:$true] %s511_s14 }
  0x2b   : > { %s500_s20 = scalar_lea.sflag [#allocation3], %s499_s17  ;;  %s3328_s24 = sshra.s32 %s510_s6, 4  ;;  %s3329_s24 = int_to_ptr.hbm [resolvable:$true] %s3328_s24 }
  0x2c   : > { %s3330_s27 = scalar_lea.hbm %s3329_s24, 8  ;;  %p3332_p9 = pneg %p3615_p8 }
  0x2d   : > { %p3331_p7 = scmp.ne.s32.totalorder %s3329_s24, %s3330_s27  ;;  %s3335_s15 = scalar_lea.hbm %s4147_s3, 16 }
  0x2e   : > { %p3336_p0 = scmp.lt.s32.totalorder %s3329_s24, %s4147_s3  ;;  %p3337_p2 = scmp.lt.s32.totalorder %s3335_s15, %s3330_s27 }
  0x2f   : > { %p3333_p10 = pnand %p3332_p9, %p3331_p7 }
  0x30   : > { %p3338_p6 = por %p3337_p2, %p3336_p0 }
  0x31   : > { %p3334_p11 = pneg %p3333_p10 }
  0x33   : > { %p3339_p5 = pnand %p3338_p6, %p3334_p11 }
  0x35   : > { %3342 = shalt.err (!%p3339_p5)
}
  0x36   : > { %3082 = dma.hbm_to_vmem [thread:$0]  (!%p3615_p8), %s510_s6, 128, %s512_s14, %s500_s20  }
  0x37   : > { %520 = sbr.rel (%p3554_p3) target bundleno = 6088 (0x17c8), region = 80  ;;  %s3632_s17 = sand.u32 (!%p3554_p3), 1, %s3424_s19  }
  0x38   : > { %s2852_s28 = sshll.u32 (!%p3554_p3), %s3632_s17, 3  ;;  %s523_s29 = scalar_lea.sflag (!%p3554_p3), [#allocation3], %s3632_s17 }
  0x39   : > { %s3638_s24 = scalar_lea.vmem (!%p3554_p3), [#allocation2], %s2852_s28 }
  0x3c   : > { %3403 = dma.done.wait (%p3597_p12), %s523_s29, 128  }
  0x3d   : > { %3405 = vsyncadd (%p3597_p12), %s523_s29, 4294967168 }
  0x3e   : > { %3407 = dma.done.wait (%p132_p1), [#allocation6], 160  }
  0x3f   : > { %3409 = vsyncadd (%p132_p1), [#allocation6], 4294967136 }
  0x40   : > { %3411 = dma.done.wait (%p132_p1), [#allocation9], 256  }
  0x41   : > { %3413 = vsyncadd (%p132_p1), [#allocation9], 4294967040  ;;  %p601_p3 = scmp.lt.s32.totalorder %s3549_s25, 1  ;;  %vm654_vm0 = vcmask 1043456   ;;  %v642_v1 = vld [vmem:[%s4148_s4] sm:$0xf] }
  0x42   : > { %s3441_s30 = smov 120   ;;  %s3442_s15 = smov 104   ;;  %v656_v2 = vsel %vm654_vm0, %v642_v1, 0  ;;  %v2860_v3 = vld [vmem:[%s4148_s4 + $0x4] sm:$0xf]  ;;  %vm647_vm1 = vcmask 64512  }
  0x43   : > { %s602_s20 = scalar_select %p601_p3, %s3549_s25, 1  ;;  %v2861_v4 = vld [vmem:[%s4148_s4 + $0x8] sm:$0xf]  ;;  %665 = vmatpush.bf16.msra.mxu0 %v656_v2  ;;  %v686_v5 = vsel %vm654_vm0, %v2860_v3, 0  ;;  %vm1021_vm2 = vcmask 261120   ;;  %vm1594_vm10 = vcmask 523264  }
  0x44   : > { %v712_v6 = vsel %vm654_vm0, %v2861_v4, 0  ;;  %695 = vmatpush.bf16.msra.mxu1 %v686_v5  ;;  %s3443_s14 = smov 112   ;;  %s4183_s13 = sld [smem:[#allocation23_spill]] }
  0x45   : > { %s3654_s26 = sshll.u32 %s602_s20, 3  ;;  %721 = vmatpush.bf16.msra.mxu2 %v712_v6 }
  0x46   : > { %s604_s27 = scalar_lea.vmem %s4144_s0, %s3654_s26  ;;  %s3703_s6 = scalar_lea.vmem %s4146_s2, %s3654_s26 }
  0x47   : > { %v3660_v0 = vld [vmem:[%s604_s27] sm:$0xff]  ;;  %s608_s29 = scalar_lea.vmem %s4145_s1, %s3654_s26 }
  0x48   : > { %631 = vrot.lane.b32.xlu0 %v3660_v0, %s3441_s30  ;;  %637 = vrot.lane.b32.xlu1 %v3660_v0, %s3442_s15  ;;  %v3706_v48 = vld [vmem:[%s3703_s6] sm:$0xff] }
  0x4a   : > { %s3378_s27 = scalar_lea.hbm %s4183_s13, 16 }
  0x50   : > { %634 = vrot.lane.b32.xlu0 %v3660_v0, %s3443_s14 }
  0xba   : > { %v632_v7 = vpop.permute.xlu0 %631  ;;  %v638_v9 = vpop.permute.xlu1 %637 }
  0xbb   : > { %v640_v8 = vpack.c.bf16 %v632_v7, %v3660_v0 }
  0xbd   : > { %2862 = vmatmul.msk.bf16.vlgmr.msra.gmra.mxu0 %vm647_vm1, %v640_v8  ;;  %2864 = vmatmul.msk.bf16.vlgmr.msra.gmra.mxu1 %vm647_vm1, %v640_v8 }
  0xbe   : > { %2866 = vmatmul.msk.bf16.vlgmr.msra.gmra.mxu2 %vm647_vm1, %v640_v8 }
  0xc2   : > { %v635_v10 = vpop.permute.xlu0 %634 }
  0xc3   : > { %v641_v11 = vpack.c.bf16 %v638_v9, %v635_v10 }
  0xcd   : > { %2865 = vmatmul.msk.bf16.gmra.mxu1 %vm647_vm1, %v641_v11  ;;  %2863 = vmatmul.msk.bf16.gmra.mxu0 %vm647_vm1, %v641_v11 }
  0xce   : > { %2867 = vmatmul.msk.bf16.gmra.mxu2 %vm647_vm1, %v641_v11 }
 0x13a   : > { %v667_v12 = vpop.f32.mrf.mxu0  ;;  %v697_v13 = vpop.f32.mrf.mxu1 }
 0x13b   : > { %v707_v14 = vpack.c.bf16 %v697_v13, %v697_v13  ;;  %v677_v16 = vmul.f32 0.17677669, %v667_v12 }
 0x13d   : > { %v741_v15 = vsel %vm647_vm1, %v707_v14, 0  ;;  %v681_v21 = vpack.c.bf16 %v677_v16, %v677_v16 }
 0x13e   : > { %750 = vmatpush.bf16.xpose.msra.mxu3 %v741_v15 }
 0x141   : > { %v723_v17 = vpop.f32.mrf.mxu2 }
 0x142   : > { %v733_v18 = vpack.c.bf16 %v723_v17, %v723_v17  ;;  %v669_v19 = vpop.f32.mrf.mxu0  ;;  %v699_v20 = vpop.f32.mrf.mxu1 }
 0x143   : > { %v708_v22 = vpack.c.bf16 %v699_v20, %v699_v20  ;;  %v678_v33 = vmul.f32 0.17677669, %v669_v19 }
 0x144   : > { %v865_v23 = vsel %vm654_vm0, %v733_v18, 0 }
 0x145   : > { %874 = vmatpush.bf16.msrb.mxu2 %v865_v23  ;;  %2868 = vmatmul.msk.bf16.vlgmr.msra.gmra.mxu3 %vm647_vm1, %v681_v21  ;;  %v760_v24 = vsel %vm647_vm1, %v708_v22, 0  ;;  %v682_v39 = vpack.c.bf16 %v678_v33, %v678_v33 }
 0x146   : > { %769 = vmatpush.bf16.xpose.msrb.mxu3 %v760_v24 }
 0x149   : > { %v725_v25 = vpop.f32.mrf.mxu2 }
 0x14a   : > { %v734_v26 = vpack.c.bf16 %v725_v25, %v725_v25  ;;  %v702_v27 = vpop.f32.mrf.mxu1  ;;  %v672_v28 = vpop.f32.mrf.mxu0 }
 0x14b   : > { %v709_v29 = vpack.c.bf16 %v702_v27, %v702_v27  ;;  %v679_v32 = vmul.f32 0.17677669, %v672_v28 }
 0x14c   : > { %v884_v30 = vsel %vm654_vm0, %v734_v26, 0 }
 0x14d   : > { %v779_v31 = vsel %vm647_vm1, %v709_v29, 0  ;;  %v683_v34 = vpack.c.bf16 %v679_v32, %v679_v32 }
 0x14e   : > { %893 = vmatpush.bf16.msra.mxu3 %v884_v30  ;;  %788 = vmatpush.bf16.xpose.msrb.mxu0 %v779_v31 }
 0x151   : > { %v728_v35 = vpop.f32.mrf.mxu2 }
 0x152   : > { %v704_v36 = vpop.f32.mrf.mxu1  ;;  %v735_v37 = vpack.c.bf16 %v728_v35, %v728_v35  ;;  %v674_v38 = vpop.f32.mrf.mxu0 }
 0x153   : > { %v710_v40 = vpack.c.bf16 %v704_v36, %v704_v36  ;;  %v680_v43 = vmul.f32 0.17677669, %v674_v38  ;;  %v941_v38 = vld [vmem:[%s4149_s5] sm:$0xf] }
 0x154   : > { %v903_v41 = vsel %vm654_vm0, %v735_v37, 0 }
 0x155   : > { %2869 = vmatmul.msk.bf16.vlgmr.msrb.gmra.mxu3 %vm647_vm1, %v682_v39  ;;  %2870 = vmatmul.msk.bf16.vlgmr.msrb.gmra.mxu0 %vm647_vm1, %v683_v34  ;;  %v798_v42 = vsel %vm647_vm1, %v710_v40, 0  ;;  %v684_v44 = vpack.c.bf16 %v680_v43, %v680_v43  ;;  %v949_v39 = vsel %vm654_vm0, %v941_v38, 0  ;;  %v942_v40 = vld [vmem:[%s4149_s5 + $0x4] sm:$0xf] }
 0x156   : > { %807 = vmatpush.bf16.xpose.msrb.mxu1 %v798_v42  ;;  %912 = vmatpush.bf16.msra.mxu0 %v903_v41  ;;  %v968_v41 = vsel %vm654_vm0, %v942_v40, 0  ;;  %v943_v42 = vld [vmem:[%s4149_s5 + $0x8] sm:$0xf] }
 0x157   : > { %958 = vmatpush.bf16.msra.mxu2 %v949_v39  ;;  %977 = vmatpush.bf16.msrb.mxu3 %v968_v41  ;;  %v987_v43 = vsel %vm654_vm0, %v943_v42, 0  ;;  %v3140_v39 = vld [vmem:[%s4152_s8] ss:$0 sm:$0xff] }
 0x159   : > { %v730_v45 = vpop.f32.mrf.mxu2 }
 0x15a   : > { %v736_v46 = vpack.c.bf16 %v730_v45, %v730_v45  ;;  %996 = vmatpush.bf16.msrb.mxu0 %v987_v43  ;;  %v2881_v43 = vld [vmem:[%s4148_s4 + $0x10] sm:$0xf] }
 0x15c   : > { %v922_v47 = vsel %vm654_vm0, %v736_v46, 0 }
 0x15d   : > { %2871 = vmatmul.msk.bf16.vlgmr.msrb.gmra.mxu1 %vm647_vm1, %v684_v44  ;;  %v944_v44 = vld [vmem:[%s4149_s5 + $0xc] sm:$0xf] }
 0x15e   : > { %931 = vmatpush.bf16.msra.mxu1 %v922_v47  ;;  %v1006_v45 = vsel %vm654_vm0, %v944_v44, 0  ;;  %v2882_v44 = vld [vmem:[%s4148_s4 + $0x14] sm:$0xf] }
 0x162   : > { %1015 = vmatpush.bf16.msrb.mxu1 %v1006_v45  ;;  %v2880_v45 = vld [vmem:[%s4148_s4 + $0xc] sm:$0xf] }
 0x1c8   : > { %v752_v49 = vpop.f32.mrf.mxu3 }
 0x1c9   : > { %v753_v50 = vadd.f32 %v752_v49, %v3706_v48 }
 0x1cb   : > { %v813_v51 = vsel %vm647_vm1, %v753_v50, -inf }
 0x1cc   : > { %814 = vmax.xlane.f32.xlu1 %v813_v51 }
 0x1d0   : > { %v754_v52 = vpop.f32.mrf.mxu3 }
 0x1d2   : > { %v790_v53 = vpop.f32.mrf.mxu0 }
 0x1d3   : > { %v791_v61 = vadd.f32 %v790_v53, %v3706_v48 }
 0x1d5   : > { %v819_v1 = vsel %vm647_vm1, %v791_v61, -inf }
 0x1d8   : > { %v771_v54 = vpop.f32.mrf.mxu3 }
 0x1d9   : > { %v772_v55 = vadd.f32 %v771_v54, %v3706_v48 }
 0x1da   : > { %v792_v56 = vpop.f32.mrf.mxu0  ;;  %v809_v57 = vpop.f32.mrf.mxu1 }
 0x1db   : > { %v810_v58 = vadd.f32 %v809_v57, %v3706_v48  ;;  %v816_v59 = vsel %vm647_vm1, %v772_v55, -inf }
 0x1dc   : > { %817 = vmax.xlane.f32.xlu2 %v816_v59 }
 0x1dd   : > { %v822_v60 = vsel %vm647_vm1, %v810_v58, -inf }
 0x1de   : > { %823 = vmax.xlane.f32.xlu0 %v822_v60 }
 0x1e0   : > { %v773_v62 = vpop.f32.mrf.mxu3 }
 0x1e2   : > { %v811_v63 = vpop.f32.mrf.mxu1 }
 0x1e4   : > { %820 = vmax.xlane.f32.xlu2 %v819_v1 }
 0x23f   : > { %v815_v2 = vpop.xlane.xlu1 %814 }
 0x240   : > { %v825_v3 = vsub.f32 %v753_v50, %v815_v2 }
 0x242   : > { %v829_v4 = vmul.f32 1.442695, %v825_v3 }
 0x244   : > { %3159 = vpow2.f32 %v829_v4 }
 0x24a   : > { %v3160_v5 = vpop.eup %3159 }
 0x24b   : > { %v837_v6 = vsel %vm647_vm1, %v3160_v5, 0.0 }
 0x24c   : > { %838 = vadd.xlane.f32.xlu2 %v837_v6 }
 0x24f   : > { %v818_v7 = vpop.xlane.xlu2 %817 }
 0x250   : > { %v826_v8 = vsub.f32 %v772_v55, %v818_v7  ;;  %v3138_v7 = vld [vmem:[#allocation5] ss:$0 sm:$0xff] }
 0x251   : > { %v824_v10 = vpop.xlane.xlu0 %823 }
 0x252   : > { %v831_v9 = vmul.f32 1.442695, %v826_v8  ;;  %v828_v14 = vsub.f32 %v810_v58, %v824_v10 }
 0x254   : > { %3161 = vpow2.f32 %v831_v9  ;;  %v835_v17 = vmul.f32 1.442695, %v828_v14 }
 0x257   : > { %v821_v11 = vpop.xlane.xlu2 %820 }
 0x258   : > { %v827_v12 = vsub.f32 %v791_v61, %v821_v11 }
 0x25a   : > { %v3162_v13 = vpop.eup %3161  ;;  %v833_v15 = vmul.f32 1.442695, %v827_v12 }
 0x25b   : > { %v840_v16 = vsel %vm647_vm1, %v3162_v13, 0.0 }
 0x25c   : > { %3163 = vpow2.f32 %v833_v15  ;;  %841 = vadd.xlane.f32.xlu2 %v840_v16  ;;  %v3444_v15 = vmov 32.0  }
 0x25d   : > { %3165 = vpow2.f32 %v835_v17 }
 0x262   : > { %v3164_v18 = vpop.eup %3163 }
 0x263   : > { %v843_v19 = vsel %vm647_vm1, %v3164_v18, 0.0  ;;  %v3166_v20 = vpop.eup %3165 }
 0x264   : > { %844 = vadd.xlane.f32.xlu2 %v843_v19  ;;  %v846_v21 = vsel %vm647_vm1, %v3166_v20, 0.0 }
 0x26c   : > { %847 = vadd.xlane.f32.xlu2 %v846_v21 }
 0x2bf   : > { %v839_v22 = vpop.xlane.xlu2 %838 }
 0x2c0   : > { %3167 = vrcp.f32 %v839_v22 }
 0x2c6   : > { %v3168_v23 = vpop.eup %3167 }
 0x2c7   : > { %v853_v24 = vmul.f32 %v3168_v23, %v3160_v5 }
 0x2c9   : > { %v857_v25 = vpack.c.bf16 %v853_v24, %v853_v24 }
 0x2cb   : > { %2872 = vmatmul.msk.bf16.vlgmr.msrb.gmra.mxu2 %vm647_vm1, %v857_v25 }
 0x2cf   : > { %v842_v26 = vpop.xlane.xlu2 %841 }
 0x2d0   : > { %3169 = vrcp.f32 %v842_v26  ;;  %v617_v26 = vld [vmem:[%s608_s29] sm:$0xff]  ;;  %s4184_s29 = sld [smem:[#allocation22_spill]] }
 0x2d6   : > { %v3170_v27 = vpop.eup %3169 }
 0x2d7   : > { %v854_v28 = vmul.f32 %v3170_v27, %v3162_v13  ;;  %v845_v29 = vpop.xlane.xlu2 %844 }
 0x2d8   : > { %3171 = vrcp.f32 %v845_v29 }
 0x2d9   : > { %v858_v30 = vpack.c.bf16 %v854_v28, %v854_v28 }
 0x2db   : > { %2873 = vmatmul.msk.bf16.vlgmr.msra.gmra.mxu3 %vm647_vm1, %v858_v30 }
 0x2de   : > { %v3172_v31 = vpop.eup %3171 }
 0x2df   : > { %v855_v32 = vmul.f32 %v3172_v31, %v3164_v18  ;;  %v848_v33 = vpop.xlane.xlu2 %847 }
 0x2e0   : > { %3173 = vrcp.f32 %v848_v33 }
 0x2e1   : > { %v859_v34 = vpack.c.bf16 %v855_v32, %v855_v32  ;;  %3175 = vrcp.f32 %v3444_v15 }
 0x2e3   : > { %2874 = vmatmul.msk.bf16.vlgmr.msra.gmra.mxu0 %vm647_vm1, %v859_v34 }
 0x2e6   : > { %v3174_v35 = vpop.eup %3173 }
 0x2e7   : > { %v856_v36 = vmul.f32 %v3174_v35, %v3166_v20  ;;  %v3176_v16 = vpop.eup %3175 }
 0x2e8   : > { %v1039_v17 = vmul.f32 32.0, %v3176_v16  ;;  %vm1043_vm3 = vweird.f32 %v3176_v16 }
 0x2e9   : > { %v860_v37 = vpack.c.bf16 %v856_v36, %v856_v36  ;;  %v3139_v36 = vld [vmem:[#allocation7] ss:$0 sm:$0xff] }
 0x2ea   : > { %v1040_v18 = vsub.f32 1.0, %v1039_v17 }
 0x2eb   : > { %2875 = vmatmul.msk.bf16.vlgmr.msra.gmra.mxu1 %vm647_vm1, %v860_v37 }
 0x2ec   : > { %v1041_v19 = vmul.f32 %v3176_v16, %v1040_v18 }
 0x2ee   : > { %v1042_v20 = vadd.f32 %v3176_v16, %v1041_v19 }
 0x2f0   : > { %v3750_v21 = vsel %vm1043_vm3, %v3176_v16, %v1042_v20 }
 0x34e   : > { %v876_v46 = vpop.f32.mrf.mxu2 }
 0x34f   : > { %v937_v47 = vpack.c.bf16 %v876_v46, %v876_v46 }
 0x351   : > { %2876 = vmatmul.msk.bf16.vlgmr.msra.gmra.mxu2 %vm647_vm1, %v937_v47  ;;  %v1135_v47 = vsel %vm654_vm0, %v2881_v43, 0 }
 0x352   : > { %1144 = vmatpush.bf16.msra.mxu3 %v1135_v47 }
 0x356   : > { %v878_v49 = vpop.f32.mrf.mxu2 }
 0x357   : > { %v1161_v49 = vsel %vm654_vm0, %v2882_v44, 0 }
 0x358   : > { %1170 = vmatpush.bf16.msra.mxu0 %v1161_v49 }
 0x35e   : > { %v895_v50 = vpop.f32.mrf.mxu3 }
 0x35f   : > { %v938_v51 = vpack.c.bf16 %v895_v50, %v895_v50  ;;  %v1099_v50 = vsel %vm654_vm0, %v2880_v45, 0 }
 0x360   : > { %v914_v52 = vpop.f32.mrf.mxu0  ;;  %1108 = vmatpush.bf16.msrb.mxu2 %v1099_v50 }
 0x361   : > { %v939_v53 = vpack.c.bf16 %v914_v52, %v914_v52  ;;  %2877 = vmatmul.msk.bf16.vlgmr.msrb.gmra.mxu3 %vm647_vm1, %v938_v51 }
 0x363   : > { %2878 = vmatmul.msk.bf16.vlgmr.msrb.gmra.mxu0 %vm647_vm1, %v939_v53 }
 0x366   : > { %v897_v54 = vpop.f32.mrf.mxu3 }
 0x368   : > { %v916_v55 = vpop.f32.mrf.mxu0  ;;  %v933_v56 = vpop.f32.mrf.mxu1 }
 0x369   : > { %v940_v57 = vpack.c.bf16 %v933_v56, %v933_v56 }
 0x36b   : > { %2879 = vmatmul.msk.bf16.vlgmr.msrb.gmra.mxu1 %vm647_vm1, %v940_v57 }
 0x370   : > { %v935_v58 = vpop.f32.mrf.mxu1 }
 0x3d4   : > { %v960_v59 = vpop.f32.mrf.mxu2 }
 0x3d5   : > { %v1022_v63 = vsel %vm1021_vm2, %v960_v59, 0.0 }
 0x3dc   : > { %v962_v60 = vpop.f32.mrf.mxu2 }
 0x3e0   : > { %v998_v61 = vpop.f32.mrf.mxu0 }
 0x3e1   : > { %v1025_v3 = vsel %vm1021_vm2, %v998_v61, 0.0 }
 0x3e4   : > { %v979_v62 = vpop.f32.mrf.mxu3 }
 0x3e5   : > { %v1023_v1 = vsel %vm1021_vm2, %v979_v62, 0.0 }
 0x3e6   : > { %v1024_v2 = vadd.f32 %v1023_v1, %v1022_v63 }
 0x3e8   : > { %v1000_v4 = vpop.f32.mrf.mxu0  ;;  %v1017_v5 = vpop.f32.mrf.mxu1  ;;  %v1026_v6 = vadd.f32 %v1025_v3, %v1024_v2 }
 0x3e9   : > { %v1027_v8 = vsel %vm1021_vm2, %v1017_v5, 0.0 }
 0x3ea   : > { %v1028_v9 = vadd.f32 %v1027_v8, %v1026_v6 }
 0x3ec   : > { %v1033_v10 = vadd.f32 %v3138_v7, %v1028_v9  ;;  %v981_v11 = vpop.f32.mrf.mxu3 }
 0x3ee   : > { %v1034_v12 = vadd.f32 %v1033_v10, %v3660_v0 }
 0x3f0   : > { %v1019_v13 = vpop.f32.mrf.mxu1  ;;  %v1035_v14 = vsel %vm1021_vm2, %v1034_v12, 0.0 }
 0x3f1   : > { %1036 = vadd.xlane.f32.xlu2 %v1035_v14 }
 0x409   : > { %619 = vrot.lane.b32.xlu2 %v617_v26, %s3441_s30 }
 0x464   : > { %v1037_v22 = vpop.xlane.xlu2 %1036 }
 0x465   : > { %v1045_v23 = vmul.f32 %v3750_v21, %v1037_v22 }
 0x467   : > { %v1046_v24 = vsub.f32 %v1034_v12, %v1045_v23 }
 0x469   : > { %v1047_v0 = vmul.f32 %v1046_v24, %v1046_v24 }
 0x46b   : > { %v1048_v25 = vsel %vm1021_vm2, %v1047_v0, 0.0 }
 0x46c   : > { %1049 = vadd.xlane.f32.xlu1 %v1048_v25  ;;  %v620_v42 = vpop.permute.xlu2 %619 }
 0x46d   : > { %v3782_v46 = vpack.c.bf16 %v620_v42, %v617_v26 }
 0x46f   : > { %2885 = vmatmul.msk.bf16.vlgmr.msra.gmra.mxu3 %vm647_vm1, %v3782_v46  ;;  %2887 = vmatmul.msk.bf16.vlgmr.msra.gmra.mxu0 %vm647_vm1, %v3782_v46 }
 0x485   : > { %622 = vrot.lane.b32.xlu1 %v617_v26, %s3443_s14 }
 0x4df   : > { %v1050_v27 = vpop.xlane.xlu1 %1049 }
 0x4e0   : > { %v1051_v28 = vmul.f32 %v1050_v27, %v3750_v21 }
 0x4e2   : > { %v1052_v29 = vadd.f32 1e-05, %v1051_v28 }
 0x4e4   : > { %3177 = vrsqrt.f32 %v1052_v29  ;;  %vm1059_vm5 = vweird.f32 %v1052_v29 }
 0x4ea   : > { %v3178_v30 = vpop.eup %3177 }
 0x4eb   : > { %v1054_v31 = vmul.f32 %v3178_v30, %v1052_v29  ;;  %vm1060_vm4 = vweird.f32 %v3178_v30 }
 0x4ec   : > { %vm1061_vm6 = vmor %vm1059_vm5, %vm1060_vm4  ;;  %v1172_v59 = vpop.f32.mrf.mxu0 }
 0x4ed   : > { %v1055_v32 = vmul.f32 %v3178_v30, %v1054_v31  ;;  %v1182_v60 = vpack.c.bf16 %v1172_v59, %v1172_v59 }
 0x4ef   : > { %v1056_v33 = vmul.f32 0.5, %v1055_v32  ;;  %v1314_v61 = vsel %vm654_vm0, %v1182_v60, 0  ;;  %v3813_v32 = vld [vmem:[%s3638_s24] sm:$0xff]  ;;  %s600_s24 = scalar_lea.vmem [#allocation10], %s2852_s28 }
 0x4f0   : > { %1323 = vmatpush.bf16.msrb.mxu0 %v1314_v61  ;;  %s2705_s26 = sshll.u32 %s600_s24, 4  ;;  %s2706_s26 = int_to_ptr.vmem [resolvable:$true] %s2705_s26 }
 0x4f1   : > { %v1057_v34 = vsub.f32 1.5, %v1056_v33 }
 0x4f2   : > { %v1146_v62 = vpop.f32.mrf.mxu3 }
 0x4f3   : > { %v1058_v35 = vmul.f32 %v3178_v30, %v1057_v34  ;;  %v1156_v63 = vpack.c.bf16 %v1146_v62, %v1146_v62 }
 0x4f4   : > { %v1174_v5 = vpop.f32.mrf.mxu0 }
 0x4f5   : > { %v1062_v37 = vsel %vm1061_vm6, %v3178_v30, %v1058_v35  ;;  %v1190_v1 = vsel %vm647_vm1, %v1156_v63, 0  ;;  %v1183_v7 = vpack.c.bf16 %v1174_v5, %v1174_v5 }
 0x4f6   : > { %v1063_v38 = vmul.f32 %v1062_v37, %v1046_v24  ;;  %1199 = vmatpush.bf16.xpose.msra.mxu1 %v1190_v1 }
 0x4f7   : > { %v623_v53 = vpop.permute.xlu1 %622  ;;  %v1333_v11 = vsel %vm654_vm0, %v1183_v7, 0 }
 0x4f8   : > { %v1068_v40 = vmul.f32 %v3139_v36, %v1063_v38 }
 0x4fa   : > { %v3764_v41 = vadd.f32 %v3140_v39, %v1068_v40  ;;  %v1148_v2 = vpop.f32.mrf.mxu3 }
 0x4fb   : > { %v1157_v3 = vpack.c.bf16 %v1148_v2, %v1148_v2 }
 0x4fc   : > { %1081 = vrot.lane.b32.xlu1 %v3764_v41, %s3442_s15  ;;  %1078 = vrot.lane.b32.xlu2 %v3764_v41, %s3443_s14 }
 0x4fd   : > { %1075 = vrot.lane.b32.xlu0 %v3764_v41, %s3441_s30  ;;  %v1209_v4 = vsel %vm647_vm1, %v1157_v3, 0 }
 0x4fe   : > { %1218 = vmatpush.bf16.xpose.msrb.mxu1 %v1209_v4 }
 0x505   : > { %625 = vrot.lane.b32.xlu0 %v617_v26, %s3442_s15 }
 0x556   : > { %v1079_v57 = vpop.permute.xlu2 %1078 }
 0x56e   : > { %v1082_v56 = vpop.permute.xlu1 %1081 }
 0x56f   : > { %v1076_v51 = vpop.permute.xlu0 %1075  ;;  %v1085_v58 = vpack.c.bf16 %v1082_v56, %v1079_v57 }
 0x570   : > { %v1084_v52 = vpack.c.bf16 %v1076_v51, %v3764_v41 }
 0x572   : > { %2883 = vmatmul.msk.bf16.vlgmr.msrb.gmra.mxu2 %vm647_vm1, %v1084_v52 }
 0x577   : > { %v626_v54 = vpop.permute.xlu0 %625 }
 0x578   : > { %v3793_v55 = vpack.c.bf16 %v626_v54, %v623_v53 }
 0x57a   : > { %2886 = vmatmul.msk.bf16.gmra.mxu3 %vm647_vm1, %v3793_v55  ;;  %2888 = vmatmul.msk.bf16.gmra.mxu0 %vm647_vm1, %v3793_v55 }
 0x582   : > { %2884 = vmatmul.msk.bf16.gmra.mxu2 %vm647_vm1, %v1085_v58 }
 0x5f5   : > { %v1110_v6 = vpop.f32.mrf.mxu2 }
 0x5f6   : > { %v1120_v8 = vmul.f32 0.17677669, %v1110_v6 }
 0x5f7   : > { %v1177_v10 = vpop.f32.mrf.mxu0 }
 0x5f8   : > { %v1124_v9 = vpack.c.bf16 %v1120_v8, %v1120_v8  ;;  %v1184_v12 = vpack.c.bf16 %v1177_v10, %v1177_v10 }
 0x5fa   : > { %2889 = vmatmul.msk.bf16.vlgmr.msra.gmra.mxu1 %vm647_vm1, %v1124_v9  ;;  %v1352_v17 = vsel %vm654_vm0, %v1184_v12, 0 }
 0x5fb   : > { %1342 = vmatpush.bf16.msra.mxu1 %v1333_v11 }
 0x5fd   : > { %v1112_v13 = vpop.f32.mrf.mxu2  ;;  %v1151_v14 = vpop.f32.mrf.mxu3 }
 0x5fe   : > { %v1158_v15 = vpack.c.bf16 %v1151_v14, %v1151_v14  ;;  %v1121_v19 = vmul.f32 0.17677669, %v1112_v13 }
 0x5ff   : > { %v1179_v18 = vpop.f32.mrf.mxu0 }
 0x600   : > { %v1228_v16 = vsel %vm647_vm1, %v1158_v15, 0  ;;  %v1185_v23 = vpack.c.bf16 %v1179_v18, %v1179_v18  ;;  %v1125_v25 = vpack.c.bf16 %v1121_v19, %v1121_v19 }
 0x601   : > { %1237 = vmatpush.bf16.xpose.msra.mxu2 %v1228_v16 }
 0x602   : > { %v1371_v28 = vsel %vm654_vm0, %v1185_v23, 0 }
 0x605   : > { %v1115_v20 = vpop.f32.mrf.mxu2  ;;  %v1153_v22 = vpop.f32.mrf.mxu3 }
 0x606   : > { %v1122_v24 = vmul.f32 0.17677669, %v1115_v20  ;;  %v1159_v0 = vpack.c.bf16 %v1153_v22, %v1153_v22 }
 0x608   : > { %v1126_v26 = vpack.c.bf16 %v1122_v24, %v1122_v24  ;;  %v1247_v27 = vsel %vm647_vm1, %v1159_v0, 0 }
 0x609   : > { %1361 = vmatpush.bf16.msrb.mxu2 %v1352_v17  ;;  %1256 = vmatpush.bf16.xpose.msrb.mxu3 %v1247_v27 }
 0x60a   : > { %2890 = vmatmul.msk.bf16.vlgmr.msrb.gmra.mxu1 %vm647_vm1, %v1125_v25  ;;  %2891 = vmatmul.msk.bf16.vlgmr.msra.gmra.mxu2 %vm647_vm1, %v1126_v26  ;;  %v2897_v26 = vld [vmem:[%s4149_s5 + $0x10] sm:$0xf] }
 0x60b   : > { %v1399_v27 = vsel %vm654_vm0, %v2897_v26, 0  ;;  %v3143_v26 = vld [vmem:[%s4152_s8 + $0x1] ss:$0 sm:$0xff] }
 0x60c   : > { %1408 = vmatpush.bf16.msra.mxu0 %v1399_v27 }
 0x60d   : > { %v1117_v29 = vpop.f32.mrf.mxu2 }
 0x60e   : > { %v1123_v30 = vmul.f32 0.17677669, %v1117_v29 }
 0x610   : > { %v1127_v31 = vpack.c.bf16 %v1123_v30, %v1123_v30  ;;  %v2898_v30 = vld [vmem:[%s4149_s5 + $0x14] sm:$0xf] }
 0x611   : > { %1380 = vmatpush.bf16.msra.mxu3 %v1371_v28  ;;  %v2899_v28 = vld [vmem:[%s4149_s5 + $0x18] sm:$0xf] }
 0x612   : > { %2892 = vmatmul.msk.bf16.vlgmr.msrb.gmra.mxu3 %vm647_vm1, %v1127_v31  ;;  %v1437_v29 = vsel %vm654_vm0, %v2899_v28, 0  ;;  %v1418_v31 = vsel %vm654_vm0, %v2898_v30, 0 }
 0x613   : > { %1446 = vmatpush.bf16.msra.mxu2 %v1437_v29  ;;  %1427 = vmatpush.bf16.msrb.mxu1 %v1418_v31  ;;  %v3042_v31 = vld [vmem:[%s4155_s11 + $0x8] sm:$0xff] }
 0x677   : > { %v1201_v33 = vpop.f32.mrf.mxu1 }
 0x678   : > { %v1202_v34 = vadd.f32 %v1201_v33, %v3813_v32 }
 0x67a   : > { %v1262_v35 = vsel %vm647_vm1, %v1202_v34, -inf }
 0x67b   : > { %1263 = vmax.xlane.f32.xlu1 %v1262_v35  ;;  %v2900_v35 = vld [vmem:[%s4149_s5 + $0x1c] sm:$0xf] }
 0x67f   : > { %v1203_v36 = vpop.f32.mrf.mxu1 }
 0x680   : > { %v1456_v36 = vsel %vm654_vm0, %v2900_v35, 0 }
 0x681   : > { %1465 = vmatpush.bf16.msrb.mxu3 %v1456_v36 }
 0x687   : > { %v1220_v37 = vpop.f32.mrf.mxu1 }
 0x688   : > { %v1221_v43 = vadd.f32 %v1220_v37, %v3813_v32 }
 0x68a   : > { %v1265_v50 = vsel %vm647_vm1, %v1221_v43, -inf }
 0x68d   : > { %v1239_v38 = vpop.f32.mrf.mxu2 }
 0x68e   : > { %v1240_v39 = vadd.f32 %v1239_v38, %v3813_v32 }
 0x68f   : > { %v1222_v40 = vpop.f32.mrf.mxu1 }
 0x690   : > { %v1268_v42 = vsel %vm647_vm1, %v1240_v39, -inf }
 0x691   : > { %1269 = vmax.xlane.f32.xlu0 %v1268_v42 }
 0x695   : > { %v1241_v44 = vpop.f32.mrf.mxu2  ;;  %v1258_v45 = vpop.f32.mrf.mxu3 }
 0x696   : > { %v1259_v47 = vadd.f32 %v1258_v45, %v3813_v32 }
 0x698   : > { %v1271_v49 = vsel %vm647_vm1, %v1259_v47, -inf }
 0x699   : > { %1272 = vmax.xlane.f32.xlu2 %v1271_v49  ;;  %1266 = vmax.xlane.f32.xlu0 %v1265_v50 }
 0x69d   : > { %v1260_v51 = vpop.f32.mrf.mxu3 }
 0x6ee   : > { %v1264_v52 = vpop.xlane.xlu1 %1263 }
 0x6ef   : > { %v1274_v53 = vsub.f32 %v1202_v34, %v1264_v52 }
 0x6f1   : > { %v1278_v54 = vmul.f32 1.442695, %v1274_v53 }
 0x6f3   : > { %3179 = vpow2.f32 %v1278_v54 }
 0x6f9   : > { %v3180_v56 = vpop.eup %3179 }
 0x6fa   : > { %v1286_v57 = vsel %vm647_vm1, %v3180_v56, 0.0 }
 0x6fb   : > { %1287 = vadd.xlane.f32.xlu0 %v1286_v57 }
 0x704   : > { %v1270_v58 = vpop.xlane.xlu0 %1269 }
 0x705   : > { %v1276_v59 = vsub.f32 %v1240_v39, %v1270_v58 }
 0x707   : > { %v1282_v60 = vmul.f32 1.442695, %v1276_v59 }
 0x709   : > { %3181 = vpow2.f32 %v1282_v60 }
 0x70c   : > { %v1273_v61 = vpop.xlane.xlu2 %1272  ;;  %v1267_v62 = vpop.xlane.xlu0 %1266 }
 0x70d   : > { %v1277_v63 = vsub.f32 %v1259_v47, %v1273_v61  ;;  %v1275_v1 = vsub.f32 %v1221_v43, %v1267_v62 }
 0x70f   : > { %v3182_v2 = vpop.eup %3181  ;;  %v1284_v3 = vmul.f32 1.442695, %v1277_v63  ;;  %v1280_v4 = vmul.f32 1.442695, %v1275_v1  ;;  %v3141_v63 = vld [vmem:[#allocation5 + $0x1] ss:$0 sm:$0xff] }
 0x710   : > { %v1292_v5 = vsel %vm647_vm1, %v3182_v2, 0.0 }
 0x711   : > { %3183 = vpow2.f32 %v1284_v3  ;;  %1293 = vadd.xlane.f32.xlu2 %v1292_v5 }
 0x712   : > { %3185 = vpow2.f32 %v1280_v4 }
 0x717   : > { %v3184_v6 = vpop.eup %3183 }
 0x718   : > { %v3186_v7 = vpop.eup %3185  ;;  %v1295_v8 = vsel %vm647_vm1, %v3184_v6, 0.0 }
 0x719   : > { %v1289_v9 = vsel %vm647_vm1, %v3186_v7, 0.0  ;;  %1296 = vadd.xlane.f32.xlu1 %v1295_v8 }
 0x71a   : > { %1290 = vadd.xlane.f32.xlu2 %v1289_v9 }
 0x76e   : > { %v1288_v10 = vpop.xlane.xlu0 %1287 }
 0x76f   : > { %3187 = vrcp.f32 %v1288_v10 }
 0x775   : > { %v3188_v11 = vpop.eup %3187 }
 0x776   : > { %v1302_v12 = vmul.f32 %v3188_v11, %v3180_v56 }
 0x778   : > { %v1306_v13 = vpack.c.bf16 %v1302_v12, %v1302_v12  ;;  %v3040_v12 = vld [vmem:[%s4153_s9 + $0x8] sm:$0xff] }
 0x77a   : > { %2893 = vmatmul.msk.bf16.vlgmr.msrb.gmra.mxu0 %vm647_vm1, %v1306_v13  ;;  %v3044_v13 = vld [vmem:[%s4155_s11 + $0x18] sm:$0xff] }
 0x77b   : > { %1549 = vmatpush.bf16.msrb.mxu0 %v3040_v12 }
 0x784   : > { %v1294_v14 = vpop.xlane.xlu2 %1293 }
 0x785   : > { %3189 = vrcp.f32 %v1294_v14 }
 0x78b   : > { %v3190_v15 = vpop.eup %3189 }
 0x78c   : > { %v1304_v16 = vmul.f32 %v3190_v15, %v3182_v2  ;;  %v1297_v17 = vpop.xlane.xlu1 %1296 }
 0x78d   : > { %v1291_v18 = vpop.xlane.xlu2 %1290  ;;  %3191 = vrcp.f32 %v1297_v17 }
 0x78e   : > { %v1308_v19 = vpack.c.bf16 %v1304_v16, %v1304_v16  ;;  %3193 = vrcp.f32 %v1291_v18  ;;  %v3043_v16 = vld [vmem:[%s4155_s11 + $0x10] sm:$0xff] }
 0x790   : > { %2895 = vmatmul.msk.bf16.vlgmr.msrb.gmra.mxu2 %vm647_vm1, %v1308_v19 }
 0x793   : > { %v3192_v20 = vpop.eup %3191 }
 0x794   : > { %v3194_v22 = vpop.eup %3193  ;;  %v1305_v23 = vmul.f32 %v3192_v20, %v3184_v6 }
 0x795   : > { %v1303_v24 = vmul.f32 %v3194_v22, %v3186_v7 }
 0x796   : > { %v1309_v0 = vpack.c.bf16 %v1305_v23, %v1305_v23 }
 0x797   : > { %v1307_v25 = vpack.c.bf16 %v1303_v24, %v1303_v24 }
 0x798   : > { %2896 = vmatmul.msk.bf16.vlgmr.msra.gmra.mxu3 %vm647_vm1, %v1309_v0  ;;  %v3142_v0 = vld [vmem:[#allocation7 + $0x1] ss:$0 sm:$0xff] }
 0x799   : > { %2894 = vmatmul.msk.bf16.vlgmr.msra.gmra.mxu1 %vm647_vm1, %v1307_v25 }
 0x79a   : > { %1602 = vmatpush.bf16.msra.mxu1 %v3044_v13 }
 0x79e   : > { %1603 = vmatpush.bf16.msra.mxu1 %v3043_v16 }
 0x7a2   : > { %1604 = vmatpush.bf16.msra.mxu1 %v3042_v31 }
 0x7f7   : > { %v1325_v33 = vpop.f32.mrf.mxu0 }
 0x7f8   : > { %v1386_v34 = vpack.c.bf16 %v1325_v33, %v1325_v33  ;;  %v3041_v33 = vld [vmem:[%s4155_s11] sm:$0xff] }
 0x7f9   : > { %1605 = vmatpush.bf16.msra.mxu1 %v3041_v33 }
 0x7fa   : > { %2901 = vmatmul.msk.bf16.vlgmr.msra.gmra.mxu0 %vm647_vm1, %v1386_v34  ;;  %v3144_v34 = vld [vmem:[%s4154_s10] ss:$0 sm:$0xff] }
 0x7ff   : > { %v1327_v37 = vpop.f32.mrf.mxu0 }
 0x813   : > { %v1363_v38 = vpop.f32.mrf.mxu2 }
 0x814   : > { %v1388_v39 = vpack.c.bf16 %v1363_v38, %v1363_v38 }
 0x816   : > { %v1344_v40 = vpop.f32.mrf.mxu1  ;;  %2903 = vmatmul.msk.bf16.vlgmr.msra.gmra.mxu2 %vm647_vm1, %v1388_v39 }
 0x817   : > { %v1387_v42 = vpack.c.bf16 %v1344_v40, %v1344_v40  ;;  %v3145_v40 = vld [vmem:[%s4156_s12] ss:$0 sm:$0xff] }
 0x819   : > { %2902 = vmatmul.msk.bf16.vlgmr.msrb.gmra.mxu1 %vm647_vm1, %v1387_v42 }
 0x81b   : > { %v1365_v43 = vpop.f32.mrf.mxu2  ;;  %v1382_v44 = vpop.f32.mrf.mxu3 }
 0x81c   : > { %v1389_v45 = vpack.c.bf16 %v1382_v44, %v1382_v44 }
 0x81e   : > { %v1346_v47 = vpop.f32.mrf.mxu1  ;;  %2904 = vmatmul.msk.bf16.vlgmr.msrb.gmra.mxu3 %vm647_vm1, %v1389_v45 }
 0x823   : > { %v1384_v49 = vpop.f32.mrf.mxu3 }
 0x877   : > { %v1410_v50 = vpop.f32.mrf.mxu0 }
 0x878   : > { %v1471_v56 = vsel %vm1021_vm2, %v1410_v50, 0.0 }
 0x87f   : > { %v1412_v51 = vpop.f32.mrf.mxu0 }
 0x896   : > { %v1429_v52 = vpop.f32.mrf.mxu1 }
 0x897   : > { %v1472_v54 = vsel %vm1021_vm2, %v1429_v52, 0.0 }
 0x898   : > { %v1473_v59 = vadd.f32 %v1472_v54, %v1471_v56 }
 0x899   : > { %v1448_v53 = vpop.f32.mrf.mxu2 }
 0x89a   : > { %v1474_v57 = vsel %vm1021_vm2, %v1448_v53, 0.0 }
 0x89b   : > { %v1475_v60 = vadd.f32 %v1474_v57, %v1473_v59 }
 0x89e   : > { %v1431_v58 = vpop.f32.mrf.mxu1 }
 0x8a1   : > { %v1450_v61 = vpop.f32.mrf.mxu2  ;;  %v1467_v62 = vpop.f32.mrf.mxu3 }
 0x8a2   : > { %v1476_v1 = vsel %vm1021_vm2, %v1467_v62, 0.0 }
 0x8a3   : > { %v1477_v2 = vadd.f32 %v1476_v1, %v1475_v60  ;;  %v3146_v1 = vld [vmem:[#allocation7 + $0x2] ss:$0 sm:$0xff] }
 0x8a5   : > { %v1483_v3 = vadd.f32 %v3141_v63, %v1477_v2 }
 0x8a7   : > { %v1484_v4 = vadd.f32 %v1483_v3, %v3764_v41  ;;  %v3039_v41 = vld [vmem:[%s4153_s9] sm:$0xff] }
 0x8a8   : > { %1550 = vmatpush.bf16.msrb.mxu0 %v3039_v41 }
 0x8a9   : > { %v1469_v5 = vpop.f32.mrf.mxu3  ;;  %v1485_v6 = vsel %vm1021_vm2, %v1484_v4, 0.0 }
 0x8aa   : > { %1486 = vadd.xlane.f32.xlu1 %v1485_v6 }
 0x91d   : > { %v1487_v7 = vpop.xlane.xlu1 %1486 }
 0x91e   : > { %v1488_v8 = vmul.f32 %v1487_v7, %v3750_v21  ;;  %v2933_v7 = vld [vmem:[%s4148_s4 + $0x18] sm:$0xf] }
 0x920   : > { %v1489_v9 = vsub.f32 %v1484_v4, %v1488_v8  ;;  %v3147_v4 = vld [vmem:[%s4152_s8 + $0x2] ss:$0 sm:$0xff]  ;;  %v2934_v8 = vld [vmem:[%s4148_s4 + $0x1c] sm:$0xf] }
 0x922   : > { %v1490_v10 = vmul.f32 %v1489_v9, %v1489_v9 }
 0x924   : > { %v1491_v11 = vsel %vm1021_vm2, %v1490_v10, 0.0  ;;  %v1671_v10 = vsel %vm654_vm0, %v2933_v7, 0 }
 0x925   : > { %1492 = vadd.xlane.f32.xlu0 %v1491_v11  ;;  %v1701_v11 = vsel %vm654_vm0, %v2934_v8, 0  ;;  %1680 = vmatpush.bf16.msrb.mxu2 %v1671_v10 }
 0x926   : > { %1710 = vmatpush.bf16.msra.mxu3 %v1701_v11 }
 0x998   : > { %v1493_v14 = vpop.xlane.xlu0 %1492 }
 0x999   : > { %v1494_v15 = vmul.f32 %v1493_v14, %v3750_v21 }
 0x99b   : > { %v1495_v17 = vadd.f32 1e-05, %v1494_v15 }
 0x99d   : > { %3195 = vrsqrt.f32 %v1495_v17  ;;  %vm1502_vm8 = vweird.f32 %v1495_v17 }
 0x9a3   : > { %v3196_v18 = vpop.eup %3195 }
 0x9a4   : > { %v1497_v19 = vmul.f32 %v3196_v18, %v1495_v17  ;;  %vm1503_vm7 = vweird.f32 %v3196_v18 }
 0x9a5   : > { %vm1504_vm9 = vmor %vm1502_vm8, %vm1503_vm7 }
 0x9a6   : > { %v1498_v20 = vmul.f32 %v3196_v18, %v1497_v19 }
 0x9a8   : > { %v1499_v22 = vmul.f32 0.5, %v1498_v20 }
 0x9aa   : > { %v1500_v23 = vsub.f32 1.5, %v1499_v22 }
 0x9ac   : > { %v1501_v24 = vmul.f32 %v3196_v18, %v1500_v23 }
 0x9ae   : > { %v1505_v25 = vsel %vm1504_vm9, %v3196_v18, %v1501_v24 }
 0x9af   : > { %v1506_v27 = vmul.f32 %v1505_v25, %v1489_v9  ;;  %v2935_v9 = vld [vmem:[%s4148_s4 + $0x20] sm:$0xf] }
 0x9b0   : > { %v1727_v12 = vsel %vm654_vm0, %v2935_v9, 0 }
 0x9b1   : > { %v1512_v28 = vmul.f32 %v3142_v0, %v1506_v27  ;;  %1736 = vmatpush.bf16.msra.mxu0 %v1727_v12 }
 0x9b3   : > { %v1518_v29 = vadd.f32 %v3143_v26, %v1512_v28 }
 0x9b5   : > { %v1519_v30 = vpack.c.bf16 %v1518_v29, %v1518_v29 }
 0x9b7   : > { %2914 = vmatmul.msk.bf16.vlgmr.msrb.gmra.mxu0 %vm1021_vm2, %v1519_v30 }
 0xa34   : > { %v1552_v35 = vpop.f32.mrf.mxu0 }
 0xa35   : > { %v1553_v36 = vadd.f32 %v3144_v34, %v1552_v35 }
 0xa37   : > { %v1556_v37 = vmax.f32 %v1553_v36, 0.0 }
 0xa39   : > { %v1557_v38 = vpack.c.bf16 %v1556_v37, %v1556_v37 }
 0xa3b   : > { %2931 = vmatmul.msk.bf16.vlgmr.msra.gmra.mxu1 %vm1594_vm10, %v1557_v38 }
 0xa3c   : > { %v1554_v39 = vpop.f32.mrf.mxu0 }
 0xab8   : > { %v1607_v42 = vpop.f32.mrf.mxu1 }
 0xab9   : > { %v1608_v43 = vadd.f32 %v3145_v40, %v1607_v42 }
 0xabb   : > { %v1611_v44 = vadd.f32 %v1608_v43, %v1518_v29 }
 0xabd   : > { %v1612_v45 = vsel %vm1021_vm2, %v1611_v44, 0.0 }
 0xabe   : > { %1613 = vadd.xlane.f32.xlu2 %v1612_v45 }
 0xac0   : > { %v1609_v47 = vpop.f32.mrf.mxu1 }
 0xb31   : > { %v1614_v49 = vpop.xlane.xlu2 %1613 }
 0xb32   : > { %v1615_v50 = vmul.f32 %v1614_v49, %v3750_v21 }
 0xb34   : > { %v1616_v51 = vsub.f32 %v1611_v44, %v1615_v50 }
 0xb36   : > { %v1617_v52 = vmul.f32 %v1616_v51, %v1616_v51 }
 0xb38   : > { %v1618_v53 = vsel %vm1021_vm2, %v1617_v52, 0.0 }
 0xb39   : > { %1619 = vadd.xlane.f32.xlu1 %v1618_v53 }
 0xbac   : > { %v1620_v54 = vpop.xlane.xlu1 %1619 }
 0xbad   : > { %v1621_v56 = vmul.f32 %v1620_v54, %v3750_v21 }
 0xbaf   : > { %v1622_v57 = vadd.f32 1e-05, %v1621_v56 }
 0xbb1   : > { %3197 = vrsqrt.f32 %v1622_v57  ;;  %vm1629_vm12 = vweird.f32 %v1622_v57 }
 0xbb7   : > { %v3198_v58 = vpop.eup %3197 }
 0xbb8   : > { %v1624_v59 = vmul.f32 %v3198_v58, %v1622_v57  ;;  %vm1630_vm11 = vweird.f32 %v3198_v58 }
 0xbb9   : > { %vm1631_vm13 = vmor %vm1629_vm12, %vm1630_vm11 }
 0xbba   : > { %v1625_v60 = vmul.f32 %v3198_v58, %v1624_v59 }
 0xbbc   : > { %v1626_v61 = vmul.f32 0.5, %v1625_v60 }
 0xbbe   : > { %v1627_v62 = vsub.f32 1.5, %v1626_v61 }
 0xbc0   : > { %v1628_v63 = vmul.f32 %v3198_v58, %v1627_v62 }
 0xbc2   : > { %v1632_v2 = vsel %vm1631_vm13, %v3198_v58, %v1628_v63 }
 0xbc3   : > { %v1633_v3 = vmul.f32 %v1632_v2, %v1616_v51 }
 0xbc5   : > { %v1639_v5 = vmul.f32 %v3146_v1, %v1633_v3  ;;  %v3237_v1 = vld [vmem:[%s3703_s6] sm:$0xff] }
 0xbc7   : > { %v3896_v6 = vadd.f32 %v3147_v4, %v1639_v5 }
 0xbc9   : > { %1653 = vrot.lane.b32.xlu1 %v3896_v6, %s3442_s15  ;;  %1650 = vrot.lane.b32.xlu2 %v3896_v6, %s3443_s14 }
 0xbca   : > { %1647 = vrot.lane.b32.xlu0 %v3896_v6, %s3441_s30 }
 0xc23   : > { %v1651_v15 = vpop.permute.xlu2 %1650 }
 0xc3b   : > { %v1654_v14 = vpop.permute.xlu1 %1653 }
 0xc3c   : > { %v1648_v41 = vpop.permute.xlu0 %1647  ;;  %v1657_v16 = vpack.c.bf16 %v1654_v14, %v1651_v15 }
 0xc3d   : > { %v1656_v13 = vpack.c.bf16 %v1648_v41, %v3896_v6 }
 0xc3f   : > { %2936 = vmatmul.msk.bf16.vlgmr.msrb.gmra.mxu2 %vm647_vm1, %v1656_v13  ;;  %2938 = vmatmul.msk.bf16.vlgmr.msra.gmra.mxu3 %vm647_vm1, %v1656_v13 }
 0xc40   : > { %2940 = vmatmul.msk.bf16.vlgmr.msra.gmra.mxu0 %vm647_vm1, %v1656_v13 }
 0xc4f   : > { %2937 = vmatmul.msk.bf16.gmra.mxu2 %vm647_vm1, %v1657_v16  ;;  %2939 = vmatmul.msk.bf16.gmra.mxu3 %vm647_vm1, %v1657_v16 }
 0xc50   : > { %2941 = vmatmul.msk.bf16.gmra.mxu0 %vm647_vm1, %v1657_v16 }
 0xcbd   : > { %v1738_v17 = vpop.f32.mrf.mxu0 }
 0xcbe   : > { %v1748_v18 = vpack.c.bf16 %v1738_v17, %v1738_v17 }
 0xcc0   : > { %v1880_v19 = vsel %vm654_vm0, %v1748_v18, 0 }
 0xcc1   : > { %1889 = vmatpush.bf16.msrb.mxu0 %v1880_v19 }
 0xcc2   : > { %v1682_v20 = vpop.f32.mrf.mxu2  ;;  %v1712_v22 = vpop.f32.mrf.mxu3 }
 0xcc3   : > { %v1722_v23 = vpack.c.bf16 %v1712_v22, %v1712_v22  ;;  %v1692_v25 = vmul.f32 0.17677669, %v1682_v20 }
 0xcc5   : > { %v1756_v24 = vsel %vm647_vm1, %v1722_v23, 0  ;;  %v1740_v0 = vpop.f32.mrf.mxu0  ;;  %v1696_v29 = vpack.c.bf16 %v1692_v25, %v1692_v25 }
 0xcc6   : > { %1765 = vmatpush.bf16.xpose.msrb.mxu1 %v1756_v24  ;;  %v1749_v26 = vpack.c.bf16 %v1740_v0, %v1740_v0 }
 0xcc8   : > { %v1899_v34 = vsel %vm654_vm0, %v1749_v26, 0 }
 0xcca   : > { %v1684_v27 = vpop.f32.mrf.mxu2  ;;  %v1714_v28 = vpop.f32.mrf.mxu3 }
 0xccb   : > { %v1723_v30 = vpack.c.bf16 %v1714_v28, %v1714_v28  ;;  %v1693_v42 = vmul.f32 0.17677669, %v1684_v27 }
 0xccd   : > { %v1775_v31 = vsel %vm647_vm1, %v1723_v30, 0  ;;  %v1743_v33 = vpop.f32.mrf.mxu0  ;;  %2942 = vmatmul.msk.bf16.vlgmr.msrb.gmra.mxu1 %vm647_vm1, %v1696_v29  ;;  %v1697_v49 = vpack.c.bf16 %v1693_v42, %v1693_v42 }
 0xcce   : > { %1784 = vmatpush.bf16.xpose.msra.mxu1 %v1775_v31  ;;  %v1750_v35 = vpack.c.bf16 %v1743_v33, %v1743_v33 }
 0xcd0   : > { %v1918_v40 = vsel %vm654_vm0, %v1750_v35, 0 }
 0xcd2   : > { %v1687_v36 = vpop.f32.mrf.mxu2  ;;  %v1717_v37 = vpop.f32.mrf.mxu3 }
 0xcd3   : > { %v1724_v38 = vpack.c.bf16 %v1717_v37, %v1717_v37  ;;  %v1694_v43 = vmul.f32 0.17677669, %v1687_v36 }
 0xcd5   : > { %v1794_v39 = vsel %vm647_vm1, %v1724_v38, 0  ;;  %v1745_v44 = vpop.f32.mrf.mxu0  ;;  %v1698_v50 = vpack.c.bf16 %v1694_v43, %v1694_v43 }
 0xcd6   : > { %1908 = vmatpush.bf16.msrb.mxu1 %v1899_v34  ;;  %1803 = vmatpush.bf16.xpose.msra.mxu2 %v1794_v39  ;;  %v1751_v45 = vpack.c.bf16 %v1745_v44, %v1745_v44 }
 0xcd8   : > { %v1937_v54 = vsel %vm654_vm0, %v1751_v45, 0 }
 0xcda   : > { %v1719_v47 = vpop.f32.mrf.mxu3  ;;  %v1689_v52 = vpop.f32.mrf.mxu2 }
 0xcdb   : > { %v1725_v51 = vpack.c.bf16 %v1719_v47, %v1719_v47  ;;  %v1695_v56 = vmul.f32 0.17677669, %v1689_v52 }
 0xcdd   : > { %v1813_v53 = vsel %vm647_vm1, %v1725_v51, 0  ;;  %2943 = vmatmul.msk.bf16.vlgmr.msra.gmra.mxu1 %vm647_vm1, %v1697_v49  ;;  %2944 = vmatmul.msk.bf16.vlgmr.msra.gmra.mxu2 %vm647_vm1, %v1698_v50  ;;  %v1699_v57 = vpack.c.bf16 %v1695_v56, %v1695_v56  ;;  %v2950_v51 = vld [vmem:[%s4149_s5 + $0x20] sm:$0xf]  ;;  %v2951_v56 = vld [vmem:[%s4149_s5 + $0x24] sm:$0xf] }
 0xcde   : > { %1927 = vmatpush.bf16.msrb.mxu2 %v1918_v40  ;;  %1822 = vmatpush.bf16.xpose.msrb.mxu3 %v1813_v53  ;;  %v1965_v52 = vsel %vm654_vm0, %v2950_v51, 0  ;;  %v2952_v53 = vld [vmem:[%s4149_s5 + $0x28] sm:$0xf] }
 0xcdf   : > { %1974 = vmatpush.bf16.msra.mxu0 %v1965_v52 }
 0xce5   : > { %2945 = vmatmul.msk.bf16.vlgmr.msrb.gmra.mxu3 %vm647_vm1, %v1699_v57  ;;  %v1984_v57 = vsel %vm654_vm0, %v2951_v56, 0 }
 0xce6   : > { %1946 = vmatpush.bf16.msra.mxu3 %v1937_v54  ;;  %v2003_v54 = vsel %vm654_vm0, %v2952_v53, 0  ;;  %1993 = vmatpush.bf16.msra.mxu1 %v1984_v57 }
 0xce7   : > { %2012 = vmatpush.bf16.msra.mxu2 %v2003_v54 }
 0xd4a   : > { %v1767_v58 = vpop.f32.mrf.mxu1 }
 0xd4b   : > { %v1768_v59 = vadd.f32 %v1767_v58, %v3706_v48 }
 0xd4d   : > { %v1828_v60 = vsel %vm647_vm1, %v1768_v59, -inf }
 0xd4e   : > { %1829 = vmax.xlane.f32.xlu1 %v1828_v60  ;;  %v2953_v60 = vld [vmem:[%s4149_s5 + $0x2c] sm:$0xf] }
 0xd52   : > { %v1769_v61 = vpop.f32.mrf.mxu1 }
 0xd53   : > { %v2022_v61 = vsel %vm654_vm0, %v2953_v60, 0 }
 0xd54   : > { %2031 = vmatpush.bf16.msrb.mxu3 %v2022_v61 }
 0xd5a   : > { %v1786_v62 = vpop.f32.mrf.mxu1 }
 0xd5b   : > { %v1787_v5 = vadd.f32 %v3237_v1, %v1786_v62 }
 0xd5d   : > { %v1831_v10 = vsel %vm647_vm1, %v1787_v5, -inf }
 0xd60   : > { %v1805_v63 = vpop.f32.mrf.mxu2 }
 0xd61   : > { %v1806_v2 = vadd.f32 %v3237_v1, %v1805_v63  ;;  %v2961_v63 = vld [vmem:[%s4148_s4 + $0x2c] sm:$0xf] }
 0xd62   : > { %v1788_v3 = vpop.f32.mrf.mxu1 }
 0xd63   : > { %v1834_v4 = vsel %vm647_vm1, %v1806_v2, -inf }
 0xd64   : > { %1835 = vmax.xlane.f32.xlu0 %v1834_v4 }
 0xd68   : > { %v1807_v7 = vpop.f32.mrf.mxu2  ;;  %v1824_v8 = vpop.f32.mrf.mxu3 }
 0xd69   : > { %v1825_v9 = vadd.f32 %v3237_v1, %v1824_v8  ;;  %v2166_v1 = vsel %vm654_vm0, %v2961_v63, 0 }
 0xd6b   : > { %v1837_v48 = vsel %vm647_vm1, %v1825_v9, -inf }
 0xd6c   : > { %1832 = vmax.xlane.f32.xlu0 %v1831_v10  ;;  %1838 = vmax.xlane.f32.xlu2 %v1837_v48 }
 0xd70   : > { %v1826_v11 = vpop.f32.mrf.mxu3 }
 0xdc1   : > { %v1830_v12 = vpop.xlane.xlu1 %1829 }
 0xdc2   : > { %v1840_v41 = vsub.f32 %v1768_v59, %v1830_v12 }
 0xdc4   : > { %v1844_v13 = vmul.f32 1.442695, %v1840_v41 }
 0xdc6   : > { %3199 = vpow2.f32 %v1844_v13 }
 0xdcc   : > { %v3200_v14 = vpop.eup %3199 }
 0xdcd   : > { %v1852_v15 = vsel %vm647_vm1, %v3200_v14, 0.0 }
 0xdce   : > { %1853 = vadd.xlane.f32.xlu1 %v1852_v15  ;;  %v2959_v15 = vld [vmem:[%s4148_s4 + $0x24] sm:$0xf] }
 0xdd7   : > { %v1836_v16 = vpop.xlane.xlu0 %1835 }
 0xdd8   : > { %v1842_v17 = vsub.f32 %v1806_v2, %v1836_v16  ;;  %v2960_v2 = vld [vmem:[%s4148_s4 + $0x28] sm:$0xf]  ;;  %v2110_v16 = vsel %vm654_vm0, %v2959_v15, 0 }
 0xdd9   : > { %v2140_v3 = vsel %vm654_vm0, %v2960_v2, 0 }
 0xdda   : > { %v1848_v18 = vmul.f32 1.442695, %v1842_v17 }
 0xddc   : > { %3201 = vpow2.f32 %v1848_v18 }
 0xddf   : > { %v1833_v19 = vpop.xlane.xlu0 %1832  ;;  %v1839_v20 = vpop.xlane.xlu2 %1838 }
 0xde0   : > { %v1841_v22 = vsub.f32 %v1787_v5, %v1833_v19  ;;  %v1843_v23 = vsub.f32 %v1825_v9, %v1839_v20 }
 0xde2   : > { %v3202_v24 = vpop.eup %3201  ;;  %v1846_v0 = vmul.f32 1.442695, %v1841_v22  ;;  %v1850_v25 = vmul.f32 1.442695, %v1843_v23 }
 0xde3   : > { %v1858_v26 = vsel %vm647_vm1, %v3202_v24, 0.0 }
 0xde4   : > { %3203 = vpow2.f32 %v1846_v0  ;;  %1859 = vadd.xlane.f32.xlu2 %v1858_v26  ;;  %v3148_v0 = vld [vmem:[#allocation5 + $0x2] ss:$0 sm:$0xff] }
 0xde5   : > { %3205 = vpow2.f32 %v1850_v25 }
 0xdea   : > { %v3204_v27 = vpop.eup %3203 }
 0xdeb   : > { %v3206_v28 = vpop.eup %3205  ;;  %v1855_v29 = vsel %vm647_vm1, %v3204_v27, 0.0 }
 0xdec   : > { %1856 = vadd.xlane.f32.xlu2 %v1855_v29  ;;  %v1861_v30 = vsel %vm647_vm1, %v3206_v28, 0.0 }
 0xded   : > { %1862 = vadd.xlane.f32.xlu0 %v1861_v30 }
 0xe41   : > { %v1854_v31 = vpop.xlane.xlu1 %1853 }
 0xe42   : > { %3207 = vrcp.f32 %v1854_v31 }
 0xe48   : > { %v3208_v33 = vpop.eup %3207 }
 0xe49   : > { %v1868_v34 = vmul.f32 %v3208_v33, %v3200_v14 }
 0xe4b   : > { %v1872_v35 = vpack.c.bf16 %v1868_v34, %v1868_v34 }
 0xe4d   : > { %2946 = vmatmul.msk.bf16.vlgmr.msrb.gmra.mxu0 %vm647_vm1, %v1872_v35 }
 0xe4e   : > { %2119 = vmatpush.bf16.msrb.mxu0 %v2110_v16 }
 0xe57   : > { %v1860_v36 = vpop.xlane.xlu2 %1859 }
 0xe58   : > { %3209 = vrcp.f32 %v1860_v36 }
 0xe5e   : > { %v3210_v37 = vpop.eup %3209 }
 0xe5f   : > { %v1870_v38 = vmul.f32 %v3210_v37, %v3202_v24  ;;  %v1857_v39 = vpop.xlane.xlu2 %1856 }
 0xe60   : > { %v1863_v40 = vpop.xlane.xlu0 %1862  ;;  %3211 = vrcp.f32 %v1857_v39 }
 0xe61   : > { %v1874_v42 = vpack.c.bf16 %v1870_v38, %v1870_v38  ;;  %3213 = vrcp.f32 %v1863_v40 }
 0xe63   : > { %2948 = vmatmul.msk.bf16.vlgmr.msrb.gmra.mxu2 %vm647_vm1, %v1874_v42 }
 0xe64   : > { %2175 = vmatpush.bf16.msrb.mxu2 %v2166_v1 }
 0xe66   : > { %v3212_v43 = vpop.eup %3211 }
 0xe67   : > { %v3214_v44 = vpop.eup %3213  ;;  %v1869_v45 = vmul.f32 %v3212_v43, %v3204_v27 }
 0xe68   : > { %v1871_v47 = vmul.f32 %v3214_v44, %v3206_v28 }
 0xe69   : > { %v1873_v49 = vpack.c.bf16 %v1869_v45, %v1869_v45 }
 0xe6a   : > { %v1875_v50 = vpack.c.bf16 %v1871_v47, %v1871_v47 }
 0xe6b   : > { %2947 = vmatmul.msk.bf16.vlgmr.msrb.gmra.mxu1 %vm647_vm1, %v1873_v49 }
 0xe6c   : > { %2949 = vmatmul.msk.bf16.vlgmr.msra.gmra.mxu3 %vm647_vm1, %v1875_v50  ;;  %2149 = vmatpush.bf16.msrb.mxu1 %v2140_v3 }
 0xeca   : > { %v1891_v58 = vpop.f32.mrf.mxu0 }
 0xecb   : > { %v1952_v59 = vpack.c.bf16 %v1891_v58, %v1891_v58 }
 0xecd   : > { %2954 = vmatmul.msk.bf16.vlgmr.msra.gmra.mxu0 %vm647_vm1, %v1952_v59 }
 0xed2   : > { %v1893_v62 = vpop.f32.mrf.mxu0 }
 0xee6   : > { %v1929_v4 = vpop.f32.mrf.mxu2 }
 0xee7   : > { %v1954_v5 = vpack.c.bf16 %v1929_v4, %v1929_v4 }
 0xee8   : > { %v1910_v7 = vpop.f32.mrf.mxu1 }
 0xee9   : > { %v1953_v8 = vpack.c.bf16 %v1910_v7, %v1910_v7  ;;  %2956 = vmatmul.msk.bf16.vlgmr.msra.gmra.mxu2 %vm647_vm1, %v1954_v5  ;;  %v3149_v7 = vld [vmem:[#allocation7 + $0x3] ss:$0 sm:$0xff] }
 0xeeb   : > { %2955 = vmatmul.msk.bf16.vlgmr.msra.gmra.mxu1 %vm647_vm1, %v1953_v8 }
 0xeee   : > { %v1931_v9 = vpop.f32.mrf.mxu2 }
 0xeef   : > { %v1948_v10 = vpop.f32.mrf.mxu3 }
 0xef0   : > { %v1955_v48 = vpack.c.bf16 %v1948_v10, %v1948_v10  ;;  %v1912_v11 = vpop.f32.mrf.mxu1  ;;  %v3150_v10 = vld [vmem:[%s4152_s8 + $0x3] ss:$0 sm:$0xff] }
 0xef2   : > { %2957 = vmatmul.msk.bf16.vlgmr.msrb.gmra.mxu3 %vm647_vm1, %v1955_v48 }
 0xef7   : > { %v1950_v12 = vpop.f32.mrf.mxu3 }
 0xef9   : > { %2966 = vmatmul.msk.bf16.vlgmr.msrb.gmra.mxu2 %vm647_vm1, %v3782_v46 }
 0xefb   : > { %2964 = vmatmul.msk.bf16.vlgmr.msrb.gmra.mxu1 %vm647_vm1, %v3782_v46 }
 0xf09   : > { %2967 = vmatmul.msk.bf16.gmra.mxu2 %vm647_vm1, %v3793_v55 }
 0xf0b   : > { %2965 = vmatmul.msk.bf16.gmra.mxu1 %vm647_vm1, %v3793_v55 }
 0xf4a   : > { %v1976_v41 = vpop.f32.mrf.mxu0 }
 0xf4b   : > { %v2037_v19 = vsel %vm1021_vm2, %v1976_v41, 0.0 }
 0xf52   : > { %v1978_v13 = vpop.f32.mrf.mxu0 }
 0xf68   : > { %v1995_v14 = vpop.f32.mrf.mxu1 }
 0xf69   : > { %v2038_v18 = vsel %vm1021_vm2, %v1995_v14, 0.0 }
 0xf6a   : > { %v2039_v22 = vadd.f32 %v2038_v18, %v2037_v19 }
 0xf6c   : > { %v2014_v17 = vpop.f32.mrf.mxu2 }
 0xf6d   : > { %v2040_v20 = vsel %vm1021_vm2, %v2014_v17, 0.0 }
 0xf6e   : > { %v2041_v23 = vadd.f32 %v2040_v20, %v2039_v22 }
 0xf70   : > { %v1997_v46 = vpop.f32.mrf.mxu1 }
 0xf74   : > { %v2016_v55 = vpop.f32.mrf.mxu2 }
 0xf75   : > { %v2033_v24 = vpop.f32.mrf.mxu3 }
 0xf76   : > { %v2042_v25 = vsel %vm1021_vm2, %v2033_v24, 0.0 }
 0xf77   : > { %v2043_v26 = vadd.f32 %v2042_v25, %v2041_v23 }
 0xf78   : > { %v2151_v27 = vpop.f32.mrf.mxu1 }
 0xf79   : > { %v2049_v28 = vadd.f32 %v3148_v0, %v2043_v26  ;;  %v2161_v29 = vpack.c.bf16 %v2151_v27, %v2151_v27 }
 0xf7b   : > { %v2195_v30 = vsel %vm647_vm1, %v2161_v29, 0  ;;  %v2050_v31 = vadd.f32 %v2049_v28, %v3896_v6 }
 0xf7c   : > { %v2177_v33 = vpop.f32.mrf.mxu2  ;;  %2204 = vmatpush.bf16.xpose.msra.mxu3 %v2195_v30 }
 0xf7d   : > { %v2035_v34 = vpop.f32.mrf.mxu3  ;;  %v2187_v35 = vpack.c.bf16 %v2177_v33, %v2177_v33  ;;  %v2051_v36 = vsel %vm1021_vm2, %v2050_v31, 0.0 }
 0xf7e   : > { %2052 = vadd.xlane.f32.xlu0 %v2051_v36 }
 0xf7f   : > { %v2319_v37 = vsel %vm654_vm0, %v2187_v35, 0 }
 0xf80   : > { %v2153_v38 = vpop.f32.mrf.mxu1  ;;  %2328 = vmatpush.bf16.msra.mxu2 %v2319_v37 }
 0xf81   : > { %v2162_v39 = vpack.c.bf16 %v2153_v38, %v2153_v38 }
 0xf83   : > { %v2214_v40 = vsel %vm647_vm1, %v2162_v39, 0 }
 0xf84   : > { %v2179_v42 = vpop.f32.mrf.mxu2  ;;  %2223 = vmatpush.bf16.xpose.msrb.mxu3 %v2214_v40 }
 0xf85   : > { %v2188_v46 = vpack.c.bf16 %v2179_v42, %v2179_v42 }
 0xf87   : > { %v2338_v22 = vsel %vm654_vm0, %v2188_v46, 0 }
 0xf88   : > { %v2156_v43 = vpop.f32.mrf.mxu1 }
 0xf89   : > { %v2163_v44 = vpack.c.bf16 %v2156_v43, %v2156_v43 }
 0xf8b   : > { %v2233_v6 = vsel %vm647_vm1, %v2163_v44, 0 }
 0xf8c   : > { %v2182_v45 = vpop.f32.mrf.mxu2  ;;  %2242 = vmatpush.bf16.xpose.msra.mxu0 %v2233_v6 }
 0xf8d   : > { %v2189_v12 = vpack.c.bf16 %v2182_v45, %v2182_v45 }
 0xf8f   : > { %v2357_v14 = vsel %vm654_vm0, %v2189_v12, 0 }
 0xf90   : > { %v2158_v47 = vpop.f32.mrf.mxu1 }
 0xf91   : > { %v2164_v49 = vpack.c.bf16 %v2158_v47, %v2158_v47 }
 0xf93   : > { %v2252_v50 = vsel %vm647_vm1, %v2164_v49, 0 }
 0xf94   : > { %v2184_v51 = vpop.f32.mrf.mxu2  ;;  %2261 = vmatpush.bf16.xpose.msra.mxu1 %v2252_v50 }
 0xf95   : > { %v2190_v52 = vpack.c.bf16 %v2184_v51, %v2184_v51 }
 0xf97   : > { %v2376_v53 = vsel %vm654_vm0, %v2190_v52, 0 }
 0xf9c   : > { %2385 = vmatpush.bf16.msrb.mxu1 %v2376_v53 }
 0xff1   : > { %v2053_v54 = vpop.xlane.xlu0 %2052 }
 0xff2   : > { %v2054_v56 = vmul.f32 %v2053_v54, %v3750_v21 }
 0xff4   : > { %v2055_v57 = vsub.f32 %v2050_v31, %v2054_v56 }
 0xff6   : > { %v2056_v58 = vmul.f32 %v2055_v57, %v2055_v57 }
 0xff8   : > { %v2057_v59 = vsel %vm1021_vm2, %v2056_v58, 0.0 }
 0xff9   : > { %2058 = vadd.xlane.f32.xlu1 %v2057_v59 }
0x106c   : > { %v2059_v60 = vpop.xlane.xlu1 %2058 }
0x106d   : > { %v2060_v61 = vmul.f32 %v2059_v60, %v3750_v21 }
0x106f   : > { %v2061_v62 = vadd.f32 1e-05, %v2060_v61 }
0x1071   : > { %3215 = vrsqrt.f32 %v2061_v62  ;;  %vm2068_vm15 = vweird.f32 %v2061_v62 }
0x1077   : > { %v3216_v63 = vpop.eup %3215 }
0x1078   : > { %v2063_v1 = vmul.f32 %v3216_v63, %v2061_v62  ;;  %vm2069_vm14 = vweird.f32 %v3216_v63 }
0x1079   : > { %vm2070_vm3 = vmor %vm2068_vm15, %vm2069_vm14 }
0x107a   : > { %v2064_v2 = vmul.f32 %v3216_v63, %v2063_v1 }
0x107c   : > { %v2065_v3 = vmul.f32 0.5, %v2064_v2 }
0x107e   : > { %v2066_v4 = vsub.f32 1.5, %v2065_v3 }
0x1080   : > { %v2067_v5 = vmul.f32 %v3216_v63, %v2066_v4 }
0x1082   : > { %v2071_v8 = vsel %vm2070_vm3, %v3216_v63, %v2067_v5 }
0x1083   : > { %v2072_v9 = vmul.f32 %v2071_v8, %v2055_v57 }
0x1085   : > { %v2078_v48 = vmul.f32 %v3149_v7, %v2072_v9 }
0x1087   : > { %v4007_v11 = vadd.f32 %v3150_v10, %v2078_v48 }
0x1089   : > { %2092 = vrot.lane.b32.xlu1 %v4007_v11, %s3442_s15  ;;  %2089 = vrot.lane.b32.xlu0 %v4007_v11, %s3443_s14  ;;  %s3036_s14 = sshll.u32 %s3549_s25, 3 }
0x108a   : > { %2086 = vrot.lane.b32.xlu2 %v4007_v11, %s3441_s30  ;;  %s2703_s22 = scalar_lea.hbm %s4183_s13, %s3036_s14  ;;  %s2693_s30 = scalar_lea.sflag [#allocation4], %s3632_s17 }
0x108b   : > { %s2707_s20 = sshll.u32 %s2703_s22, 4  ;;  %s2708_s20 = int_to_ptr.hbm [resolvable:$true] %s2707_s20 }
0x108c   : > { %s3372_s25 = sshra.s32 %s2708_s20, 4  ;;  %s3373_s25 = int_to_ptr.hbm [resolvable:$true] %s3372_s25 }
0x108d   : > { %s3374_s15 = scalar_lea.hbm %s3373_s25, 8  ;;  %p3379_p8 = scmp.lt.s32.totalorder %s3373_s25, %s4183_s13 }
0x108e   : > { %p3375_p1 = scmp.ne.s32.totalorder %s3373_s25, %s3374_s15  ;;  %p3380_p7 = scmp.lt.s32.totalorder %s3378_s27, %s3374_s15 }
0x1090   : > { %p3376_p5 = pnand %p3375_p1, %p3601_p13  ;;  %p3381_p9 = por %p3380_p7, %p3379_p8 }
0x1092   : > { %p3377_p12 = pneg %p3376_p5 }
0x1094   : > { %p3382_p10 = pnand %p3381_p9, %p3377_p12 }
0x10e4   : > { %v2087_v41 = vpop.permute.xlu2 %2086 }
0x10e5   : > { %v2095_v13 = vpack.c.bf16 %v2087_v41, %v4007_v11 }
0x10e7   : > { %2962 = vmatmul.msk.bf16.vlgmr.msrb.gmra.mxu0 %vm647_vm1, %v2095_v13 }
0x10e8   : > { %2366 = vmatpush.bf16.msrb.mxu0 %v2357_v14 }
0x10fb   : > { %v2093_v15 = vpop.permute.xlu1 %2092  ;;  %v2090_v16 = vpop.permute.xlu0 %2089 }
0x10fc   : > { %v2096_v17 = vpack.c.bf16 %v2093_v15, %v2090_v16 }
0x10fe   : > { %2963 = vmatmul.msk.bf16.gmra.mxu0 %vm647_vm1, %v2096_v17 }
0x1164   : > { %v2121_v18 = vpop.f32.mrf.mxu0 }
0x1165   : > { %v2131_v19 = vmul.f32 0.17677669, %v2121_v18 }
0x1167   : > { %v2135_v20 = vpack.c.bf16 %v2131_v19, %v2131_v19 }
0x1169   : > { %2968 = vmatmul.msk.bf16.vlgmr.msra.gmra.mxu3 %vm647_vm1, %v2135_v20 }
0x116a   : > { %2347 = vmatpush.bf16.msra.mxu3 %v2338_v22  ;;  %v2976_v22 = vld [vmem:[%s4149_s5 + $0x30] sm:$0xf] }
0x116c   : > { %v2123_v55 = vpop.f32.mrf.mxu0 }
0x116d   : > { %v2132_v23 = vmul.f32 0.17677669, %v2123_v55  ;;  %v2404_v55 = vsel %vm654_vm0, %v2976_v22, 0 }
0x116e   : > { %2413 = vmatpush.bf16.msrb.mxu2 %v2404_v55  ;;  %v3048_v55 = vld [vmem:[%s4155_s11 + $0x28] sm:$0xff] }
0x116f   : > { %v2136_v24 = vpack.c.bf16 %v2132_v23, %v2132_v23  ;;  %v2978_v23 = vld [vmem:[%s4149_s5 + $0x38] sm:$0xf] }
0x1179   : > { %2969 = vmatmul.msk.bf16.vlgmr.msrb.gmra.mxu3 %vm647_vm1, %v2136_v24  ;;  %v2442_v24 = vsel %vm654_vm0, %v2978_v23, 0  ;;  %v3047_v23 = vld [vmem:[%s4155_s11 + $0x20] sm:$0xff] }
0x117b   : > { %v2126_v0 = vpop.f32.mrf.mxu0 }
0x117c   : > { %v2133_v25 = vmul.f32 0.17677669, %v2126_v0  ;;  %v2977_v0 = vld [vmem:[%s4149_s5 + $0x34] sm:$0xf] }
0x117e   : > { %v2137_v26 = vpack.c.bf16 %v2133_v25, %v2133_v25  ;;  %v2423_v25 = vsel %vm654_vm0, %v2977_v0, 0 }
0x117f   : > { %2432 = vmatpush.bf16.msrb.mxu3 %v2423_v25 }
0x1180   : > { %2970 = vmatmul.msk.bf16.vlgmr.msra.gmra.mxu0 %vm647_vm1, %v2137_v26  ;;  %v2979_v26 = vld [vmem:[%s4149_s5 + $0x3c] sm:$0xf] }
0x1181   : > { %2451 = vmatpush.bf16.msra.mxu0 %v2442_v24  ;;  %v3154_v24 = vld [vmem:[%s4154_s10 + $0x1] ss:$0 sm:$0xff] }
0x1183   : > { %v2128_v27 = vpop.f32.mrf.mxu0 }
0x1184   : > { %v2134_v28 = vmul.f32 0.17677669, %v2128_v27  ;;  %v2461_v27 = vsel %vm654_vm0, %v2979_v26, 0 }
0x1186   : > { %v2138_v29 = vpack.c.bf16 %v2134_v28, %v2134_v28 }
0x1188   : > { %2971 = vmatmul.msk.bf16.vlgmr.msra.gmra.mxu1 %vm647_vm1, %v2138_v29 }
0x1189   : > { %2470 = vmatpush.bf16.msra.mxu1 %v2461_v27 }
0x11ec   : > { %v2206_v30 = vpop.f32.mrf.mxu3 }
0x11ed   : > { %v2207_v31 = vadd.f32 %v2206_v30, %v3813_v32 }
0x11ef   : > { %v2267_v33 = vsel %vm647_vm1, %v2207_v31, -inf }
0x11f0   : > { %2268 = vmax.xlane.f32.xlu0 %v2267_v33 }
0x11f4   : > { %v2208_v34 = vpop.f32.mrf.mxu3 }
0x11fc   : > { %v2225_v35 = vpop.f32.mrf.mxu3 }
0x11fd   : > { %v2226_v36 = vadd.f32 %v2225_v35, %v3813_v32  ;;  %v2244_v37 = vpop.f32.mrf.mxu0 }
0x11fe   : > { %v2245_v38 = vadd.f32 %v2244_v37, %v3813_v32 }
0x11ff   : > { %v2270_v39 = vsel %vm647_vm1, %v2226_v36, -inf }
0x1200   : > { %2271 = vmax.xlane.f32.xlu2 %v2270_v39  ;;  %v2273_v40 = vsel %vm647_vm1, %v2245_v38, -inf }
0x1201   : > { %2274 = vmax.xlane.f32.xlu1 %v2273_v40 }
0x1204   : > { %v2227_v42 = vpop.f32.mrf.mxu3 }
0x1205   : > { %v2246_v43 = vpop.f32.mrf.mxu0  ;;  %v2263_v44 = vpop.f32.mrf.mxu1 }
0x1206   : > { %v2264_v6 = vadd.f32 %v2263_v44, %v3813_v32 }
0x1208   : > { %v2276_v45 = vsel %vm647_vm1, %v2264_v6, -inf }
0x1209   : > { %2277 = vmax.xlane.f32.xlu2 %v2276_v45 }
0x120d   : > { %v2265_v47 = vpop.f32.mrf.mxu1 }
0x1263   : > { %v2269_v49 = vpop.xlane.xlu0 %2268 }
0x1264   : > { %v2279_v50 = vsub.f32 %v2207_v31, %v2269_v49 }
0x1266   : > { %v2283_v51 = vmul.f32 1.442695, %v2279_v50 }
0x1268   : > { %3217 = vpow2.f32 %v2283_v51 }
0x126e   : > { %v3218_v52 = vpop.eup %3217 }
0x126f   : > { %v2291_v53 = vsel %vm647_vm1, %v3218_v52, 0.0 }
0x1270   : > { %2292 = vadd.xlane.f32.xlu0 %v2291_v53 }
0x1273   : > { %v2272_v54 = vpop.xlane.xlu2 %2271 }
0x1274   : > { %v2280_v56 = vsub.f32 %v2226_v36, %v2272_v54  ;;  %v2275_v57 = vpop.xlane.xlu1 %2274  ;;  %v3151_v54 = vld [vmem:[#allocation5 + $0x3] ss:$0 sm:$0xff] }
0x1275   : > { %v2281_v58 = vsub.f32 %v2245_v38, %v2275_v57 }
0x1276   : > { %v2285_v59 = vmul.f32 1.442695, %v2280_v56 }
0x1277   : > { %v2287_v60 = vmul.f32 1.442695, %v2281_v58 }
0x1278   : > { %3219 = vpow2.f32 %v2285_v59 }
0x1279   : > { %3221 = vpow2.f32 %v2287_v60 }
0x127c   : > { %v2278_v32 = vpop.xlane.xlu2 %2277 }
0x127d   : > { %v2282_v61 = vsub.f32 %v2264_v6, %v2278_v32 }
0x127e   : > { %v3220_v62 = vpop.eup %3219 }
0x127f   : > { %v3222_v63 = vpop.eup %3221  ;;  %v2289_v1 = vmul.f32 1.442695, %v2282_v61  ;;  %v2294_v2 = vsel %vm647_vm1, %v3220_v62, 0.0 }
0x1280   : > { %2295 = vadd.xlane.f32.xlu1 %v2294_v2  ;;  %v2297_v3 = vsel %vm647_vm1, %v3222_v63, 0.0 }
0x1281   : > { %3223 = vpow2.f32 %v2289_v1  ;;  %2298 = vadd.xlane.f32.xlu2 %v2297_v3 }
0x1287   : > { %v3224_v4 = vpop.eup %3223 }
0x1288   : > { %v2300_v5 = vsel %vm647_vm1, %v3224_v4, 0.0 }
0x1289   : > { %2301 = vadd.xlane.f32.xlu0 %v2300_v5  ;;  %v3050_v5 = vld [vmem:[%s4155_s11 + $0x38] sm:$0xff] }
0x12e3   : > { %v2293_v7 = vpop.xlane.xlu0 %2292 }
0x12e4   : > { %3225 = vrcp.f32 %v2293_v7 }
0x12ea   : > { %v3226_v8 = vpop.eup %3225 }
0x12eb   : > { %v2307_v9 = vmul.f32 %v3226_v8, %v3218_v52 }
0x12ed   : > { %v2311_v10 = vpack.c.bf16 %v2307_v9, %v2307_v9  ;;  %v3049_v9 = vld [vmem:[%s4155_s11 + $0x30] sm:$0xff] }
0x12ef   : > { %2972 = vmatmul.msk.bf16.vlgmr.msra.gmra.mxu2 %vm647_vm1, %v2311_v10 }
0x12f3   : > { %v2296_v48 = vpop.xlane.xlu1 %2295 }
0x12f4   : > { %3227 = vrcp.f32 %v2296_v48  ;;  %v2299_v12 = vpop.xlane.xlu2 %2298 }
0x12f5   : > { %3229 = vrcp.f32 %v2299_v12 }
0x12fa   : > { %v3228_v41 = vpop.eup %3227 }
0x12fb   : > { %v3230_v13 = vpop.eup %3229  ;;  %v2308_v14 = vmul.f32 %v3228_v41, %v3220_v62 }
0x12fc   : > { %v2309_v15 = vmul.f32 %v3230_v13, %v3222_v63  ;;  %v2302_v16 = vpop.xlane.xlu0 %2301 }
0x12fd   : > { %v2312_v17 = vpack.c.bf16 %v2308_v14, %v2308_v14  ;;  %3231 = vrcp.f32 %v2302_v16  ;;  %v3152_v16 = vld [vmem:[#allocation7 + $0x4] ss:$0 sm:$0xff] }
0x12fe   : > { %v2313_v18 = vpack.c.bf16 %v2309_v15, %v2309_v15 }
0x12ff   : > { %2973 = vmatmul.msk.bf16.vlgmr.msra.gmra.mxu3 %vm647_vm1, %v2312_v17 }
0x1300   : > { %2974 = vmatmul.msk.bf16.vlgmr.msrb.gmra.mxu0 %vm647_vm1, %v2313_v18  ;;  %2610 = vmatpush.bf16.msra.mxu3 %v3050_v5  ;;  %v3153_v18 = vld [vmem:[%s4152_s8 + $0x4] ss:$0 sm:$0xff] }
0x1303   : > { %v3232_v46 = vpop.eup %3231 }
0x1304   : > { %v2310_v19 = vmul.f32 %v3232_v46, %v3224_v4  ;;  %v3046_v4 = vld [vmem:[%s4153_s9 + $0x18] sm:$0xff]  ;;  %2611 = vmatpush.bf16.msra.mxu3 %v3049_v9 }
0x1305   : > { %2556 = vmatpush.bf16.msra.mxu2 %v3046_v4 }
0x1306   : > { %v2314_v20 = vpack.c.bf16 %v2310_v19, %v2310_v19 }
0x1308   : > { %2975 = vmatmul.msk.bf16.vlgmr.msrb.gmra.mxu1 %vm647_vm1, %v2314_v20  ;;  %2612 = vmatpush.bf16.msra.mxu3 %v3048_v55 }
0x130c   : > { %2613 = vmatpush.bf16.msra.mxu3 %v3047_v23 }
0x1372   : > { %v2330_v28 = vpop.f32.mrf.mxu2 }
0x1373   : > { %v2391_v29 = vpack.c.bf16 %v2330_v28, %v2330_v28 }
0x1375   : > { %2980 = vmatmul.msk.bf16.vlgmr.msrb.gmra.mxu2 %vm647_vm1, %v2391_v29  ;;  %v3155_v29 = vld [vmem:[%s4156_s12 + $0x1] ss:$0 sm:$0xff] }
0x137a   : > { %v2332_v30 = vpop.f32.mrf.mxu2 }
0x137d   : > { %v2368_v31 = vpop.f32.mrf.mxu0 }
0x137e   : > { %v2393_v33 = vpack.c.bf16 %v2368_v31, %v2368_v31 }
0x1380   : > { %2982 = vmatmul.msk.bf16.vlgmr.msra.gmra.mxu0 %vm647_vm1, %v2393_v33 }
0x1382   : > { %v2349_v34 = vpop.f32.mrf.mxu3 }
0x1383   : > { %v2392_v35 = vpack.c.bf16 %v2349_v34, %v2349_v34 }
0x1385   : > { %2981 = vmatmul.msk.bf16.vlgmr.msrb.gmra.mxu3 %vm647_vm1, %v2392_v35  ;;  %v2370_v36 = vpop.f32.mrf.mxu0  ;;  %v2387_v37 = vpop.f32.mrf.mxu1 }
0x1386   : > { %v2394_v38 = vpack.c.bf16 %v2387_v37, %v2387_v37 }
0x1388   : > { %2983 = vmatmul.msk.bf16.vlgmr.msra.gmra.mxu1 %vm647_vm1, %v2394_v38 }
0x138a   : > { %v2351_v39 = vpop.f32.mrf.mxu3 }
0x138d   : > { %v2389_v40 = vpop.f32.mrf.mxu1 }
0x13f8   : > { %v2415_v42 = vpop.f32.mrf.mxu2 }
0x13f9   : > { %v2476_v49 = vsel %vm1021_vm2, %v2415_v42, 0.0  ;;  %v3052_v42 = vld [vmem:[#allocation8 + $0x8] sm:$0xff] }
0x13fa   : > { %2684 = vmatpush.bf16.msrb.mxu0 %v3052_v42 }
0x13fd   : > { %v2453_v43 = vpop.f32.mrf.mxu0 }
0x13fe   : > { %v2479_v52 = vsel %vm1021_vm2, %v2453_v43, 0.0  ;;  %v3051_v43 = vld [vmem:[#allocation8] sm:$0xff] }
0x13ff   : > { %2685 = vmatpush.bf16.msrb.mxu0 %v3051_v43 }
0x1400   : > { %v2417_v44 = vpop.f32.mrf.mxu2 }
0x1405   : > { %v2455_v6 = vpop.f32.mrf.mxu0  ;;  %v2472_v45 = vpop.f32.mrf.mxu1 }
0x1406   : > { %v2481_v56 = vsel %vm1021_vm2, %v2472_v45, 0.0 }
0x1408   : > { %v2434_v47 = vpop.f32.mrf.mxu3 }
0x1409   : > { %v2477_v50 = vsel %vm1021_vm2, %v2434_v47, 0.0 }
0x140a   : > { %v2478_v51 = vadd.f32 %v2477_v50, %v2476_v49 }
0x140c   : > { %v2480_v53 = vadd.f32 %v2479_v52, %v2478_v51 }
0x140d   : > { %v2474_v57 = vpop.f32.mrf.mxu1 }
0x140e   : > { %v2482_v58 = vadd.f32 %v2481_v56, %v2480_v53  ;;  %v3157_v57 = vld [vmem:[%s4152_s8 + $0x5] ss:$0 sm:$0xff] }
0x1410   : > { %v2436_v59 = vpop.f32.mrf.mxu3  ;;  %v2488_v60 = vadd.f32 %v3151_v54, %v2482_v58  ;;  %v3156_v54 = vld [vmem:[#allocation7 + $0x5] ss:$0 sm:$0xff] }
0x1412   : > { %v2489_v32 = vadd.f32 %v2488_v60, %v4007_v11  ;;  %v3045_v11 = vld [vmem:[%s4153_s9 + $0x10] sm:$0xff] }
0x1413   : > { %2557 = vmatpush.bf16.msra.mxu2 %v3045_v11 }
0x1414   : > { %v2490_v61 = vsel %vm1021_vm2, %v2489_v32, 0.0 }
0x1415   : > { %2491 = vadd.xlane.f32.xlu1 %v2490_v61 }
0x1488   : > { %v2492_v62 = vpop.xlane.xlu1 %2491 }
0x1489   : > { %v2493_v63 = vmul.f32 %v2492_v62, %v3750_v21 }
0x148b   : > { %v2494_v1 = vsub.f32 %v2489_v32, %v2493_v63  ;;  %v3158_v32 = vld [vmem:[%s4184_s29] ss:$0 sm:$0xff] }
0x148d   : > { %v2495_v2 = vmul.f32 %v2494_v1, %v2494_v1 }
0x148f   : > { %v2496_v3 = vsel %vm1021_vm2, %v2495_v2, 0.0 }
0x1490   : > { %2497 = vadd.xlane.f32.xlu2 %v2496_v3 }
0x1503   : > { %v2498_v7 = vpop.xlane.xlu2 %2497 }
0x1504   : > { %v2499_v8 = vmul.f32 %v2498_v7, %v3750_v21 }
0x1506   : > { %v2500_v10 = vadd.f32 1e-05, %v2499_v8 }
0x1508   : > { %3233 = vrsqrt.f32 %v2500_v10  ;;  %vm2507_vm1 = vweird.f32 %v2500_v10 }
0x150e   : > { %v3234_v48 = vpop.eup %3233 }
0x150f   : > { %v2502_v12 = vmul.f32 %v3234_v48, %v2500_v10  ;;  %vm2508_vm0 = vweird.f32 %v3234_v48 }
0x1510   : > { %vm2509_vm4 = vmor %vm2507_vm1, %vm2508_vm0 }
0x1511   : > { %v2503_v41 = vmul.f32 %v3234_v48, %v2502_v12 }
0x1513   : > { %v2504_v13 = vmul.f32 0.5, %v2503_v41 }
0x1515   : > { %v2505_v14 = vsub.f32 1.5, %v2504_v13 }
0x1517   : > { %v2506_v15 = vmul.f32 %v3234_v48, %v2505_v14 }
0x1519   : > { %v2510_v17 = vsel %vm2509_vm4, %v3234_v48, %v2506_v15 }
0x151a   : > { %v2511_v46 = vmul.f32 %v2510_v17, %v2494_v1 }
0x151c   : > { %v2517_v19 = vmul.f32 %v3152_v16, %v2511_v46 }
0x151e   : > { %v2523_v20 = vadd.f32 %v3153_v18, %v2517_v19 }
0x1520   : > { %v2524_v22 = vpack.c.bf16 %v2523_v20, %v2523_v20 }
0x1522   : > { %2998 = vmatmul.msk.bf16.vlgmr.msra.gmra.mxu2 %vm1021_vm2, %v2524_v22 }
0x15a5   : > { %v2559_v0 = vpop.f32.mrf.mxu2 }
0x15a6   : > { %v2560_v25 = vadd.f32 %v3154_v24, %v2559_v0 }
0x15a8   : > { %v2563_v26 = vmax.f32 %v2560_v25, 0.0 }
0x15aa   : > { %v2564_v27 = vpack.c.bf16 %v2563_v26, %v2563_v26 }
0x15ac   : > { %3024 = vmatmul.msk.bf16.vlgmr.msra.gmra.mxu3 %vm1594_vm10, %v2564_v27 }
0x15ad   : > { %v2561_v28 = vpop.f32.mrf.mxu2 }
0x162f   : > { %v2615_v30 = vpop.f32.mrf.mxu3 }
0x1630   : > { %v2616_v31 = vadd.f32 %v3155_v29, %v2615_v30 }
0x1632   : > { %v2619_v33 = vadd.f32 %v2616_v31, %v2523_v20 }
0x1634   : > { %v2620_v34 = vsel %vm1021_vm2, %v2619_v33, 0.0 }
0x1635   : > { %2621 = vadd.xlane.f32.xlu0 %v2620_v34 }
0x1637   : > { %v2617_v35 = vpop.f32.mrf.mxu3 }
0x16a8   : > { %v2622_v36 = vpop.xlane.xlu0 %2621 }
0x16a9   : > { %v2623_v37 = vmul.f32 %v2622_v36, %v3750_v21 }
0x16ab   : > { %v2624_v38 = vsub.f32 %v2619_v33, %v2623_v37 }
0x16ad   : > { %v2625_v39 = vmul.f32 %v2624_v38, %v2624_v38 }
0x16af   : > { %v2626_v40 = vsel %vm1021_vm2, %v2625_v39, 0.0 }
0x16b0   : > { %2627 = vadd.xlane.f32.xlu1 %v2626_v40 }
0x1723   : > { %v2628_v44 = vpop.xlane.xlu1 %2627 }
0x1724   : > { %v2629_v6 = vmul.f32 %v2628_v44, %v3750_v21 }
0x1726   : > { %v2630_v45 = vadd.f32 1e-05, %v2629_v6 }
0x1728   : > { %3235 = vrsqrt.f32 %v2630_v45  ;;  %vm2637_vm6 = vweird.f32 %v2630_v45 }
0x172e   : > { %v3236_v47 = vpop.eup %3235 }
0x172f   : > { %v2632_v49 = vmul.f32 %v3236_v47, %v2630_v45  ;;  %vm2638_vm5 = vweird.f32 %v3236_v47 }
0x1730   : > { %vm2639_vm7 = vmor %vm2637_vm6, %vm2638_vm5 }
0x1731   : > { %v2633_v50 = vmul.f32 %v3236_v47, %v2632_v49 }
0x1733   : > { %v2634_v51 = vmul.f32 0.5, %v2633_v50 }
0x1735   : > { %v2635_v52 = vsub.f32 1.5, %v2634_v51 }
0x1737   : > { %v2636_v53 = vmul.f32 %v3236_v47, %v2635_v52 }
0x1739   : > { %v2640_v56 = vsel %vm2639_vm7, %v3236_v47, %v2636_v53 }
0x173a   : > { %v2641_v21 = vmul.f32 %v2640_v56, %v2624_v38 }
0x173c   : > { %v2647_v58 = vmul.f32 %v3156_v54, %v2641_v21 }
0x173e   : > { %v2653_v59 = vadd.f32 %v3157_v57, %v2647_v58 }
0x1740   : > { %v2654_v60 = vpack.c.bf16 %v2653_v59, %v2653_v59 }
0x1742   : > { %3034 = vmatmul.msk.bf16.vlgmr.msrb.gmra.mxu0 %vm1021_vm2, %v2654_v60 }
0x17bf   : > { %v2687_v61 = vpop.f32.mrf.mxu0 }
0x17c0   : > { %v2688_v62 = vadd.f32 %v3158_v32, %v2687_v61 }
0x17c2   : > { %2691 = vst [vmem:[%s600_s24] sm:$0xff] %v2688_v62 }
0x17c3   : > { %3385 = shalt.err (!%p3382_p10)
}
0x17c4   : > { %3067 = dma.vmem_to_hbm [thread:$0]  (%p3601_p13), %s2706_s26, 128, %s2708_s20, %s2693_s30  }
0x17c7   : > { %v2689_v63 = vpop.f32.mrf.mxu0 }
0x17c8 PF: > { %s2719_s22 = sand.u32 1, %s3420_s18   ;;  %p4186_p11 = scmp.ge.s32.totalorder %s3432_s21, 2 }
0x17c9   : > { %s2720_s23 = scalar_lea.sflag [#allocation4], %s2719_s22 }
0x17ca   : > { %p3084_p0 = pnand %p4186_p11, %p3606_p4 }
0x17cc   : > { %p3085_p2 = pneg %p3084_p0 }
0x17ce   : > { %3415 = dma.done.wait (%p3085_p2), %s2720_s23, 128  }
0x17cf   : > { %3417 = vsyncadd (%p3085_p2), %s2720_s23, 4294967168  ;;  %s4187_s21 = sld [smem:[#allocation16_spill]]  ;;  %s4190_s18 = smov %s3424_s19 }
0x17d0   : > { %s4188_s29 = sld [smem:[#allocation15_spill]] }
0x17d1   : > { %s4189_s20 = sld [smem:[#allocation17_spill]] }
0x17d5   : > { %p30_p6 = scmp.ge.s32.totalorder %s4187_s21, 4  }
0x17d6   : > { %s4191_s19 = smov %s4188_s29 }
0x17d7   :  { %32 = sbr.rel (!%p30_p6) target bundleno = 13 (0xd), region = 177 }
0x17dc   :  { %2726 = vsyncpa [#allocation3], 1 }
0x17dd   :  { %2728 = vsyncpa [#allocation3 + $0x1], 1 }
0x17de   :  { %2729 = vsyncpa [#allocation6], 1 }
0x17df   :  { %2730 = vsyncpa [#allocation9], 1 }
0x17e0   :  { %2731 = vsyncpa [#allocation4], 1 }
0x17e1   :  { %2733 = vsyncpa [#allocation4 + $0x1], 1 }

// kernel: tpu_custom_call.1
= control target key start
LH: loop header
LB: loop body
LE: loop exit
PB: predicated region body
PF: predicated region fallthrough
CT: control target
= control target key end

     0   :  { %s4144_s0 = inlined_call_operand.vmem [shape: f32[2,8,32], index: 0, kind: input, shape index: {}]   ;;  %s4145_s1 = inlined_call_operand.vmem [shape: f32[2,8,32], index: 1, kind: input, shape index: {}]   ;;  %s4146_s2 = inlined_call_operand.vmem [shape: f32[2,8,8], index: 2, kind: input, shape index: {}]   ;;  %s4147_s3 = inlined_call_operand.hbm [shape: f32[2,8,8], index: 3, kind: input, shape index: {}]   ;;  %s4148_s4 = inlined_call_operand.vmem [shape: bf16[12,8,8], index: 4, kind: input, shape index: {}]   ;;  %s4149_s5 = inlined_call_operand.vmem [shape: bf16[4,4,8,32], index: 5, kind: input, shape index: {}]   ;;  %s4150_s6 = inlined_call_operand.hbm [shape: f32[4,1,32], index: 6, kind: input, shape index: {}]   ;;  %s4151_s7 = inlined_call_operand.hbm [shape: f32[6,1,32], index: 7, kind: input, shape index: {}]   ;;  %s4152_s8 = inlined_call_operand.vmem [shape: f32[6,1,32], index: 8, kind: input, shape index: {}]   ;;  %s4153_s9 = inlined_call_operand.vmem [shape: bf16[2,32,64], index: 9, kind: input, shape index: {}]   ;;  %s4154_s10 = inlined_call_operand.vmem [shape: f32[2,1,64], index: 10, kind: input, shape index: {}]   ;;  %s4155_s11 = inlined_call_operand.vmem [shape: bf16[2,64,32], index: 11, kind: input, shape index: {}]   ;;  %s4156_s12 = inlined_call_operand.vmem [shape: f32[2,1,32], index: 12, kind: input, shape index: {}]   ;;  %s4157_s13 = inlined_call_operand.hbm [shape: bf16[32,128], index: 13, kind: input, shape index: {}]   ;;  %s4158_s14 = inlined_call_operand.vmem [shape: f32[1,128], index: 14, kind: input, shape index: {}]   ;;  %s4159_s15 = inlined_call_operand.hbm [shape: f32[2,8,128], index: 15, kind: output, shape index: {}]  }
   0x1   :  { %4165 = sst [smem:[#allocation19_spill]] %s4150_s6 }
   0x2   :  { %4166 = sst [smem:[#allocation20_spill]] %s4151_s7 }
   0x3   :  { %4167 = sst [smem:[#allocation21_spill]] %s4157_s13 }
   0x4   :  { %4168 = sst [smem:[#allocation22_spill]] %s4158_s14 }
   0x5   :  { %4169 = sst [smem:[#allocation23_spill]] %s4159_s15 }
   0x6   :  { %20 = vsyncpa [#allocation3], 0 }
   0x7   :  { %22 = vsyncpa [#allocation3 + $0x1], 0 }
   0x8   :  { %23 = vsyncpa [#allocation6], 0 }
   0x9   :  { %24 = vsyncpa [#allocation9], 0 }
   0xa   :  { %25 = vsyncpa [#allocation4], 0 }
   0xb   :  { %27 = vsyncpa [#allocation4 + $0x1], 0  ;;  %s3525_s18 = smov 0   ;;  %s3527_s19 = smov 0  }
   0xc   :  { %s3529_s20 = smov 0   ;;  %s3531_s21 = smov 0  }
   0xd LB: > { %4170 = sst [smem:[#allocation15_spill]] %s3428_s20  ;;  %s3549_s25 = sadd.s32 4294967295, %s3432_s21   ;;  %s3432_s21 = sphi %s3531_s21, %s4187_s21   ;;  %s3428_s20 = sphi %s3529_s20, %s4189_s20   ;;  %s3424_s19 = sphi %s3527_s19, %s4191_s19   ;;  %s3420_s18 = sphi %s3525_s18, %s4190_s18  }
   0xe   : > { %s4171_s6 = sld [smem:[#allocation19_spill]]  ;;  %p2844_p0 = scmp.ge.s32.totalorder %s3432_s21, 1 }
   0xf   : > { %p132_p1 = scmp.eq.s32.totalorder %s3549_s25, 0  ;;  %p399_p2 = scmp.lt.s32.totalorder %s3432_s21, 3 }
  0x10   : > { %s3434_s27 = smov [#allocation5]   ;;  %s4173_s7 = sld [smem:[#allocation20_spill]] }
  0x11   : > { %p3554_p3 = pnand %p2844_p0, %p399_p2  ;;  %s418_s28 = sshll.u32 %s3434_s27, 4  ;;  %s419_s28 = int_to_ptr.vmem [resolvable:$true] %s418_s28 }
  0x12   : > { %s4175_s13 = sld [smem:[#allocation21_spill]]  ;;  %s3436_s29 = smov 16  }
  0x13   : > { %p3069_p4 = pneg %p3554_p3  ;;  %s3437_s30 = smov 1  }
  0x14   : > { %s416_s24 = sshll.u32 %s4171_s6, 4  ;;  %s3435_s6 = smov [#allocation7]   ;;  %s417_s24 = int_to_ptr.hbm [resolvable:$true] %s416_s24 }
  0x15   : > { %p3566_p6 = pnand %p3069_p4, %p132_p1  ;;  %s432_s14 = sshll.u32 %s3435_s6, 4  ;;  %s433_s14 = int_to_ptr.vmem [resolvable:$true] %s432_s14 }
  0x16   : > { %s430_s16 = sshll.u32 %s4173_s7, 4  ;;  %s3438_s22 = smov [#allocation8]   ;;  %s431_s16 = int_to_ptr.hbm [resolvable:$true] %s430_s16 }
  0x17   : > { %3072 = dma.hbm_to_vmem [thread:$0]  (!%p3566_p6), %s417_s24, 64, %s419_s28, [#allocation6], %s3436_s29, %s3436_s29, %s3437_s30  }
  0x18   : > { %s459_s27 = sshll.u32 %s4175_s13, 4  ;;  %s461_s23 = sshll.u32 %s3438_s22, 4  ;;  %s460_s27 = int_to_ptr.hbm [resolvable:$true] %s459_s27  ;;  %s462_s23 = int_to_ptr.vmem [resolvable:$true] %s461_s23 }
  0x19   : > { %3075 = dma.hbm_to_vmem [thread:$0]  (!%p3566_p6), %s431_s16, 96, %s433_s14, [#allocation6], %s3436_s29, %s3436_s29, %s3437_s30  }
  0x1a   : > { %s3439_s6 = smov 64   ;;  %s3440_s7 = smov 4  }
  0x1b   : > { %3078 = dma.hbm_to_vmem [thread:$0]  (!%p3566_p6), %s460_s27, 256, %s462_s23, [#allocation9], %s3439_s6, %s3439_s6, %s3440_s7  }
  0x1c   : > { %s2843_s13 = sadd.s32 4294967294, %s3432_s21   ;;  %s3581_s24 = sadd.s32 1, %s3432_s21  }
  0x1d   : > { %4176 = sst [smem:[#allocation16_spill]] %s3581_s24  ;;  %s118_s28 = sadd.s32 1, %s3428_s20 }
  0x1e   : > { %s115_s15 = ssub.s32 %s3432_s21, %s3581_s24  ;;  %p125_p7 = scmp.ne.s32.totalorder %s3428_s20, %s3424_s19 }
  0x1f   : > { %p116_p8 = scmp.eq.s32.totalorder %s115_s15, 0  ;;  %p126_p9 = scmp.eq.s32.totalorder %s3432_s21, 0 }
  0x20   : > { %p131_p10 = scmp.ne.s32.totalorder %s3424_s19, %s3420_s18  ;;  %p386_p11 = scmp.eq.s32.totalorder %s3549_s25, 1 }
  0x21   : > { %s3593_s14 = scalar_select %p116_p8, %s3428_s20, %s118_s28  }
  0x22   : > { %p3597_p12 = por %p132_p1, %p131_p10  ;;  %p3601_p13 = por %p386_p11, %p125_p7 }
  0x23   : > { %4177 = sst [smem:[#allocation17_spill]] %s3593_s14  ;;  %p392_p0 = scmp.eq.s32.totalorder %s2843_s13, 1 }
  0x24   : > { %p127_p2 = por %p126_p9, %p125_p7  ;;  %s499_s17 = sand.u32 1, %s3428_s20  }
  0x25   : > { %p3606_p4 = por %p392_p0, %p131_p10  ;;  %p3090_p6 = scmp.lt.s32.totalorder %s3432_s21, 2 }
  0x26   : > { %s2849_s15 = sshll.u32 %s499_s17, 3  ;;  %s2850_s29 = sshll.u32 %s3432_s21, 3 }
  0x27   : > { %s4180_s27 = scalar_select %p3606_p4, 1, 0 }
  0x28   : > { %s507_s23 = scalar_lea.hbm %s4147_s3, %s2850_s29  ;;  %s503_s28 = scalar_lea.vmem [#allocation2], %s2849_s15 }
  0x29   : > { %4181 = sst [smem:[#allocation18_spill]] %s4180_s27  ;;  %s509_s6 = sshll.u32 %s507_s23, 4  ;;  %s510_s6 = int_to_ptr.hbm [resolvable:$true] %s509_s6 }
  0x2a   : > { %s511_s14 = sshll.u32 %s503_s28, 4  ;;  %p3615_p8 = pnand %p3090_p6, %p127_p2  ;;  %s512_s14 = int_to_ptr.vmem [resolvable:$true] %s511_s14 }
  0x2b   : > { %s500_s20 = scalar_lea.sflag [#allocation3], %s499_s17  ;;  %s3328_s24 = sshra.s32 %s510_s6, 4  ;;  %s3329_s24 = int_to_ptr.hbm [resolvable:$true] %s3328_s24 }
  0x2c   : > { %s3330_s27 = scalar_lea.hbm %s3329_s24, 8  ;;  %p3332_p9 = pneg %p3615_p8 }
  0x2d   : > { %p3331_p7 = scmp.ne.s32.totalorder %s3329_s24, %s3330_s27  ;;  %s3335_s15 = scalar_lea.hbm %s4147_s3, 16 }
  0x2e   : > { %p3336_p0 = scmp.lt.s32.totalorder %s3329_s24, %s4147_s3  ;;  %p3337_p2 = scmp.lt.s32.totalorder %s3335_s15, %s3330_s27 }
  0x2f   : > { %p3333_p10 = pnand %p3332_p9, %p3331_p7 }
  0x30   : > { %p3338_p6 = por %p3337_p2, %p3336_p0 }
  0x31   : > { %p3334_p11 = pneg %p3333_p10 }
  0x33   : > { %p3339_p5 = pnand %p3338_p6, %p3334_p11 }
  0x35   : > { %3342 = shalt.err (!%p3339_p5)
}
  0x36   : > { %3082 = dma.hbm_to_vmem [thread:$0]  (!%p3615_p8), %s510_s6, 128, %s512_s14, %s500_s20  }
  0x37   : > { %520 = sbr.rel (%p3554_p3) target bundleno = 6088 (0x17c8), region = 80  ;;  %s3632_s17 = sand.u32 (!%p3554_p3), 1, %s3424_s19  }
  0x38   : > { %s2852_s28 = sshll.u32 (!%p3554_p3), %s3632_s17, 3  ;;  %s523_s29 = scalar_lea.sflag (!%p3554_p3), [#allocation3], %s3632_s17 }
  0x39   : > { %s3638_s24 = scalar_lea.vmem (!%p3554_p3), [#allocation2], %s2852_s28 }
  0x3c   : > { %3403 = dma.done.wait (%p3597_p12), %s523_s29, 128  }
  0x3d   : > { %3405 = vsyncadd (%p3597_p12), %s523_s29, 4294967168 }
  0x3e   : > { %3407 = dma.done.wait (%p132_p1), [#allocation6], 160  }
  0x3f   : > { %3409 = vsyncadd (%p132_p1), [#allocation6], 4294967136 }
  0x40   : > { %3411 = dma.done.wait (%p132_p1), [#allocation9], 256  }
  0x41   : > { %3413 = vsyncadd (%p132_p1), [#allocation9], 4294967040  ;;  %p601_p3 = scmp.lt.s32.totalorder %s3549_s25, 1  ;;  %vm654_vm0 = vcmask 1043456   ;;  %v642_v1 = vld [vmem:[%s4148_s4] sm:$0xf] }
  0x42   : > { %s3441_s30 = smov 120   ;;  %s3442_s15 = smov 104   ;;  %v656_v2 = vsel %vm654_vm0, %v642_v1, 0  ;;  %v2860_v3 = vld [vmem:[%s4148_s4 + $0x4] sm:$0xf]  ;;  %vm647_vm1 = vcmask 64512  }
  0x43   : > { %s602_s20 = scalar_select %p601_p3, %s3549_s25, 1  ;;  %v2861_v4 = vld [vmem:[%s4148_s4 + $0x8] sm:$0xf]  ;;  %665 = vmatpush.bf16.msra.mxu0 %v656_v2  ;;  %v686_v5 = vsel %vm654_vm0, %v2860_v3, 0  ;;  %vm1021_vm2 = vcmask 261120   ;;  %vm1594_vm10 = vcmask 523264  }
  0x44   : > { %v712_v6 = vsel %vm654_vm0, %v2861_v4, 0  ;;  %695 = vmatpush.bf16.msra.mxu1 %v686_v5  ;;  %s3443_s14 = smov 112   ;;  %s4183_s13 = sld [smem:[#allocation23_spill]] }
  0x45   : > { %s3654_s26 = sshll.u32 %s602_s20, 3  ;;  %721 = vmatpush.bf16.msra.mxu2 %v712_v6 }
  0x46   : > { %s604_s27 = scalar_lea.vmem %s4144_s0, %s3654_s26  ;;  %s3703_s6 = scalar_lea.vmem %s4146_s2, %s3654_s26 }
  0x47   : > { %v3660_v0 = vld [vmem:[%s604_s27] sm:$0xff]  ;;  %s608_s29 = scalar_lea.vmem %s4145_s1, %s3654_s26 }
  0x48   : > { %631 = vrot.lane.b32.xlu0 %v3660_v0, %s3441_s30  ;;  %637 = vrot.lane.b32.xlu1 %v3660_v0, %s3442_s15  ;;  %v3706_v48 = vld [vmem:[%s3703_s6] sm:$0xff] }
  0x4a   : > { %s3378_s27 = scalar_lea.hbm %s4183_s13, 16 }
  0x50   : > { %634 = vrot.lane.b32.xlu0 %v3660_v0, %s3443_s14 }
  0xba   : > { %v632_v7 = vpop.permute.xlu0 %631  ;;  %v638_v9 = vpop.permute.xlu1 %637 }
  0xbb   : > { %v640_v8 = vpack.c.bf16 %v632_v7, %v3660_v0 }
  0xbd   : > { %2862 = vmatmul.msk.bf16.vlgmr.msra.gmra.mxu0 %vm647_vm1, %v640_v8  ;;  %2864 = vmatmul.msk.bf16.vlgmr.msra.gmra.mxu1 %vm647_vm1, %v640_v8 }
  0xbe   : > { %2866 = vmatmul.msk.bf16.vlgmr.msra.gmra.mxu2 %vm647_vm1, %v640_v8 }
  0xc2   : > { %v635_v10 = vpop.permute.xlu0 %634 }
  0xc3   : > { %v641_v11 = vpack.c.bf16 %v638_v9, %v635_v10 }
  0xcd   : > { %2865 = vmatmul.msk.bf16.gmra.mxu1 %vm647_vm1, %v641_v11  ;;  %2863 = vmatmul.msk.bf16.gmra.mxu0 %vm647_vm1, %v641_v11 }
  0xce   : > { %2867 = vmatmul.msk.bf16.gmra.mxu2 %vm647_vm1, %v641_v11 }
 0x13a   : > { %v667_v12 = vpop.f32.mrf.mxu0  ;;  %v697_v13 = vpop.f32.mrf.mxu1 }
 0x13b   : > { %v707_v14 = vpack.c.bf16 %v697_v13, %v697_v13  ;;  %v677_v16 = vmul.f32 0.17677669, %v667_v12 }
 0x13d   : > { %v741_v15 = vsel %vm647_vm1, %v707_v14, 0  ;;  %v681_v21 = vpack.c.bf16 %v677_v16, %v677_v16 }
 0x13e   : > { %750 = vmatpush.bf16.xpose.msra.mxu3 %v741_v15 }
 0x141   : > { %v723_v17 = vpop.f32.mrf.mxu2 }
 0x142   : > { %v733_v18 = vpack.c.bf16 %v723_v17, %v723_v17  ;;  %v669_v19 = vpop.f32.mrf.mxu0  ;;  %v699_v20 = vpop.f32.mrf.mxu1 }
 0x143   : > { %v708_v22 = vpack.c.bf16 %v699_v20, %v699_v20  ;;  %v678_v33 = vmul.f32 0.17677669, %v669_v19 }
 0x144   : > { %v865_v23 = vsel %vm654_vm0, %v733_v18, 0 }
 0x145   : > { %874 = vmatpush.bf16.msrb.mxu2 %v865_v23  ;;  %2868 = vmatmul.msk.bf16.vlgmr.msra.gmra.mxu3 %vm647_vm1, %v681_v21  ;;  %v760_v24 = vsel %vm647_vm1, %v708_v22, 0  ;;  %v682_v39 = vpack.c.bf16 %v678_v33, %v678_v33 }
 0x146   : > { %769 = vmatpush.bf16.xpose.msrb.mxu3 %v760_v24 }
 0x149   : > { %v725_v25 = vpop.f32.mrf.mxu2 }
 0x14a   : > { %v734_v26 = vpack.c.bf16 %v725_v25, %v725_v25  ;;  %v702_v27 = vpop.f32.mrf.mxu1  ;;  %v672_v28 = vpop.f32.mrf.mxu0 }
 0x14b   : > { %v709_v29 = vpack.c.bf16 %v702_v27, %v702_v27  ;;  %v679_v32 = vmul.f32 0.17677669, %v672_v28 }
 0x14c   : > { %v884_v30 = vsel %vm654_vm0, %v734_v26, 0 }
 0x14d   : > { %v779_v31 = vsel %vm647_vm1, %v709_v29, 0  ;;  %v683_v34 = vpack.c.bf16 %v679_v32, %v679_v32 }
 0x14e   : > { %893 = vmatpush.bf16.msra.mxu3 %v884_v30  ;;  %788 = vmatpush.bf16.xpose.msrb.mxu0 %v779_v31 }
 0x151   : > { %v728_v35 = vpop.f32.mrf.mxu2 }
 0x152   : > { %v704_v36 = vpop.f32.mrf.mxu1  ;;  %v735_v37 = vpack.c.bf16 %v728_v35, %v728_v35  ;;  %v674_v38 = vpop.f32.mrf.mxu0 }
 0x153   : > { %v710_v40 = vpack.c.bf16 %v704_v36, %v704_v36  ;;  %v680_v43 = vmul.f32 0.17677669, %v674_v38  ;;  %v941_v38 = vld [vmem:[%s4149_s5] sm:$0xf] }
 0x154   : > { %v903_v41 = vsel %vm654_vm0, %v735_v37, 0 }
 0x155   : > { %2869 = vmatmul.msk.bf16.vlgmr.msrb.gmra.mxu3 %vm647_vm1, %v682_v39  ;;  %2870 = vmatmul.msk.bf16.vlgmr.msrb.gmra.mxu0 %vm647_vm1, %v683_v34  ;;  %v798_v42 = vsel %vm647_vm1, %v710_v40, 0  ;;  %v684_v44 = vpack.c.bf16 %v680_v43, %v680_v43  ;;  %v949_v39 = vsel %vm654_vm0, %v941_v38, 0  ;;  %v942_v40 = vld [vmem:[%s4149_s5 + $0x4] sm:$0xf] }
 0x156   : > { %807 = vmatpush.bf16.xpose.msrb.mxu1 %v798_v42  ;;  %912 = vmatpush.bf16.msra.mxu0 %v903_v41  ;;  %v968_v41 = vsel %vm654_vm0, %v942_v40, 0  ;;  %v943_v42 = vld [vmem:[%s4149_s5 + $0x8] sm:$0xf] }
 0x157   : > { %958 = vmatpush.bf16.msra.mxu2 %v949_v39  ;;  %977 = vmatpush.bf16.msrb.mxu3 %v968_v41  ;;  %v987_v43 = vsel %vm654_vm0, %v943_v42, 0  ;;  %v3140_v39 = vld [vmem:[%s4152_s8] ss:$0 sm:$0xff] }
 0x159   : > { %v730_v45 = vpop.f32.mrf.mxu2 }
 0x15a   : > { %v736_v46 = vpack.c.bf16 %v730_v45, %v730_v45  ;;  %996 = vmatpush.bf16.msrb.mxu0 %v987_v43  ;;  %v2881_v43 = vld [vmem:[%s4148_s4 + $0x10] sm:$0xf] }
 0x15c   : > { %v922_v47 = vsel %vm654_vm0, %v736_v46, 0 }
 0x15d   : > { %2871 = vmatmul.msk.bf16.vlgmr.msrb.gmra.mxu1 %vm647_vm1, %v684_v44  ;;  %v944_v44 = vld [vmem:[%s4149_s5 + $0xc] sm:$0xf] }
 0x15e   : > { %931 = vmatpush.bf16.msra.mxu1 %v922_v47  ;;  %v1006_v45 = vsel %vm654_vm0, %v944_v44, 0  ;;  %v2882_v44 = vld [vmem:[%s4148_s4 + $0x14] sm:$0xf] }
 0x162   : > { %1015 = vmatpush.bf16.msrb.mxu1 %v1006_v45  ;;  %v2880_v45 = vld [vmem:[%s4148_s4 + $0xc] sm:$0xf] }
 0x1c8   : > { %v752_v49 = vpop.f32.mrf.mxu3 }
 0x1c9   : > { %v753_v50 = vadd.f32 %v752_v49, %v3706_v48 }
 0x1cb   : > { %v813_v51 = vsel %vm647_vm1, %v753_v50, -inf }
 0x1cc   : > { %814 = vmax.xlane.f32.xlu1 %v813_v51 }
 0x1d0   : > { %v754_v52 = vpop.f32.mrf.mxu3 }
 0x1d2   : > { %v790_v53 = vpop.f32.mrf.mxu0 }
 0x1d3   : > { %v791_v61 = vadd.f32 %v790_v53, %v3706_v48 }
 0x1d5   : > { %v819_v1 = vsel %vm647_vm1, %v791_v61, -inf }
 0x1d8   : > { %v771_v54 = vpop.f32.mrf.mxu3 }
 0x1d9   : > { %v772_v55 = vadd.f32 %v771_v54, %v3706_v48 }
 0x1da   : > { %v792_v56 = vpop.f32.mrf.mxu0  ;;  %v809_v57 = vpop.f32.mrf.mxu1 }
 0x1db   : > { %v810_v58 = vadd.f32 %v809_v57, %v3706_v48  ;;  %v816_v59 = vsel %vm647_vm1, %v772_v55, -inf }
 0x1dc   : > { %817 = vmax.xlane.f32.xlu2 %v816_v59 }
 0x1dd   : > { %v822_v60 = vsel %vm647_vm1, %v810_v58, -inf }
 0x1de   : > { %823 = vmax.xlane.f32.xlu0 %v822_v60 }
 0x1e0   : > { %v773_v62 = vpop.f32.mrf.mxu3 }
 0x1e2   : > { %v811_v63 = vpop.f32.mrf.mxu1 }
 0x1e4   : > { %820 = vmax.xlane.f32.xlu2 %v819_v1 }
 0x23f   : > { %v815_v2 = vpop.xlane.xlu1 %814 }
 0x240   : > { %v825_v3 = vsub.f32 %v753_v50, %v815_v2 }
 0x242   : > { %v829_v4 = vmul.f32 1.442695, %v825_v3 }
 0x244   : > { %3159 = vpow2.f32 %v829_v4 }
 0x24a   : > { %v3160_v5 = vpop.eup %3159 }
 0x24b   : > { %v837_v6 = vsel %vm647_vm1, %v3160_v5, 0.0 }
 0x24c   : > { %838 = vadd.xlane.f32.xlu2 %v837_v6 }
 0x24f   : > { %v818_v7 = vpop.xlane.xlu2 %817 }
 0x250   : > { %v826_v8 = vsub.f32 %v772_v55, %v818_v7  ;;  %v3138_v7 = vld [vmem:[#allocation5] ss:$0 sm:$0xff] }
 0x251   : > { %v824_v10 = vpop.xlane.xlu0 %823 }
 0x252   : > { %v831_v9 = vmul.f32 1.442695, %v826_v8  ;;  %v828_v14 = vsub.f32 %v810_v58, %v824_v10 }
 0x254   : > { %3161 = vpow2.f32 %v831_v9  ;;  %v835_v17 = vmul.f32 1.442695, %v828_v14 }
 0x257   : > { %v821_v11 = vpop.xlane.xlu2 %820 }
 0x258   : > { %v827_v12 = vsub.f32 %v791_v61, %v821_v11 }
 0x25a   : > { %v3162_v13 = vpop.eup %3161  ;;  %v833_v15 = vmul.f32 1.442695, %v827_v12 }
 0x25b   : > { %v840_v16 = vsel %vm647_vm1, %v3162_v13, 0.0 }
 0x25c   : > { %3163 = vpow2.f32 %v833_v15  ;;  %841 = vadd.xlane.f32.xlu2 %v840_v16  ;;  %v3444_v15 = vmov 32.0  }
 0x25d   : > { %3165 = vpow2.f32 %v835_v17 }
 0x262   : > { %v3164_v18 = vpop.eup %3163 }
 0x263   : > { %v843_v19 = vsel %vm647_vm1, %v3164_v18, 0.0  ;;  %v3166_v20 = vpop.eup %3165 }
 0x264   : > { %844 = vadd.xlane.f32.xlu2 %v843_v19  ;;  %v846_v21 = vsel %vm647_vm1, %v3166_v20, 0.0 }
 0x26c   : > { %847 = vadd.xlane.f32.xlu2 %v846_v21 }
 0x2bf   : > { %v839_v22 = vpop.xlane.xlu2 %838 }
 0x2c0   : > { %3167 = vrcp.f32 %v839_v22 }
 0x2c6   : > { %v3168_v23 = vpop.eup %3167 }
 0x2c7   : > { %v853_v24 = vmul.f32 %v3168_v23, %v3160_v5 }
 0x2c9   : > { %v857_v25 = vpack.c.bf16 %v853_v24, %v853_v24 }
 0x2cb   : > { %2872 = vmatmul.msk.bf16.vlgmr.msrb.gmra.mxu2 %vm647_vm1, %v857_v25 }
 0x2cf   : > { %v842_v26 = vpop.xlane.xlu2 %841 }
 0x2d0   : > { %3169 = vrcp.f32 %v842_v26  ;;  %v617_v26 = vld [vmem:[%s608_s29] sm:$0xff]  ;;  %s4184_s29 = sld [smem:[#allocation22_spill]] }
 0x2d6   : > { %v3170_v27 = vpop.eup %3169 }
 0x2d7   : > { %v854_v28 = vmul.f32 %v3170_v27, %v3162_v13  ;;  %v845_v29 = vpop.xlane.xlu2 %844 }
 0x2d8   : > { %3171 = vrcp.f32 %v845_v29 }
 0x2d9   : > { %v858_v30 = vpack.c.bf16 %v854_v28, %v854_v28 }
 0x2db   : > { %2873 = vmatmul.msk.bf16.vlgmr.msra.gmra.mxu3 %vm647_vm1, %v858_v30 }
 0x2de   : > { %v3172_v31 = vpop.eup %3171 }
 0x2df   : > { %v855_v32 = vmul.f32 %v3172_v31, %v3164_v18  ;;  %v848_v33 = vpop.xlane.xlu2 %847 }
 0x2e0   : > { %3173 = vrcp.f32 %v848_v33 }
 0x2e1   : > { %v859_v34 = vpack.c.bf16 %v855_v32, %v855_v32  ;;  %3175 = vrcp.f32 %v3444_v15 }
 0x2e3   : > { %2874 = vmatmul.msk.bf16.vlgmr.msra.gmra.mxu0 %vm647_vm1, %v859_v34 }
 0x2e6   : > { %v3174_v35 = vpop.eup %3173 }
 0x2e7   : > { %v856_v36 = vmul.f32 %v3174_v35, %v3166_v20  ;;  %v3176_v16 = vpop.eup %3175 }
 0x2e8   : > { %v1039_v17 = vmul.f32 32.0, %v3176_v16  ;;  %vm1043_vm3 = vweird.f32 %v3176_v16 }
 0x2e9   : > { %v860_v37 = vpack.c.bf16 %v856_v36, %v856_v36  ;;  %v3139_v36 = vld [vmem:[#allocation7] ss:$0 sm:$0xff] }
 0x2ea   : > { %v1040_v18 = vsub.f32 1.0, %v1039_v17 }
 0x2eb   : > { %2875 = vmatmul.msk.bf16.vlgmr.msra.gmra.mxu1 %vm647_vm1, %v860_v37 }
 0x2ec   : > { %v1041_v19 = vmul.f32 %v3176_v16, %v1040_v18 }
 0x2ee   : > { %v1042_v20 = vadd.f32 %v3176_v16, %v1041_v19 }
 0x2f0   : > { %v3750_v21 = vsel %vm1043_vm3, %v3176_v16, %v1042_v20 }
 0x34e   : > { %v876_v46 = vpop.f32.mrf.mxu2 }
 0x34f   : > { %v937_v47 = vpack.c.bf16 %v876_v46, %v876_v46 }
 0x351   : > { %2876 = vmatmul.msk.bf16.vlgmr.msra.gmra.mxu2 %vm647_vm1, %v937_v47  ;;  %v1135_v47 = vsel %vm654_vm0, %v2881_v43, 0 }
 0x352   : > { %1144 = vmatpush.bf16.msra.mxu3 %v1135_v47 }
 0x356   : > { %v878_v49 = vpop.f32.mrf.mxu2 }
 0x357   : > { %v1161_v49 = vsel %vm654_vm0, %v2882_v44, 0 }
 0x358   : > { %1170 = vmatpush.bf16.msra.mxu0 %v1161_v49 }
 0x35e   : > { %v895_v50 = vpop.f32.mrf.mxu3 }
 0x35f   : > { %v938_v51 = vpack.c.bf16 %v895_v50, %v895_v50  ;;  %v1099_v50 = vsel %vm654_vm0, %v2880_v45, 0 }
 0x360   : > { %v914_v52 = vpop.f32.mrf.mxu0  ;;  %1108 = vmatpush.bf16.msrb.mxu2 %v1099_v50 }
 0x361   : > { %v939_v53 = vpack.c.bf16 %v914_v52, %v914_v52  ;;  %2877 = vmatmul.msk.bf16.vlgmr.msrb.gmra.mxu3 %vm647_vm1, %v938_v51 }
 0x363   : > { %2878 = vmatmul.msk.bf16.vlgmr.msrb.gmra.mxu0 %vm647_vm1, %v939_v53 }
 0x366   : > { %v897_v54 = vpop.f32.mrf.mxu3 }
 0x368   : > { %v916_v55 = vpop.f32.mrf.mxu0  ;;  %v933_v56 = vpop.f32.mrf.mxu1 }
 0x369   : > { %v940_v57 = vpack.c.bf16 %v933_v56, %v933_v56 }
 0x36b   : > { %2879 = vmatmul.msk.bf16.vlgmr.msrb.gmra.mxu1 %vm647_vm1, %v940_v57 }
 0x370   : > { %v935_v58 = vpop.f32.mrf.mxu1 }
 0x3d4   : > { %v960_v59 = vpop.f32.mrf.mxu2 }
 0x3d5   : > { %v1022_v63 = vsel %vm1021_vm2, %v960_v59, 0.0 }
 0x3dc   : > { %v962_v60 = vpop.f32.mrf.mxu2 }
 0x3e0   : > { %v998_v61 = vpop.f32.mrf.mxu0 }
 0x3e1   : > { %v1025_v3 = vsel %vm1021_vm2, %v998_v61, 0.0 }
 0x3e4   : > { %v979_v62 = vpop.f32.mrf.mxu3 }
 0x3e5   : > { %v1023_v1 = vsel %vm1021_vm2, %v979_v62, 0.0 }
 0x3e6   : > { %v1024_v2 = vadd.f32 %v1023_v1, %v1022_v63 }
 0x3e8   : > { %v1000_v4 = vpop.f32.mrf.mxu0  ;;  %v1017_v5 = vpop.f32.mrf.mxu1  ;;  %v1026_v6 = vadd.f32 %v1025_v3, %v1024_v2 }
 0x3e9   : > { %v1027_v8 = vsel %vm1021_vm2, %v1017_v5, 0.0 }
 0x3ea   : > { %v1028_v9 = vadd.f32 %v1027_v8, %v1026_v6 }
 0x3ec   : > { %v1033_v10 = vadd.f32 %v3138_v7, %v1028_v9  ;;  %v981_v11 = vpop.f32.mrf.mxu3 }
 0x3ee   : > { %v1034_v12 = vadd.f32 %v1033_v10, %v3660_v0 }
 0x3f0   : > { %v1019_v13 = vpop.f32.mrf.mxu1  ;;  %v1035_v14 = vsel %vm1021_vm2, %v1034_v12, 0.0 }
 0x3f1   : > { %1036 = vadd.xlane.f32.xlu2 %v1035_v14 }
 0x409   : > { %619 = vrot.lane.b32.xlu2 %v617_v26, %s3441_s30 }
 0x464   : > { %v1037_v22 = vpop.xlane.xlu2 %1036 }
 0x465   : > { %v1045_v23 = vmul.f32 %v3750_v21, %v1037_v22 }
 0x467   : > { %v1046_v24 = vsub.f32 %v1034_v12, %v1045_v23 }
 0x469   : > { %v1047_v0 = vmul.f32 %v1046_v24, %v1046_v24 }
 0x46b   : > { %v1048_v25 = vsel %vm1021_vm2, %v1047_v0, 0.0 }
 0x46c   : > { %1049 = vadd.xlane.f32.xlu1 %v1048_v25  ;;  %v620_v42 = vpop.permute.xlu2 %619 }
 0x46d   : > { %v3782_v46 = vpack.c.bf16 %v620_v42, %v617_v26 }
 0x46f   : > { %2885 = vmatmul.msk.bf16.vlgmr.msra.gmra.mxu3 %vm647_vm1, %v3782_v46  ;;  %2887 = vmatmul.msk.bf16.vlgmr.msra.gmra.mxu0 %vm647_vm1, %v3782_v46 }
 0x485   : > { %622 = vrot.lane.b32.xlu1 %v617_v26, %s3443_s14 }
 0x4df   : > { %v1050_v27 = vpop.xlane.xlu1 %1049 }
 0x4e0   : > { %v1051_v28 = vmul.f32 %v1050_v27, %v3750_v21 }
 0x4e2   : > { %v1052_v29 = vadd.f32 1e-05, %v1051_v28 }
 0x4e4   : > { %3177 = vrsqrt.f32 %v1052_v29  ;;  %vm1059_vm5 = vweird.f32 %v1052_v29 }
 0x4ea   : > { %v3178_v30 = vpop.eup %3177 }
 0x4eb   : > { %v1054_v31 = vmul.f32 %v3178_v30, %v1052_v29  ;;  %vm1060_vm4 = vweird.f32 %v3178_v30 }
 0x4ec   : > { %vm1061_vm6 = vmor %vm1059_vm5, %vm1060_vm4  ;;  %v1172_v59 = vpop.f32.mrf.mxu0 }
 0x4ed   : > { %v1055_v32 = vmul.f32 %v3178_v30, %v1054_v31  ;;  %v1182_v60 = vpack.c.bf16 %v1172_v59, %v1172_v59 }
 0x4ef   : > { %v1056_v33 = vmul.f32 0.5, %v1055_v32  ;;  %v1314_v61 = vsel %vm654_vm0, %v1182_v60, 0  ;;  %v3813_v32 = vld [vmem:[%s3638_s24] sm:$0xff]  ;;  %s600_s24 = scalar_lea.vmem [#allocation10], %s2852_s28 }
 0x4f0   : > { %1323 = vmatpush.bf16.msrb.mxu0 %v1314_v61  ;;  %s2705_s26 = sshll.u32 %s600_s24, 4  ;;  %s2706_s26 = int_to_ptr.vmem [resolvable:$true] %s2705_s26 }
 0x4f1   : > { %v1057_v34 = vsub.f32 1.5, %v1056_v33 }
 0x4f2   : > { %v1146_v62 = vpop.f32.mrf.mxu3 }
 0x4f3   : > { %v1058_v35 = vmul.f32 %v3178_v30, %v1057_v34  ;;  %v1156_v63 = vpack.c.bf16 %v1146_v62, %v1146_v62 }
 0x4f4   : > { %v1174_v5 = vpop.f32.mrf.mxu0 }
 0x4f5   : > { %v1062_v37 = vsel %vm1061_vm6, %v3178_v30, %v1058_v35  ;;  %v1190_v1 = vsel %vm647_vm1, %v1156_v63, 0  ;;  %v1183_v7 = vpack.c.bf16 %v1174_v5, %v1174_v5 }
 0x4f6   : > { %v1063_v38 = vmul.f32 %v1062_v37, %v1046_v24  ;;  %1199 = vmatpush.bf16.xpose.msra.mxu1 %v1190_v1 }
 0x4f7   : > { %v623_v53 = vpop.permute.xlu1 %622  ;;  %v1333_v11 = vsel %vm654_vm0, %v1183_v7, 0 }
 0x4f8   : > { %v1068_v40 = vmul.f32 %v3139_v36, %v1063_v38 }
 0x4fa   : > { %v3764_v41 = vadd.f32 %v3140_v39, %v1068_v40  ;;  %v1148_v2 = vpop.f32.mrf.mxu3 }
 0x4fb   : > { %v1157_v3 = vpack.c.bf16 %v1148_v2, %v1148_v2 }
 0x4fc   : > { %1081 = vrot.lane.b32.xlu1 %v3764_v41, %s3442_s15  ;;  %1078 = vrot.lane.b32.xlu2 %v3764_v41, %s3443_s14 }
 0x4fd   : > { %1075 = vrot.lane.b32.xlu0 %v3764_v41, %s3441_s30  ;;  %v1209_v4 = vsel %vm647_vm1, %v1157_v3, 0 }
 0x4fe   : > { %1218 = vmatpush.bf16.xpose.msrb.mxu1 %v1209_v4 }
 0x505   : > { %625 = vrot.lane.b32.xlu0 %v617_v26, %s3442_s15 }
 0x556   : > { %v1079_v57 = vpop.permute.xlu2 %1078 }
 0x56e   : > { %v1082_v56 = vpop.permute.xlu1 %1081 }
 0x56f   : > { %v1076_v51 = vpop.permute.xlu0 %1075  ;;  %v1085_v58 = vpack.c.bf16 %v1082_v56, %v1079_v57 }
 0x570   : > { %v1084_v52 = vpack.c.bf16 %v1076_v51, %v3764_v41 }
 0x572   : > { %2883 = vmatmul.msk.bf16.vlgmr.msrb.gmra.mxu2 %vm647_vm1, %v1084_v52 }
 0x577   : > { %v626_v54 = vpop.permute.xlu0 %625 }
 0x578   : > { %v3793_v55 = vpack.c.bf16 %v626_v54, %v623_v53 }
 0x57a   : > { %2886 = vmatmul.msk.bf16.gmra.mxu3 %vm647_vm1, %v3793_v55  ;;  %2888 = vmatmul.msk.bf16.gmra.mxu0 %vm647_vm1, %v3793_v55 }
 0x582   : > { %2884 = vmatmul.msk.bf16.gmra.mxu2 %vm647_vm1, %v1085_v58 }
 0x5f5   : > { %v1110_v6 = vpop.f32.mrf.mxu2 }
 0x5f6   : > { %v1120_v8 = vmul.f32 0.17677669, %v1110_v6 }
 0x5f7   : > { %v1177_v10 = vpop.f32.mrf.mxu0 }
 0x5f8   : > { %v1124_v9 = vpack.c.bf16 %v1120_v8, %v1120_v8  ;;  %v1184_v12 = vpack.c.bf16 %v1177_v10, %v1177_v10 }
 0x5fa   : > { %2889 = vmatmul.msk.bf16.vlgmr.msra.gmra.mxu1 %vm647_vm1, %v1124_v9  ;;  %v1352_v17 = vsel %vm654_vm0, %v1184_v12, 0 }
 0x5fb   : > { %1342 = vmatpush.bf16.msra.mxu1 %v1333_v11 }
 0x5fd   : > { %v1112_v13 = vpop.f32.mrf.mxu2  ;;  %v1151_v14 = vpop.f32.mrf.mxu3 }
 0x5fe   : > { %v1158_v15 = vpack.c.bf16 %v1151_v14, %v1151_v14  ;;  %v1121_v19 = vmul.f32 0.17677669, %v1112_v13 }
 0x5ff   : > { %v1179_v18 = vpop.f32.mrf.mxu0 }
 0x600   : > { %v1228_v16 = vsel %vm647_vm1, %v1158_v15, 0  ;;  %v1185_v23 = vpack.c.bf16 %v1179_v18, %v1179_v18  ;;  %v1125_v25 = vpack.c.bf16 %v1121_v19, %v1121_v19 }
 0x601   : > { %1237 = vmatpush.bf16.xpose.msra.mxu2 %v1228_v16 }
 0x602   : > { %v1371_v28 = vsel %vm654_vm0, %v1185_v23, 0 }
 0x605   : > { %v1115_v20 = vpop.f32.mrf.mxu2  ;;  %v1153_v22 = vpop.f32.mrf.mxu3 }
 0x606   : > { %v1122_v24 = vmul.f32 0.17677669, %v1115_v20  ;;  %v1159_v0 = vpack.c.bf16 %v1153_v22, %v1153_v22 }
 0x608   : > { %v1126_v26 = vpack.c.bf16 %v1122_v24, %v1122_v24  ;;  %v1247_v27 = vsel %vm647_vm1, %v1159_v0, 0 }
 0x609   : > { %1361 = vmatpush.bf16.msrb.mxu2 %v1352_v17  ;;  %1256 = vmatpush.bf16.xpose.msrb.mxu3 %v1247_v27 }
 0x60a   : > { %2890 = vmatmul.msk.bf16.vlgmr.msrb.gmra.mxu1 %vm647_vm1, %v1125_v25  ;;  %2891 = vmatmul.msk.bf16.vlgmr.msra.gmra.mxu2 %vm647_vm1, %v1126_v26  ;;  %v2897_v26 = vld [vmem:[%s4149_s5 + $0x10] sm:$0xf] }
 0x60b   : > { %v1399_v27 = vsel %vm654_vm0, %v2897_v26, 0  ;;  %v3143_v26 = vld [vmem:[%s4152_s8 + $0x1] ss:$0 sm:$0xff] }
 0x60c   : > { %1408 = vmatpush.bf16.msra.mxu0 %v1399_v27 }
 0x60d   : > { %v1117_v29 = vpop.f32.mrf.mxu2 }
 0x60e   : > { %v1123_v30 = vmul.f32 0.17677669, %v1117_v29 }
 0x610   : > { %v1127_v31 = vpack.c.bf16 %v1123_v30, %v1123_v30  ;;  %v2898_v30 = vld [vmem:[%s4149_s5 + $0x14] sm:$0xf] }
 0x611   : > { %1380 = vmatpush.bf16.msra.mxu3 %v1371_v28  ;;  %v2899_v28 = vld [vmem:[%s4149_s5 + $0x18] sm:$0xf] }
 0x612   : > { %2892 = vmatmul.msk.bf16.vlgmr.msrb.gmra.mxu3 %vm647_vm1, %v1127_v31  ;;  %v1437_v29 = vsel %vm654_vm0, %v2899_v28, 0  ;;  %v1418_v31 = vsel %vm654_vm0, %v2898_v30, 0 }
 0x613   : > { %1446 = vmatpush.bf16.msra.mxu2 %v1437_v29  ;;  %1427 = vmatpush.bf16.msrb.mxu1 %v1418_v31  ;;  %v3042_v31 = vld [vmem:[%s4155_s11 + $0x8] sm:$0xff] }
 0x677   : > { %v1201_v33 = vpop.f32.mrf.mxu1 }
 0x678   : > { %v1202_v34 = vadd.f32 %v1201_v33, %v3813_v32 }
 0x67a   : > { %v1262_v35 = vsel %vm647_vm1, %v1202_v34, -inf }
 0x67b   : > { %1263 = vmax.xlane.f32.xlu1 %v1262_v35  ;;  %v2900_v35 = vld [vmem:[%s4149_s5 + $0x1c] sm:$0xf] }
 0x67f   : > { %v1203_v36 = vpop.f32.mrf.mxu1 }
 0x680   : > { %v1456_v36 = vsel %vm654_vm0, %v2900_v35, 0 }
 0x681   : > { %1465 = vmatpush.bf16.msrb.mxu3 %v1456_v36 }
 0x687   : > { %v1220_v37 = vpop.f32.mrf.mxu1 }
 0x688   : > { %v1221_v43 = vadd.f32 %v1220_v37, %v3813_v32 }
 0x68a   : > { %v1265_v50 = vsel %vm647_vm1, %v1221_v43, -inf }
 0x68d   : > { %v1239_v38 = vpop.f32.mrf.mxu2 }
 0x68e   : > { %v1240_v39 = vadd.f32 %v1239_v38, %v3813_v32 }
 0x68f   : > { %v1222_v40 = vpop.f32.mrf.mxu1 }
 0x690   : > { %v1268_v42 = vsel %vm647_vm1, %v1240_v39, -inf }
 0x691   : > { %1269 = vmax.xlane.f32.xlu0 %v1268_v42 }
 0x695   : > { %v1241_v44 = vpop.f32.mrf.mxu2  ;;  %v1258_v45 = vpop.f32.mrf.mxu3 }
 0x696   : > { %v1259_v47 = vadd.f32 %v1258_v45, %v3813_v32 }
 0x698   : > { %v1271_v49 = vsel %vm647_vm1, %v1259_v47, -inf }
 0x699   : > { %1272 = vmax.xlane.f32.xlu2 %v1271_v49  ;;  %1266 = vmax.xlane.f32.xlu0 %v1265_v50 }
 0x69d   : > { %v1260_v51 = vpop.f32.mrf.mxu3 }
 0x6ee   : > { %v1264_v52 = vpop.xlane.xlu1 %1263 }
 0x6ef   : > { %v1274_v53 = vsub.f32 %v1202_v34, %v1264_v52 }
 0x6f1   : > { %v1278_v54 = vmul.f32 1.442695, %v1274_v53 }
 0x6f3   : > { %3179 = vpow2.f32 %v1278_v54 }
 0x6f9   : > { %v3180_v56 = vpop.eup %3179 }
 0x6fa   : > { %v1286_v57 = vsel %vm647_vm1, %v3180_v56, 0.0 }
 0x6fb   : > { %1287 = vadd.xlane.f32.xlu0 %v1286_v57 }
 0x704   : > { %v1270_v58 = vpop.xlane.xlu0 %1269 }
 0x705   : > { %v1276_v59 = vsub.f32 %v1240_v39, %v1270_v58 }
 0x707   : > { %v1282_v60 = vmul.f32 1.442695, %v1276_v59 }
 0x709   : > { %3181 = vpow2.f32 %v1282_v60 }
 0x70c   : > { %v1273_v61 = vpop.xlane.xlu2 %1272  ;;  %v1267_v62 = vpop.xlane.xlu0 %1266 }
 0x70d   : > { %v1277_v63 = vsub.f32 %v1259_v47, %v1273_v61  ;;  %v1275_v1 = vsub.f32 %v1221_v43, %v1267_v62 }
 0x70f   : > { %v3182_v2 = vpop.eup %3181  ;;  %v1284_v3 = vmul.f32 1.442695, %v1277_v63  ;;  %v1280_v4 = vmul.f32 1.442695, %v1275_v1  ;;  %v3141_v63 = vld [vmem:[#allocation5 + $0x1] ss:$0 sm:$0xff] }
 0x710   : > { %v1292_v5 = vsel %vm647_vm1, %v3182_v2, 0.0 }
 0x711   : > { %3183 = vpow2.f32 %v1284_v3  ;;  %1293 = vadd.xlane.f32.xlu2 %v1292_v5 }
 0x712   : > { %3185 = vpow2.f32 %v1280_v4 }
 0x717   : > { %v3184_v6 = vpop.eup %3183 }
 0x718   : > { %v3186_v7 = vpop.eup %3185  ;;  %v1295_v8 = vsel %vm647_vm1, %v3184_v6, 0.0 }
 0x719   : > { %v1289_v9 = vsel %vm647_vm1, %v3186_v7, 0.0  ;;  %1296 = vadd.xlane.f32.xlu1 %v1295_v8 }
 0x71a   : > { %1290 = vadd.xlane.f32.xlu2 %v1289_v9 }
 0x76e   : > { %v1288_v10 = vpop.xlane.xlu0 %1287 }
 0x76f   : > { %3187 = vrcp.f32 %v1288_v10 }
 0x775   : > { %v3188_v11 = vpop.eup %3187 }
 0x776   : > { %v1302_v12 = vmul.f32 %v3188_v11, %v3180_v56 }
 0x778   : > { %v1306_v13 = vpack.c.bf16 %v1302_v12, %v1302_v12  ;;  %v3040_v12 = vld [vmem:[%s4153_s9 + $0x8] sm:$0xff] }
 0x77a   : > { %2893 = vmatmul.msk.bf16.vlgmr.msrb.gmra.mxu0 %vm647_vm1, %v1306_v13  ;;  %v3044_v13 = vld [vmem:[%s4155_s11 + $0x18] sm:$0xff] }
 0x77b   : > { %1549 = vmatpush.bf16.msrb.mxu0 %v3040_v12 }
 0x784   : > { %v1294_v14 = vpop.xlane.xlu2 %1293 }
 0x785   : > { %3189 = vrcp.f32 %v1294_v14 }
 0x78b   : > { %v3190_v15 = vpop.eup %3189 }
 0x78c   : > { %v1304_v16 = vmul.f32 %v3190_v15, %v3182_v2  ;;  %v1297_v17 = vpop.xlane.xlu1 %1296 }
 0x78d   : > { %v1291_v18 = vpop.xlane.xlu2 %1290  ;;  %3191 = vrcp.f32 %v1297_v17 }
 0x78e   : > { %v1308_v19 = vpack.c.bf16 %v1304_v16, %v1304_v16  ;;  %3193 = vrcp.f32 %v1291_v18  ;;  %v3043_v16 = vld [vmem:[%s4155_s11 + $0x10] sm:$0xff] }
 0x790   : > { %2895 = vmatmul.msk.bf16.vlgmr.msrb.gmra.mxu2 %vm647_vm1, %v1308_v19 }
 0x793   : > { %v3192_v20 = vpop.eup %3191 }
 0x794   : > { %v3194_v22 = vpop.eup %3193  ;;  %v1305_v23 = vmul.f32 %v3192_v20, %v3184_v6 }
 0x795   : > { %v1303_v24 = vmul.f32 %v3194_v22, %v3186_v7 }
 0x796   : > { %v1309_v0 = vpack.c.bf16 %v1305_v23, %v1305_v23 }
 0x797   : > { %v1307_v25 = vpack.c.bf16 %v1303_v24, %v1303_v24 }
 0x798   : > { %2896 = vmatmul.msk.bf16.vlgmr.msra.gmra.mxu3 %vm647_vm1, %v1309_v0  ;;  %v3142_v0 = vld [vmem:[#allocation7 + $0x1] ss:$0 sm:$0xff] }
 0x799   : > { %2894 = vmatmul.msk.bf16.vlgmr.msra.gmra.mxu1 %vm647_vm1, %v1307_v25 }
 0x79a   : > { %1602 = vmatpush.bf16.msra.mxu1 %v3044_v13 }
 0x79e   : > { %1603 = vmatpush.bf16.msra.mxu1 %v3043_v16 }
 0x7a2   : > { %1604 = vmatpush.bf16.msra.mxu1 %v3042_v31 }
 0x7f7   : > { %v1325_v33 = vpop.f32.mrf.mxu0 }
 0x7f8   : > { %v1386_v34 = vpack.c.bf16 %v1325_v33, %v1325_v33  ;;  %v3041_v33 = vld [vmem:[%s4155_s11] sm:$0xff] }
 0x7f9   : > { %1605 = vmatpush.bf16.msra.mxu1 %v3041_v33 }
 0x7fa   : > { %2901 = vmatmul.msk.bf16.vlgmr.msra.gmra.mxu0 %vm647_vm1, %v1386_v34  ;;  %v3144_v34 = vld [vmem:[%s4154_s10] ss:$0 sm:$0xff] }
 0x7ff   : > { %v1327_v37 = vpop.f32.mrf.mxu0 }
 0x813   : > { %v1363_v38 = vpop.f32.mrf.mxu2 }
 0x814   : > { %v1388_v39 = vpack.c.bf16 %v1363_v38, %v1363_v38 }
 0x816   : > { %v1344_v40 = vpop.f32.mrf.mxu1  ;;  %2903 = vmatmul.msk.bf16.vlgmr.msra.gmra.mxu2 %vm647_vm1, %v1388_v39 }
 0x817   : > { %v1387_v42 = vpack.c.bf16 %v1344_v40, %v1344_v40  ;;  %v3145_v40 = vld [vmem:[%s4156_s12] ss:$0 sm:$0xff] }
 0x819   : > { %2902 = vmatmul.msk.bf16.vlgmr.msrb.gmra.mxu1 %vm647_vm1, %v1387_v42 }
 0x81b   : > { %v1365_v43 = vpop.f32.mrf.mxu2  ;;  %v1382_v44 = vpop.f32.mrf.mxu3 }
 0x81c   : > { %v1389_v45 = vpack.c.bf16 %v1382_v44, %v1382_v44 }
 0x81e   : > { %v1346_v47 = vpop.f32.mrf.mxu1  ;;  %2904 = vmatmul.msk.bf16.vlgmr.msrb.gmra.mxu3 %vm647_vm1, %v1389_v45 }
 0x823   : > { %v1384_v49 = vpop.f32.mrf.mxu3 }
 0x877   : > { %v1410_v50 = vpop.f32.mrf.mxu0 }
 0x878   : > { %v1471_v56 = vsel %vm1021_vm2, %v1410_v50, 0.0 }
 0x87f   : > { %v1412_v51 = vpop.f32.mrf.mxu0 }
 0x896   : > { %v1429_v52 = vpop.f32.mrf.mxu1 }
 0x897   : > { %v1472_v54 = vsel %vm1021_vm2, %v1429_v52, 0.0 }
 0x898   : > { %v1473_v59 = vadd.f32 %v1472_v54, %v1471_v56 }
 0x899   : > { %v1448_v53 = vpop.f32.mrf.mxu2 }
 0x89a   : > { %v1474_v57 = vsel %vm1021_vm2, %v1448_v53, 0.0 }
 0x89b   : > { %v1475_v60 = vadd.f32 %v1474_v57, %v1473_v59 }
 0x89e   : > { %v1431_v58 = vpop.f32.mrf.mxu1 }
 0x8a1   : > { %v1450_v61 = vpop.f32.mrf.mxu2  ;;  %v1467_v62 = vpop.f32.mrf.mxu3 }
 0x8a2   : > { %v1476_v1 = vsel %vm1021_vm2, %v1467_v62, 0.0 }
 0x8a3   : > { %v1477_v2 = vadd.f32 %v1476_v1, %v1475_v60  ;;  %v3146_v1 = vld [vmem:[#allocation7 + $0x2] ss:$0 sm:$0xff] }
 0x8a5   : > { %v1483_v3 = vadd.f32 %v3141_v63, %v1477_v2 }
 0x8a7   : > { %v1484_v4 = vadd.f32 %v1483_v3, %v3764_v41  ;;  %v3039_v41 = vld [vmem:[%s4153_s9] sm:$0xff] }
 0x8a8   : > { %1550 = vmatpush.bf16.msrb.mxu0 %v3039_v41 }
 0x8a9   : > { %v1469_v5 = vpop.f32.mrf.mxu3  ;;  %v1485_v6 = vsel %vm1021_vm2, %v1484_v4, 0.0 }
 0x8aa   : > { %1486 = vadd.xlane.f32.xlu1 %v1485_v6 }
 0x91d   : > { %v1487_v7 = vpop.xlane.xlu1 %1486 }
 0x91e   : > { %v1488_v8 = vmul.f32 %v1487_v7, %v3750_v21  ;;  %v2933_v7 = vld [vmem:[%s4148_s4 + $0x18] sm:$0xf] }
 0x920   : > { %v1489_v9 = vsub.f32 %v1484_v4, %v1488_v8  ;;  %v3147_v4 = vld [vmem:[%s4152_s8 + $0x2] ss:$0 sm:$0xff]  ;;  %v2934_v8 = vld [vmem:[%s4148_s4 + $0x1c] sm:$0xf] }
 0x922   : > { %v1490_v10 = vmul.f32 %v1489_v9, %v1489_v9 }
 0x924   : > { %v1491_v11 = vsel %vm1021_vm2, %v1490_v10, 0.0  ;;  %v1671_v10 = vsel %vm654_vm0, %v2933_v7, 0 }
 0x925   : > { %1492 = vadd.xlane.f32.xlu0 %v1491_v11  ;;  %v1701_v11 = vsel %vm654_vm0, %v2934_v8, 0  ;;  %1680 = vmatpush.bf16.msrb.mxu2 %v1671_v10 }
 0x926   : > { %1710 = vmatpush.bf16.msra.mxu3 %v1701_v11 }
 0x998   : > { %v1493_v14 = vpop.xlane.xlu0 %1492 }
 0x999   : > { %v1494_v15 = vmul.f32 %v1493_v14, %v3750_v21 }
 0x99b   : > { %v1495_v17 = vadd.f32 1e-05, %v1494_v15 }
 0x99d   : > { %3195 = vrsqrt.f32 %v1495_v17  ;;  %vm1502_vm8 = vweird.f32 %v1495_v17 }
 0x9a3   : > { %v3196_v18 = vpop.eup %3195 }
 0x9a4   : > { %v1497_v19 = vmul.f32 %v3196_v18, %v1495_v17  ;;  %vm1503_vm7 = vweird.f32 %v3196_v18 }
 0x9a5   : > { %vm1504_vm9 = vmor %vm1502_vm8, %vm1503_vm7 }
 0x9a6   : > { %v1498_v20 = vmul.f32 %v3196_v18, %v1497_v19 }
 0x9a8   : > { %v1499_v22 = vmul.f32 0.5, %v1498_v20 }
 0x9aa   : > { %v1500_v23 = vsub.f32 1.5, %v1499_v22 }
 0x9ac   : > { %v1501_v24 = vmul.f32 %v3196_v18, %v1500_v23 }
 0x9ae   : > { %v1505_v25 = vsel %vm1504_vm9, %v3196_v18, %v1501_v24 }
 0x9af   : > { %v1506_v27 = vmul.f32 %v1505_v25, %v1489_v9  ;;  %v2935_v9 = vld [vmem:[%s4148_s4 + $0x20] sm:$0xf] }
 0x9b0   : > { %v1727_v12 = vsel %vm654_vm0, %v2935_v9, 0 }
 0x9b1   : > { %v1512_v28 = vmul.f32 %v3142_v0, %v1506_v27  ;;  %1736 = vmatpush.bf16.msra.mxu0 %v1727_v12 }
 0x9b3   : > { %v1518_v29 = vadd.f32 %v3143_v26, %v1512_v28 }
 0x9b5   : > { %v1519_v30 = vpack.c.bf16 %v1518_v29, %v1518_v29 }
 0x9b7   : > { %2914 = vmatmul.msk.bf16.vlgmr.msrb.gmra.mxu0 %vm1021_vm2, %v1519_v30 }
 0xa34   : > { %v1552_v35 = vpop.f32.mrf.mxu0 }
 0xa35   : > { %v1553_v36 = vadd.f32 %v3144_v34, %v1552_v35 }
 0xa37   : > { %v1556_v37 = vmax.f32 %v1553_v36, 0.0 }
 0xa39   : > { %v1557_v38 = vpack.c.bf16 %v1556_v37, %v1556_v37 }
 0xa3b   : > { %2931 = vmatmul.msk.bf16.vlgmr.msra.gmra.mxu1 %vm1594_vm10, %v1557_v38 }
 0xa3c   : > { %v1554_v39 = vpop.f32.mrf.mxu0 }
 0xab8   : > { %v1607_v42 = vpop.f32.mrf.mxu1 }
 0xab9   : > { %v1608_v43 = vadd.f32 %v3145_v40, %v1607_v42 }
 0xabb   : > { %v1611_v44 = vadd.f32 %v1608_v43, %v1518_v29 }
 0xabd   : > { %v1612_v45 = vsel %vm1021_vm2, %v1611_v44, 0.0 }
 0xabe   : > { %1613 = vadd.xlane.f32.xlu2 %v1612_v45 }
 0xac0   : > { %v1609_v47 = vpop.f32.mrf.mxu1 }
 0xb31   : > { %v1614_v49 = vpop.xlane.xlu2 %1613 }
 0xb32   : > { %v1615_v50 = vmul.f32 %v1614_v49, %v3750_v21 }
 0xb34   : > { %v1616_v51 = vsub.f32 %v1611_v44, %v1615_v50 }
 0xb36   : > { %v1617_v52 = vmul.f32 %v1616_v51, %v1616_v51 }
 0xb38   : > { %v1618_v53 = vsel %vm1021_vm2, %v1617_v52, 0.0 }
 0xb39   : > { %1619 = vadd.xlane.f32.xlu1 %v1618_v53 }
 0xbac   : > { %v1620_v54 = vpop.xlane.xlu1 %1619 }
 0xbad   : > { %v1621_v56 = vmul.f32 %v1620_v54, %v3750_v21 }
 0xbaf   : > { %v1622_v57 = vadd.f32 1e-05, %v1621_v56 }
 0xbb1   : > { %3197 = vrsqrt.f32 %v1622_v57  ;;  %vm1629_vm12 = vweird.f32 %v1622_v57 }
 0xbb7   : > { %v3198_v58 = vpop.eup %3197 }
 0xbb8   : > { %v1624_v59 = vmul.f32 %v3198_v58, %v1622_v57  ;;  %vm1630_vm11 = vweird.f32 %v3198_v58 }
 0xbb9   : > { %vm1631_vm13 = vmor %vm1629_vm12, %vm1630_vm11 }
 0xbba   : > { %v1625_v60 = vmul.f32 %v3198_v58, %v1624_v59 }
 0xbbc   : > { %v1626_v61 = vmul.f32 0.5, %v1625_v60 }
 0xbbe   : > { %v1627_v62 = vsub.f32 1.5, %v1626_v61 }
 0xbc0   : > { %v1628_v63 = vmul.f32 %v3198_v58, %v1627_v62 }
 0xbc2   : > { %v1632_v2 = vsel %vm1631_vm13, %v3198_v58, %v1628_v63 }
 0xbc3   : > { %v1633_v3 = vmul.f32 %v1632_v2, %v1616_v51 }
 0xbc5   : > { %v1639_v5 = vmul.f32 %v3146_v1, %v1633_v3  ;;  %v3237_v1 = vld [vmem:[%s3703_s6] sm:$0xff] }
 0xbc7   : > { %v3896_v6 = vadd.f32 %v3147_v4, %v1639_v5 }
 0xbc9   : > { %1653 = vrot.lane.b32.xlu1 %v3896_v6, %s3442_s15  ;;  %1650 = vrot.lane.b32.xlu2 %v3896_v6, %s3443_s14 }
 0xbca   : > { %1647 = vrot.lane.b32.xlu0 %v3896_v6, %s3441_s30 }
 0xc23   : > { %v1651_v15 = vpop.permute.xlu2 %1650 }
 0xc3b   : > { %v1654_v14 = vpop.permute.xlu1 %1653 }
 0xc3c   : > { %v1648_v41 = vpop.permute.xlu0 %1647  ;;  %v1657_v16 = vpack.c.bf16 %v1654_v14, %v1651_v15 }
 0xc3d   : > { %v1656_v13 = vpack.c.bf16 %v1648_v41, %v3896_v6 }
 0xc3f   : > { %2936 = vmatmul.msk.bf16.vlgmr.msrb.gmra.mxu2 %vm647_vm1, %v1656_v13  ;;  %2938 = vmatmul.msk.bf16.vlgmr.msra.gmra.mxu3 %vm647_vm1, %v1656_v13 }
 0xc40   : > { %2940 = vmatmul.msk.bf16.vlgmr.msra.gmra.mxu0 %vm647_vm1, %v1656_v13 }
 0xc4f   : > { %2937 = vmatmul.msk.bf16.gmra.mxu2 %vm647_vm1, %v1657_v16  ;;  %2939 = vmatmul.msk.bf16.gmra.mxu3 %vm647_vm1, %v1657_v16 }
 0xc50   : > { %2941 = vmatmul.msk.bf16.gmra.mxu0 %vm647_vm1, %v1657_v16 }
 0xcbd   : > { %v1738_v17 = vpop.f32.mrf.mxu0 }
 0xcbe   : > { %v1748_v18 = vpack.c.bf16 %v1738_v17, %v1738_v17 }
 0xcc0   : > { %v1880_v19 = vsel %vm654_vm0, %v1748_v18, 0 }
 0xcc1   : > { %1889 = vmatpush.bf16.msrb.mxu0 %v1880_v19 }
 0xcc2   : > { %v1682_v20 = vpop.f32.mrf.mxu2  ;;  %v1712_v22 = vpop.f32.mrf.mxu3 }
 0xcc3   : > { %v1722_v23 = vpack.c.bf16 %v1712_v22, %v1712_v22  ;;  %v1692_v25 = vmul.f32 0.17677669, %v1682_v20 }
 0xcc5   : > { %v1756_v24 = vsel %vm647_vm1, %v1722_v23, 0  ;;  %v1740_v0 = vpop.f32.mrf.mxu0  ;;  %v1696_v29 = vpack.c.bf16 %v1692_v25, %v1692_v25 }
 0xcc6   : > { %1765 = vmatpush.bf16.xpose.msrb.mxu1 %v1756_v24  ;;  %v1749_v26 = vpack.c.bf16 %v1740_v0, %v1740_v0 }
 0xcc8   : > { %v1899_v34 = vsel %vm654_vm0, %v1749_v26, 0 }
 0xcca   : > { %v1684_v27 = vpop.f32.mrf.mxu2  ;;  %v1714_v28 = vpop.f32.mrf.mxu3 }
 0xccb   : > { %v1723_v30 = vpack.c.bf16 %v1714_v28, %v1714_v28  ;;  %v1693_v42 = vmul.f32 0.17677669, %v1684_v27 }
 0xccd   : > { %v1775_v31 = vsel %vm647_vm1, %v1723_v30, 0  ;;  %v1743_v33 = vpop.f32.mrf.mxu0  ;;  %2942 = vmatmul.msk.bf16.vlgmr.msrb.gmra.mxu1 %vm647_vm1, %v1696_v29  ;;  %v1697_v49 = vpack.c.bf16 %v1693_v42, %v1693_v42 }
 0xcce   : > { %1784 = vmatpush.bf16.xpose.msra.mxu1 %v1775_v31  ;;  %v1750_v35 = vpack.c.bf16 %v1743_v33, %v1743_v33 }
 0xcd0   : > { %v1918_v40 = vsel %vm654_vm0, %v1750_v35, 0 }
 0xcd2   : > { %v1687_v36 = vpop.f32.mrf.mxu2  ;;  %v1717_v37 = vpop.f32.mrf.mxu3 }
 0xcd3   : > { %v1724_v38 = vpack.c.bf16 %v1717_v37, %v1717_v37  ;;  %v1694_v43 = vmul.f32 0.17677669, %v1687_v36 }
 0xcd5   : > { %v1794_v39 = vsel %vm647_vm1, %v1724_v38, 0  ;;  %v1745_v44 = vpop.f32.mrf.mxu0  ;;  %v1698_v50 = vpack.c.bf16 %v1694_v43, %v1694_v43 }
 0xcd6   : > { %1908 = vmatpush.bf16.msrb.mxu1 %v1899_v34  ;;  %1803 = vmatpush.bf16.xpose.msra.mxu2 %v1794_v39  ;;  %v1751_v45 = vpack.c.bf16 %v1745_v44, %v1745_v44 }
 0xcd8   : > { %v1937_v54 = vsel %vm654_vm0, %v1751_v45, 0 }
 0xcda   : > { %v1719_v47 = vpop.f32.mrf.mxu3  ;;  %v1689_v52 = vpop.f32.mrf.mxu2 }
 0xcdb   : > { %v1725_v51 = vpack.c.bf16 %v1719_v47, %v1719_v47  ;;  %v1695_v56 = vmul.f32 0.17677669, %v1689_v52 }
 0xcdd   : > { %v1813_v53 = vsel %vm647_vm1, %v1725_v51, 0  ;;  %2943 = vmatmul.msk.bf16.vlgmr.msra.gmra.mxu1 %vm647_vm1, %v1697_v49  ;;  %2944 = vmatmul.msk.bf16.vlgmr.msra.gmra.mxu2 %vm647_vm1, %v1698_v50  ;;  %v1699_v57 = vpack.c.bf16 %v1695_v56, %v1695_v56  ;;  %v2950_v51 = vld [vmem:[%s4149_s5 + $0x20] sm:$0xf]  ;;  %v2951_v56 = vld [vmem:[%s4149_s5 + $0x24] sm:$0xf] }
 0xcde   : > { %1927 = vmatpush.bf16.msrb.mxu2 %v1918_v40  ;;  %1822 = vmatpush.bf16.xpose.msrb.mxu3 %v1813_v53  ;;  %v1965_v52 = vsel %vm654_vm0, %v2950_v51, 0  ;;  %v2952_v53 = vld [vmem:[%s4149_s5 + $0x28] sm:$0xf] }
 0xcdf   : > { %1974 = vmatpush.bf16.msra.mxu0 %v1965_v52 }
 0xce5   : > { %2945 = vmatmul.msk.bf16.vlgmr.msrb.gmra.mxu3 %vm647_vm1, %v1699_v57  ;;  %v1984_v57 = vsel %vm654_vm0, %v2951_v56, 0 }
 0xce6   : > { %1946 = vmatpush.bf16.msra.mxu3 %v1937_v54  ;;  %v2003_v54 = vsel %vm654_vm0, %v2952_v53, 0  ;;  %1993 = vmatpush.bf16.msra.mxu1 %v1984_v57 }
 0xce7   : > { %2012 = vmatpush.bf16.msra.mxu2 %v2003_v54 }
 0xd4a   : > { %v1767_v58 = vpop.f32.mrf.mxu1 }
 0xd4b   : > { %v1768_v59 = vadd.f32 %v1767_v58, %v3706_v48 }
 0xd4d   : > { %v1828_v60 = vsel %vm647_vm1, %v1768_v59, -inf }
 0xd4e   : > { %1829 = vmax.xlane.f32.xlu1 %v1828_v60  ;;  %v2953_v60 = vld [vmem:[%s4149_s5 + $0x2c] sm:$0xf] }
 0xd52   : > { %v1769_v61 = vpop.f32.mrf.mxu1 }
 0xd53   : > { %v2022_v61 = vsel %vm654_vm0, %v2953_v60, 0 }
 0xd54   : > { %2031 = vmatpush.bf16.msrb.mxu3 %v2022_v61 }
 0xd5a   : > { %v1786_v62 = vpop.f32.mrf.mxu1 }
 0xd5b   : > { %v1787_v5 = vadd.f32 %v3237_v1, %v1786_v62 }
 0xd5d   : > { %v1831_v10 = vsel %vm647_vm1, %v1787_v5, -inf }
 0xd60   : > { %v1805_v63 = vpop.f32.mrf.mxu2 }
 0xd61   : > { %v1806_v2 = vadd.f32 %v3237_v1, %v1805_v63  ;;  %v2961_v63 = vld [vmem:[%s4148_s4 + $0x2c] sm:$0xf] }
 0xd62   : > { %v1788_v3 = vpop.f32.mrf.mxu1 }
 0xd63   : > { %v1834_v4 = vsel %vm647_vm1, %v1806_v2, -inf }
 0xd64   : > { %1835 = vmax.xlane.f32.xlu0 %v1834_v4 }
 0xd68   : > { %v1807_v7 = vpop.f32.mrf.mxu2  ;;  %v1824_v8 = vpop.f32.mrf.mxu3 }
 0xd69   : > { %v1825_v9 = vadd.f32 %v3237_v1, %v1824_v8  ;;  %v2166_v1 = vsel %vm654_vm0, %v2961_v63, 0 }
 0xd6b   : > { %v1837_v48 = vsel %vm647_vm1, %v1825_v9, -inf }
 0xd6c   : > { %1832 = vmax.xlane.f32.xlu0 %v1831_v10  ;;  %1838 = vmax.xlane.f32.xlu2 %v1837_v48 }
 0xd70   : > { %v1826_v11 = vpop.f32.mrf.mxu3 }
 0xdc1   : > { %v1830_v12 = vpop.xlane.xlu1 %1829 }
 0xdc2   : > { %v1840_v41 = vsub.f32 %v1768_v59, %v1830_v12 }
 0xdc4   : > { %v1844_v13 = vmul.f32 1.442695, %v1840_v41 }
 0xdc6   : > { %3199 = vpow2.f32 %v1844_v13 }
 0xdcc   : > { %v3200_v14 = vpop.eup %3199 }
 0xdcd   : > { %v1852_v15 = vsel %vm647_vm1, %v3200_v14, 0.0 }
 0xdce   : > { %1853 = vadd.xlane.f32.xlu1 %v1852_v15  ;;  %v2959_v15 = vld [vmem:[%s4148_s4 + $0x24] sm:$0xf] }
 0xdd7   : > { %v1836_v16 = vpop.xlane.xlu0 %1835 }
 0xdd8   : > { %v1842_v17 = vsub.f32 %v1806_v2, %v1836_v16  ;;  %v2960_v2 = vld [vmem:[%s4148_s4 + $0x28] sm:$0xf]  ;;  %v2110_v16 = vsel %vm654_vm0, %v2959_v15, 0 }
 0xdd9   : > { %v2140_v3 = vsel %vm654_vm0, %v2960_v2, 0 }
 0xdda   : > { %v1848_v18 = vmul.f32 1.442695, %v1842_v17 }
 0xddc   : > { %3201 = vpow2.f32 %v1848_v18 }
 0xddf   : > { %v1833_v19 = vpop.xlane.xlu0 %1832  ;;  %v1839_v20 = vpop.xlane.xlu2 %1838 }
 0xde0   : > { %v1841_v22 = vsub.f32 %v1787_v5, %v1833_v19  ;;  %v1843_v23 = vsub.f32 %v1825_v9, %v1839_v20 }
 0xde2   : > { %v3202_v24 = vpop.eup %3201  ;;  %v1846_v0 = vmul.f32 1.442695, %v1841_v22  ;;  %v1850_v25 = vmul.f32 1.442695, %v1843_v23 }
 0xde3   : > { %v1858_v26 = vsel %vm647_vm1, %v3202_v24, 0.0 }
 0xde4   : > { %3203 = vpow2.f32 %v1846_v0  ;;  %1859 = vadd.xlane.f32.xlu2 %v1858_v26  ;;  %v3148_v0 = vld [vmem:[#allocation5 + $0x2] ss:$0 sm:$0xff] }
 0xde5   : > { %3205 = vpow2.f32 %v1850_v25 }
 0xdea   : > { %v3204_v27 = vpop.eup %3203 }
 0xdeb   : > { %v3206_v28 = vpop.eup %3205  ;;  %v1855_v29 = vsel %vm647_vm1, %v3204_v27, 0.0 }
 0xdec   : > { %1856 = vadd.xlane.f32.xlu2 %v1855_v29  ;;  %v1861_v30 = vsel %vm647_vm1, %v3206_v28, 0.0 }
 0xded   : > { %1862 = vadd.xlane.f32.xlu0 %v1861_v30 }
 0xe41   : > { %v1854_v31 = vpop.xlane.xlu1 %1853 }
 0xe42   : > { %3207 = vrcp.f32 %v1854_v31 }
 0xe48   : > { %v3208_v33 = vpop.eup %3207 }
 0xe49   : > { %v1868_v34 = vmul.f32 %v3208_v33, %v3200_v14 }
 0xe4b   : > { %v1872_v35 = vpack.c.bf16 %v1868_v34, %v1868_v34 }
 0xe4d   : > { %2946 = vmatmul.msk.bf16.vlgmr.msrb.gmra.mxu0 %vm647_vm1, %v1872_v35 }
 0xe4e   : > { %2119 = vmatpush.bf16.msrb.mxu0 %v2110_v16 }
 0xe57   : > { %v1860_v36 = vpop.xlane.xlu2 %1859 }
 0xe58   : > { %3209 = vrcp.f32 %v1860_v36 }
 0xe5e   : > { %v3210_v37 = vpop.eup %3209 }
 0xe5f   : > { %v1870_v38 = vmul.f32 %v3210_v37, %v3202_v24  ;;  %v1857_v39 = vpop.xlane.xlu2 %1856 }
 0xe60   : > { %v1863_v40 = vpop.xlane.xlu0 %1862  ;;  %3211 = vrcp.f32 %v1857_v39 }
 0xe61   : > { %v1874_v42 = vpack.c.bf16 %v1870_v38, %v1870_v38  ;;  %3213 = vrcp.f32 %v1863_v40 }
 0xe63   : > { %2948 = vmatmul.msk.bf16.vlgmr.msrb.gmra.mxu2 %vm647_vm1, %v1874_v42 }
 0xe64   : > { %2175 = vmatpush.bf16.msrb.mxu2 %v2166_v1 }
 0xe66   : > { %v3212_v43 = vpop.eup %3211 }
 0xe67   : > { %v3214_v44 = vpop.eup %3213  ;;  %v1869_v45 = vmul.f32 %v3212_v43, %v3204_v27 }
 0xe68   : > { %v1871_v47 = vmul.f32 %v3214_v44, %v3206_v28 }
 0xe69   : > { %v1873_v49 = vpack.c.bf16 %v1869_v45, %v1869_v45 }
 0xe6a   : > { %v1875_v50 = vpack.c.bf16 %v1871_v47, %v1871_v47 }
 0xe6b   : > { %2947 = vmatmul.msk.bf16.vlgmr.msrb.gmra.mxu1 %vm647_vm1, %v1873_v49 }
 0xe6c   : > { %2949 = vmatmul.msk.bf16.vlgmr.msra.gmra.mxu3 %vm647_vm1, %v1875_v50  ;;  %2149 = vmatpush.bf16.msrb.mxu1 %v2140_v3 }
 0xeca   : > { %v1891_v58 = vpop.f32.mrf.mxu0 }
 0xecb   : > { %v1952_v59 = vpack.c.bf16 %v1891_v58, %v1891_v58 }
 0xecd   : > { %2954 = vmatmul.msk.bf16.vlgmr.msra.gmra.mxu0 %vm647_vm1, %v1952_v59 }
 0xed2   : > { %v1893_v62 = vpop.f32.mrf.mxu0 }
 0xee6   : > { %v1929_v4 = vpop.f32.mrf.mxu2 }
 0xee7   : > { %v1954_v5 = vpack.c.bf16 %v1929_v4, %v1929_v4 }
 0xee8   : > { %v1910_v7 = vpop.f32.mrf.mxu1 }
 0xee9   : > { %v1953_v8 = vpack.c.bf16 %v1910_v7, %v1910_v7  ;;  %2956 = vmatmul.msk.bf16.vlgmr.msra.gmra.mxu2 %vm647_vm1, %v1954_v5  ;;  %v3149_v7 = vld [vmem:[#allocation7 + $0x3] ss:$0 sm:$0xff] }
 0xeeb   : > { %2955 = vmatmul.msk.bf16.vlgmr.msra.gmra.mxu1 %vm647_vm1, %v1953_v8 }
 0xeee   : > { %v1931_v9 = vpop.f32.mrf.mxu2 }
 0xeef   : > { %v1948_v10 = vpop.f32.mrf.mxu3 }
 0xef0   : > { %v1955_v48 = vpack.c.bf16 %v1948_v10, %v1948_v10  ;;  %v1912_v11 = vpop.f32.mrf.mxu1  ;;  %v3150_v10 = vld [vmem:[%s4152_s8 + $0x3] ss:$0 sm:$0xff] }
 0xef2   : > { %2957 = vmatmul.msk.bf16.vlgmr.msrb.gmra.mxu3 %vm647_vm1, %v1955_v48 }
 0xef7   : > { %v1950_v12 = vpop.f32.mrf.mxu3 }
 0xef9   : > { %2966 = vmatmul.msk.bf16.vlgmr.msrb.gmra.mxu2 %vm647_vm1, %v3782_v46 }
 0xefb   : > { %2964 = vmatmul.msk.bf16.vlgmr.msrb.gmra.mxu1 %vm647_vm1, %v3782_v46 }
 0xf09   : > { %2967 = vmatmul.msk.bf16.gmra.mxu2 %vm647_vm1, %v3793_v55 }
 0xf0b   : > { %2965 = vmatmul.msk.bf16.gmra.mxu1 %vm647_vm1, %v3793_v55 }
 0xf4a   : > { %v1976_v41 = vpop.f32.mrf.mxu0 }
 0xf4b   : > { %v2037_v19 = vsel %vm1021_vm2, %v1976_v41, 0.0 }
 0xf52   : > { %v1978_v13 = vpop.f32.mrf.mxu0 }
 0xf68   : > { %v1995_v14 = vpop.f32.mrf.mxu1 }
 0xf69   : > { %v2038_v18 = vsel %vm1021_vm2, %v1995_v14, 0.0 }
 0xf6a   : > { %v2039_v22 = vadd.f32 %v2038_v18, %v2037_v19 }
 0xf6c   : > { %v2014_v17 = vpop.f32.mrf.mxu2 }
 0xf6d   : > { %v2040_v20 = vsel %vm1021_vm2, %v2014_v17, 0.0 }
 0xf6e   : > { %v2041_v23 = vadd.f32 %v2040_v20, %v2039_v22 }
 0xf70   : > { %v1997_v46 = vpop.f32.mrf.mxu1 }
 0xf74   : > { %v2016_v55 = vpop.f32.mrf.mxu2 }
 0xf75   : > { %v2033_v24 = vpop.f32.mrf.mxu3 }
 0xf76   : > { %v2042_v25 = vsel %vm1021_vm2, %v2033_v24, 0.0 }
 0xf77   : > { %v2043_v26 = vadd.f32 %v2042_v25, %v2041_v23 }
 0xf78   : > { %v2151_v27 = vpop.f32.mrf.mxu1 }
 0xf79   : > { %v2049_v28 = vadd.f32 %v3148_v0, %v2043_v26  ;;  %v2161_v29 = vpack.c.bf16 %v2151_v27, %v2151_v27 }
 0xf7b   : > { %v2195_v30 = vsel %vm647_vm1, %v2161_v29, 0  ;;  %v2050_v31 = vadd.f32 %v2049_v28, %v3896_v6 }
 0xf7c   : > { %v2177_v33 = vpop.f32.mrf.mxu2  ;;  %2204 = vmatpush.bf16.xpose.msra.mxu3 %v2195_v30 }
 0xf7d   : > { %v2035_v34 = vpop.f32.mrf.mxu3  ;;  %v2187_v35 = vpack.c.bf16 %v2177_v33, %v2177_v33  ;;  %v2051_v36 = vsel %vm1021_vm2, %v2050_v31, 0.0 }
 0xf7e   : > { %2052 = vadd.xlane.f32.xlu0 %v2051_v36 }
 0xf7f   : > { %v2319_v37 = vsel %vm654_vm0, %v2187_v35, 0 }
 0xf80   : > { %v2153_v38 = vpop.f32.mrf.mxu1  ;;  %2328 = vmatpush.bf16.msra.mxu2 %v2319_v37 }
 0xf81   : > { %v2162_v39 = vpack.c.bf16 %v2153_v38, %v2153_v38 }
 0xf83   : > { %v2214_v40 = vsel %vm647_vm1, %v2162_v39, 0 }
 0xf84   : > { %v2179_v42 = vpop.f32.mrf.mxu2  ;;  %2223 = vmatpush.bf16.xpose.msrb.mxu3 %v2214_v40 }
 0xf85   : > { %v2188_v46 = vpack.c.bf16 %v2179_v42, %v2179_v42 }
 0xf87   : > { %v2338_v22 = vsel %vm654_vm0, %v2188_v46, 0 }
 0xf88   : > { %v2156_v43 = vpop.f32.mrf.mxu1 }
 0xf89   : > { %v2163_v44 = vpack.c.bf16 %v2156_v43, %v2156_v43 }
 0xf8b   : > { %v2233_v6 = vsel %vm647_vm1, %v2163_v44, 0 }
 0xf8c   : > { %v2182_v45 = vpop.f32.mrf.mxu2  ;;  %2242 = vmatpush.bf16.xpose.msra.mxu0 %v2233_v6 }
 0xf8d   : > { %v2189_v12 = vpack.c.bf16 %v2182_v45, %v2182_v45 }
 0xf8f   : > { %v2357_v14 = vsel %vm654_vm0, %v2189_v12, 0 }
 0xf90   : > { %v2158_v47 = vpop.f32.mrf.mxu1 }
 0xf91   : > { %v2164_v49 = vpack.c.bf16 %v2158_v47, %v2158_v47 }
 0xf93   : > { %v2252_v50 = vsel %vm647_vm1, %v2164_v49, 0 }
 0xf94   : > { %v2184_v51 = vpop.f32.mrf.mxu2  ;;  %2261 = vmatpush.bf16.xpose.msra.mxu1 %v2252_v50 }
 0xf95   : > { %v2190_v52 = vpack.c.bf16 %v2184_v51, %v2184_v51 }
 0xf97   : > { %v2376_v53 = vsel %vm654_vm0, %v2190_v52, 0 }
 0xf9c   : > { %2385 = vmatpush.bf16.msrb.mxu1 %v2376_v53 }
 0xff1   : > { %v2053_v54 = vpop.xlane.xlu0 %2052 }
 0xff2   : > { %v2054_v56 = vmul.f32 %v2053_v54, %v3750_v21 }
 0xff4   : > { %v2055_v57 = vsub.f32 %v2050_v31, %v2054_v56 }
 0xff6   : > { %v2056_v58 = vmul.f32 %v2055_v57, %v2055_v57 }
 0xff8   : > { %v2057_v59 = vsel %vm1021_vm2, %v2056_v58, 0.0 }
 0xff9   : > { %2058 = vadd.xlane.f32.xlu1 %v2057_v59 }
0x106c   : > { %v2059_v60 = vpop.xlane.xlu1 %2058 }
0x106d   : > { %v2060_v61 = vmul.f32 %v2059_v60, %v3750_v21 }
0x106f   : > { %v2061_v62 = vadd.f32 1e-05, %v2060_v61 }
0x1071   : > { %3215 = vrsqrt.f32 %v2061_v62  ;;  %vm2068_vm15 = vweird.f32 %v2061_v62 }
0x1077   : > { %v3216_v63 = vpop.eup %3215 }
0x1078   : > { %v2063_v1 = vmul.f32 %v3216_v63, %v2061_v62  ;;  %vm2069_vm14 = vweird.f32 %v3216_v63 }
0x1079   : > { %vm2070_vm3 = vmor %vm2068_vm15, %vm2069_vm14 }
0x107a   : > { %v2064_v2 = vmul.f32 %v3216_v63, %v2063_v1 }
0x107c   : > { %v2065_v3 = vmul.f32 0.5, %v2064_v2 }
0x107e   : > { %v2066_v4 = vsub.f32 1.5, %v2065_v3 }
0x1080   : > { %v2067_v5 = vmul.f32 %v3216_v63, %v2066_v4 }
0x1082   : > { %v2071_v8 = vsel %vm2070_vm3, %v3216_v63, %v2067_v5 }
0x1083   : > { %v2072_v9 = vmul.f32 %v2071_v8, %v2055_v57 }
0x1085   : > { %v2078_v48 = vmul.f32 %v3149_v7, %v2072_v9 }
0x1087   : > { %v4007_v11 = vadd.f32 %v3150_v10, %v2078_v48 }
0x1089   : > { %2092 = vrot.lane.b32.xlu1 %v4007_v11, %s3442_s15  ;;  %2089 = vrot.lane.b32.xlu0 %v4007_v11, %s3443_s14  ;;  %s3036_s14 = sshll.u32 %s3549_s25, 3 }
0x108a   : > { %2086 = vrot.lane.b32.xlu2 %v4007_v11, %s3441_s30  ;;  %s2703_s22 = scalar_lea.hbm %s4183_s13, %s3036_s14  ;;  %s2693_s30 = scalar_lea.sflag [#allocation4], %s3632_s17 }
0x108b   : > { %s2707_s20 = sshll.u32 %s2703_s22, 4  ;;  %s2708_s20 = int_to_ptr.hbm [resolvable:$true] %s2707_s20 }
0x108c   : > { %s3372_s25 = sshra.s32 %s2708_s20, 4  ;;  %s3373_s25 = int_to_ptr.hbm [resolvable:$true] %s3372_s25 }
0x108d   : > { %s3374_s15 = scalar_lea.hbm %s3373_s25, 8  ;;  %p3379_p8 = scmp.lt.s32.totalorder %s3373_s25, %s4183_s13 }
0x108e   : > { %p3375_p1 = scmp.ne.s32.totalorder %s3373_s25, %s3374_s15  ;;  %p3380_p7 = scmp.lt.s32.totalorder %s3378_s27, %s3374_s15 }
0x1090   : > { %p3376_p5 = pnand %p3375_p1, %p3601_p13  ;;  %p3381_p9 = por %p3380_p7, %p3379_p8 }
0x1092   : > { %p3377_p12 = pneg %p3376_p5 }
0x1094   : > { %p3382_p10 = pnand %p3381_p9, %p3377_p12 }
0x10e4   : > { %v2087_v41 = vpop.permute.xlu2 %2086 }
0x10e5   : > { %v2095_v13 = vpack.c.bf16 %v2087_v41, %v4007_v11 }
0x10e7   : > { %2962 = vmatmul.msk.bf16.vlgmr.msrb.gmra.mxu0 %vm647_vm1, %v2095_v13 }
0x10e8   : > { %2366 = vmatpush.bf16.msrb.mxu0 %v2357_v14 }
0x10fb   : > { %v2093_v15 = vpop.permute.xlu1 %2092  ;;  %v2090_v16 = vpop.permute.xlu0 %2089 }
0x10fc   : > { %v2096_v17 = vpack.c.bf16 %v2093_v15, %v2090_v16 }
0x10fe   : > { %2963 = vmatmul.msk.bf16.gmra.mxu0 %vm647_vm1, %v2096_v17 }
0x1164   : > { %v2121_v18 = vpop.f32.mrf.mxu0 }
0x1165   : > { %v2131_v19 = vmul.f32 0.17677669, %v2121_v18 }
0x1167   : > { %v2135_v20 = vpack.c.bf16 %v2131_v19, %v2131_v19 }
0x1169   : > { %2968 = vmatmul.msk.bf16.vlgmr.msra.gmra.mxu3 %vm647_vm1, %v2135_v20 }
0x116a   : > { %2347 = vmatpush.bf16.msra.mxu3 %v2338_v22  ;;  %v2976_v22 = vld [vmem:[%s4149_s5 + $0x30] sm:$0xf] }
0x116c   : > { %v2123_v55 = vpop.f32.mrf.mxu0 }
0x116d   : > { %v2132_v23 = vmul.f32 0.17677669, %v2123_v55  ;;  %v2404_v55 = vsel %vm654_vm0, %v2976_v22, 0 }
0x116e   : > { %2413 = vmatpush.bf16.msrb.mxu2 %v2404_v55  ;;  %v3048_v55 = vld [vmem:[%s4155_s11 + $0x28] sm:$0xff] }
0x116f   : > { %v2136_v24 = vpack.c.bf16 %v2132_v23, %v2132_v23  ;;  %v2978_v23 = vld [vmem:[%s4149_s5 + $0x38] sm:$0xf] }
0x1179   : > { %2969 = vmatmul.msk.bf16.vlgmr.msrb.gmra.mxu3 %vm647_vm1, %v2136_v24  ;;  %v2442_v24 = vsel %vm654_vm0, %v2978_v23, 0  ;;  %v3047_v23 = vld [vmem:[%s4155_s11 + $0x20] sm:$0xff] }
0x117b   : > { %v2126_v0 = vpop.f32.mrf.mxu0 }
0x117c   : > { %v2133_v25 = vmul.f32 0.17677669, %v2126_v0  ;;  %v2977_v0 = vld [vmem:[%s4149_s5 + $0x34] sm:$0xf] }
0x117e   : > { %v2137_v26 = vpack.c.bf16 %v2133_v25, %v2133_v25  ;;  %v2423_v25 = vsel %vm654_vm0, %v2977_v0, 0 }
0x117f   : > { %2432 = vmatpush.bf16.msrb.mxu3 %v2423_v25 }
0x1180   : > { %2970 = vmatmul.msk.bf16.vlgmr.msra.gmra.mxu0 %vm647_vm1, %v2137_v26  ;;  %v2979_v26 = vld [vmem:[%s4149_s5 + $0x3c] sm:$0xf] }
0x1181   : > { %2451 = vmatpush.bf16.msra.mxu0 %v2442_v24  ;;  %v3154_v24 = vld [vmem:[%s4154_s10 + $0x1] ss:$0 sm:$0xff] }
0x1183   : > { %v2128_v27 = vpop.f32.mrf.mxu0 }
0x1184   : > { %v2134_v28 = vmul.f32 0.17677669, %v2128_v27  ;;  %v2461_v27 = vsel %vm654_vm0, %v2979_v26, 0 }
0x1186   : > { %v2138_v29 = vpack.c.bf16 %v2134_v28, %v2134_v28 }
0x1188   : > { %2971 = vmatmul.msk.bf16.vlgmr.msra.gmra.mxu1 %vm647_vm1, %v2138_v29 }
0x1189   : > { %2470 = vmatpush.bf16.msra.mxu1 %v2461_v27 }
0x11ec   : > { %v2206_v30 = vpop.f32.mrf.mxu3 }
0x11ed   : > { %v2207_v31 = vadd.f32 %v2206_v30, %v3813_v32 }
0x11ef   : > { %v2267_v33 = vsel %vm647_vm1, %v2207_v31, -inf }
0x11f0   : > { %2268 = vmax.xlane.f32.xlu0 %v2267_v33 }
0x11f4   : > { %v2208_v34 = vpop.f32.mrf.mxu3 }
0x11fc   : > { %v2225_v35 = vpop.f32.mrf.mxu3 }
0x11fd   : > { %v2226_v36 = vadd.f32 %v2225_v35, %v3813_v32  ;;  %v2244_v37 = vpop.f32.mrf.mxu0 }
0x11fe   : > { %v2245_v38 = vadd.f32 %v2244_v37, %v3813_v32 }
0x11ff   : > { %v2270_v39 = vsel %vm647_vm1, %v2226_v36, -inf }
0x1200   : > { %2271 = vmax.xlane.f32.xlu2 %v2270_v39  ;;  %v2273_v40 = vsel %vm647_vm1, %v2245_v38, -inf }
0x1201   : > { %2274 = vmax.xlane.f32.xlu1 %v2273_v40 }
0x1204   : > { %v2227_v42 = vpop.f32.mrf.mxu3 }
0x1205   : > { %v2246_v43 = vpop.f32.mrf.mxu0  ;;  %v2263_v44 = vpop.f32.mrf.mxu1 }
0x1206   : > { %v2264_v6 = vadd.f32 %v2263_v44, %v3813_v32 }
0x1208   : > { %v2276_v45 = vsel %vm647_vm1, %v2264_v6, -inf }
0x1209   : > { %2277 = vmax.xlane.f32.xlu2 %v2276_v45 }
0x120d   : > { %v2265_v47 = vpop.f32.mrf.mxu1 }
0x1263   : > { %v2269_v49 = vpop.xlane.xlu0 %2268 }
0x1264   : > { %v2279_v50 = vsub.f32 %v2207_v31, %v2269_v49 }
0x1266   : > { %v2283_v51 = vmul.f32 1.442695, %v2279_v50 }
0x1268   : > { %3217 = vpow2.f32 %v2283_v51 }
0x126e   : > { %v3218_v52 = vpop.eup %3217 }
0x126f   : > { %v2291_v53 = vsel %vm647_vm1, %v3218_v52, 0.0 }
0x1270   : > { %2292 = vadd.xlane.f32.xlu0 %v2291_v53 }
0x1273   : > { %v2272_v54 = vpop.xlane.xlu2 %2271 }
0x1274   : > { %v2280_v56 = vsub.f32 %v2226_v36, %v2272_v54  ;;  %v2275_v57 = vpop.xlane.xlu1 %2274  ;;  %v3151_v54 = vld [vmem:[#allocation5 + $0x3] ss:$0 sm:$0xff] }
0x1275   : > { %v2281_v58 = vsub.f32 %v2245_v38, %v2275_v57 }
0x1276   : > { %v2285_v59 = vmul.f32 1.442695, %v2280_v56 }
0x1277   : > { %v2287_v60 = vmul.f32 1.442695, %v2281_v58 }
0x1278   : > { %3219 = vpow2.f32 %v2285_v59 }
0x1279   : > { %3221 = vpow2.f32 %v2287_v60 }
0x127c   : > { %v2278_v32 = vpop.xlane.xlu2 %2277 }
0x127d   : > { %v2282_v61 = vsub.f32 %v2264_v6, %v2278_v32 }
0x127e   : > { %v3220_v62 = vpop.eup %3219 }
0x127f   : > { %v3222_v63 = vpop.eup %3221  ;;  %v2289_v1 = vmul.f32 1.442695, %v2282_v61  ;;  %v2294_v2 = vsel %vm647_vm1, %v3220_v62, 0.0 }
0x1280   : > { %2295 = vadd.xlane.f32.xlu1 %v2294_v2  ;;  %v2297_v3 = vsel %vm647_vm1, %v3222_v63, 0.0 }
0x1281   : > { %3223 = vpow2.f32 %v2289_v1  ;;  %2298 = vadd.xlane.f32.xlu2 %v2297_v3 }
0x1287   : > { %v3224_v4 = vpop.eup %3223 }
0x1288   : > { %v2300_v5 = vsel %vm647_vm1, %v3224_v4, 0.0 }
0x1289   : > { %2301 = vadd.xlane.f32.xlu0 %v2300_v5  ;;  %v3050_v5 = vld [vmem:[%s4155_s11 + $0x38] sm:$0xff] }
0x12e3   : > { %v2293_v7 = vpop.xlane.xlu0 %2292 }
0x12e4   : > { %3225 = vrcp.f32 %v2293_v7 }
0x12ea   : > { %v3226_v8 = vpop.eup %3225 }
0x12eb   : > { %v2307_v9 = vmul.f32 %v3226_v8, %v3218_v52 }
0x12ed   : > { %v2311_v10 = vpack.c.bf16 %v2307_v9, %v2307_v9  ;;  %v3049_v9 = vld [vmem:[%s4155_s11 + $0x30] sm:$0xff] }
0x12ef   : > { %2972 = vmatmul.msk.bf16.vlgmr.msra.gmra.mxu2 %vm647_vm1, %v2311_v10 }
0x12f3   : > { %v2296_v48 = vpop.xlane.xlu1 %2295 }
0x12f4   : > { %3227 = vrcp.f32 %v2296_v48  ;;  %v2299_v12 = vpop.xlane.xlu2 %2298 }
0x12f5   : > { %3229 = vrcp.f32 %v2299_v12 }
0x12fa   : > { %v3228_v41 = vpop.eup %3227 }
0x12fb   : > { %v3230_v13 = vpop.eup %3229  ;;  %v2308_v14 = vmul.f32 %v3228_v41, %v3220_v62 }
0x12fc   : > { %v2309_v15 = vmul.f32 %v3230_v13, %v3222_v63  ;;  %v2302_v16 = vpop.xlane.xlu0 %2301 }
0x12fd   : > { %v2312_v17 = vpack.c.bf16 %v2308_v14, %v2308_v14  ;;  %3231 = vrcp.f32 %v2302_v16  ;;  %v3152_v16 = vld [vmem:[#allocation7 + $0x4] ss:$0 sm:$0xff] }
0x12fe   : > { %v2313_v18 = vpack.c.bf16 %v2309_v15, %v2309_v15 }
0x12ff   : > { %2973 = vmatmul.msk.bf16.vlgmr.msra.gmra.mxu3 %vm647_vm1, %v2312_v17 }
0x1300   : > { %2974 = vmatmul.msk.bf16.vlgmr.msrb.gmra.mxu0 %vm647_vm1, %v2313_v18  ;;  %2610 = vmatpush.bf16.msra.mxu3 %v3050_v5  ;;  %v3153_v18 = vld [vmem:[%s4152_s8 + $0x4] ss:$0 sm:$0xff] }
0x1303   : > { %v3232_v46 = vpop.eup %3231 }
0x1304   : > { %v2310_v19 = vmul.f32 %v3232_v46, %v3224_v4  ;;  %v3046_v4 = vld [vmem:[%s4153_s9 + $0x18] sm:$0xff]  ;;  %2611 = vmatpush.bf16.msra.mxu3 %v3049_v9 }
0x1305   : > { %2556 = vmatpush.bf16.msra.mxu2 %v3046_v4 }
0x1306   : > { %v2314_v20 = vpack.c.bf16 %v2310_v19, %v2310_v19 }
0x1308   : > { %2975 = vmatmul.msk.bf16.vlgmr.msrb.gmra.mxu1 %vm647_vm1, %v2314_v20  ;;  %2612 = vmatpush.bf16.msra.mxu3 %v3048_v55 }
0x130c   : > { %2613 = vmatpush.bf16.msra.mxu3 %v3047_v23 }
0x1372   : > { %v2330_v28 = vpop.f32.mrf.mxu2 }
0x1373   : > { %v2391_v29 = vpack.c.bf16 %v2330_v28, %v2330_v28 }
0x1375   : > { %2980 = vmatmul.msk.bf16.vlgmr.msrb.gmra.mxu2 %vm647_vm1, %v2391_v29  ;;  %v3155_v29 = vld [vmem:[%s4156_s12 + $0x1] ss:$0 sm:$0xff] }
0x137a   : > { %v2332_v30 = vpop.f32.mrf.mxu2 }
0x137d   : > { %v2368_v31 = vpop.f32.mrf.mxu0 }
0x137e   : > { %v2393_v33 = vpack.c.bf16 %v2368_v31, %v2368_v31 }
0x1380   : > { %2982 = vmatmul.msk.bf16.vlgmr.msra.gmra.mxu0 %vm647_vm1, %v2393_v33 }
0x1382   : > { %v2349_v34 = vpop.f32.mrf.mxu3 }
0x1383   : > { %v2392_v35 = vpack.c.bf16 %v2349_v34, %v2349_v34 }
0x1385   : > { %2981 = vmatmul.msk.bf16.vlgmr.msrb.gmra.mxu3 %vm647_vm1, %v2392_v35  ;;  %v2370_v36 = vpop.f32.mrf.mxu0  ;;  %v2387_v37 = vpop.f32.mrf.mxu1 }
0x1386   : > { %v2394_v38 = vpack.c.bf16 %v2387_v37, %v2387_v37 }
0x1388   : > { %2983 = vmatmul.msk.bf16.vlgmr.msra.gmra.mxu1 %vm647_vm1, %v2394_v38 }
0x138a   : > { %v2351_v39 = vpop.f32.mrf.mxu3 }
0x138d   : > { %v2389_v40 = vpop.f32.mrf.mxu1 }
0x13f8   : > { %v2415_v42 = vpop.f32.mrf.mxu2 }
0x13f9   : > { %v2476_v49 = vsel %vm1021_vm2, %v2415_v42, 0.0  ;;  %v3052_v42 = vld [vmem:[#allocation8 + $0x8] sm:$0xff] }
0x13fa   : > { %2684 = vmatpush.bf16.msrb.mxu0 %v3052_v42 }
0x13fd   : > { %v2453_v43 = vpop.f32.mrf.mxu0 }
0x13fe   : > { %v2479_v52 = vsel %vm1021_vm2, %v2453_v43, 0.0  ;;  %v3051_v43 = vld [vmem:[#allocation8] sm:$0xff] }
0x13ff   : > { %2685 = vmatpush.bf16.msrb.mxu0 %v3051_v43 }
0x1400   : > { %v2417_v44 = vpop.f32.mrf.mxu2 }
0x1405   : > { %v2455_v6 = vpop.f32.mrf.mxu0  ;;  %v2472_v45 = vpop.f32.mrf.mxu1 }
0x1406   : > { %v2481_v56 = vsel %vm1021_vm2, %v2472_v45, 0.0 }
0x1408   : > { %v2434_v47 = vpop.f32.mrf.mxu3 }
0x1409   : > { %v2477_v50 = vsel %vm1021_vm2, %v2434_v47, 0.0 }
0x140a   : > { %v2478_v51 = vadd.f32 %v2477_v50, %v2476_v49 }
0x140c   : > { %v2480_v53 = vadd.f32 %v2479_v52, %v2478_v51 }
0x140d   : > { %v2474_v57 = vpop.f32.mrf.mxu1 }
0x140e   : > { %v2482_v58 = vadd.f32 %v2481_v56, %v2480_v53  ;;  %v3157_v57 = vld [vmem:[%s4152_s8 + $0x5] ss:$0 sm:$0xff] }
0x1410   : > { %v2436_v59 = vpop.f32.mrf.mxu3  ;;  %v2488_v60 = vadd.f32 %v3151_v54, %v2482_v58  ;;  %v3156_v54 = vld [vmem:[#allocation7 + $0x5] ss:$0 sm:$0xff] }
0x1412   : > { %v2489_v32 = vadd.f32 %v2488_v60, %v4007_v11  ;;  %v3045_v11 = vld [vmem:[%s4153_s9 + $0x10] sm:$0xff] }
0x1413   : > { %2557 = vmatpush.bf16.msra.mxu2 %v3045_v11 }
0x1414   : > { %v2490_v61 = vsel %vm1021_vm2, %v2489_v32, 0.0 }
0x1415   : > { %2491 = vadd.xlane.f32.xlu1 %v2490_v61 }
0x1488   : > { %v2492_v62 = vpop.xlane.xlu1 %2491 }
0x1489   : > { %v2493_v63 = vmul.f32 %v2492_v62, %v3750_v21 }
0x148b   : > { %v2494_v1 = vsub.f32 %v2489_v32, %v2493_v63  ;;  %v3158_v32 = vld [vmem:[%s4184_s29] ss:$0 sm:$0xff] }
0x148d   : > { %v2495_v2 = vmul.f32 %v2494_v1, %v2494_v1 }
0x148f   : > { %v2496_v3 = vsel %vm1021_vm2, %v2495_v2, 0.0 }
0x1490   : > { %2497 = vadd.xlane.f32.xlu2 %v2496_v3 }
0x1503   : > { %v2498_v7 = vpop.xlane.xlu2 %2497 }
0x1504   : > { %v2499_v8 = vmul.f32 %v2498_v7, %v3750_v21 }
0x1506   : > { %v2500_v10 = vadd.f32 1e-05, %v2499_v8 }
0x1508   : > { %3233 = vrsqrt.f32 %v2500_v10  ;;  %vm2507_vm1 = vweird.f32 %v2500_v10 }
0x150e   : > { %v3234_v48 = vpop.eup %3233 }
0x150f   : > { %v2502_v12 = vmul.f32 %v3234_v48, %v2500_v10  ;;  %vm2508_vm0 = vweird.f32 %v3234_v48 }
0x1510   : > { %vm2509_vm4 = vmor %vm2507_vm1, %vm2508_vm0 }
0x1511   : > { %v2503_v41 = vmul.f32 %v3234_v48, %v2502_v12 }
0x1513   : > { %v2504_v13 = vmul.f32 0.5, %v2503_v41 }
0x1515   : > { %v2505_v14 = vsub.f32 1.5, %v2504_v13 }
0x1517   : > { %v2506_v15 = vmul.f32 %v3234_v48, %v2505_v14 }
0x1519   : > { %v2510_v17 = vsel %vm2509_vm4, %v3234_v48, %v2506_v15 }
0x151a   : > { %v2511_v46 = vmul.f32 %v2510_v17, %v2494_v1 }
0x151c   : > { %v2517_v19 = vmul.f32 %v3152_v16, %v2511_v46 }
0x151e   : > { %v2523_v20 = vadd.f32 %v3153_v18, %v2517_v19 }
0x1520   : > { %v2524_v22 = vpack.c.bf16 %v2523_v20, %v2523_v20 }
0x1522   : > { %2998 = vmatmul.msk.bf16.vlgmr.msra.gmra.mxu2 %vm1021_vm2, %v2524_v22 }
0x15a5   : > { %v2559_v0 = vpop.f32.mrf.mxu2 }
0x15a6   : > { %v2560_v25 = vadd.f32 %v3154_v24, %v2559_v0 }
0x15a8   : > { %v2563_v26 = vmax.f32 %v2560_v25, 0.0 }
0x15aa   : > { %v2564_v27 = vpack.c.bf16 %v2563_v26, %v2563_v26 }
0x15ac   : > { %3024 = vmatmul.msk.bf16.vlgmr.msra.gmra.mxu3 %vm1594_vm10, %v2564_v27 }
0x15ad   : > { %v2561_v28 = vpop.f32.mrf.mxu2 }
0x162f   : > { %v2615_v30 = vpop.f32.mrf.mxu3 }
0x1630   : > { %v2616_v31 = vadd.f32 %v3155_v29, %v2615_v30 }
0x1632   : > { %v2619_v33 = vadd.f32 %v2616_v31, %v2523_v20 }
0x1634   : > { %v2620_v34 = vsel %vm1021_vm2, %v2619_v33, 0.0 }
0x1635   : > { %2621 = vadd.xlane.f32.xlu0 %v2620_v34 }
0x1637   : > { %v2617_v35 = vpop.f32.mrf.mxu3 }
0x16a8   : > { %v2622_v36 = vpop.xlane.xlu0 %2621 }
0x16a9   : > { %v2623_v37 = vmul.f32 %v2622_v36, %v3750_v21 }
0x16ab   : > { %v2624_v38 = vsub.f32 %v2619_v33, %v2623_v37 }
0x16ad   : > { %v2625_v39 = vmul.f32 %v2624_v38, %v2624_v38 }
0x16af   : > { %v2626_v40 = vsel %vm1021_vm2, %v2625_v39, 0.0 }
0x16b0   : > { %2627 = vadd.xlane.f32.xlu1 %v2626_v40 }
0x1723   : > { %v2628_v44 = vpop.xlane.xlu1 %2627 }
0x1724   : > { %v2629_v6 = vmul.f32 %v2628_v44, %v3750_v21 }
0x1726   : > { %v2630_v45 = vadd.f32 1e-05, %v2629_v6 }
0x1728   : > { %3235 = vrsqrt.f32 %v2630_v45  ;;  %vm2637_vm6 = vweird.f32 %v2630_v45 }
0x172e   : > { %v3236_v47 = vpop.eup %3235 }
0x172f   : > { %v2632_v49 = vmul.f32 %v3236_v47, %v2630_v45  ;;  %vm2638_vm5 = vweird.f32 %v3236_v47 }
0x1730   : > { %vm2639_vm7 = vmor %vm2637_vm6, %vm2638_vm5 }
0x1731   : > { %v2633_v50 = vmul.f32 %v3236_v47, %v2632_v49 }
0x1733   : > { %v2634_v51 = vmul.f32 0.5, %v2633_v50 }
0x1735   : > { %v2635_v52 = vsub.f32 1.5, %v2634_v51 }
0x1737   : > { %v2636_v53 = vmul.f32 %v3236_v47, %v2635_v52 }
0x1739   : > { %v2640_v56 = vsel %vm2639_vm7, %v3236_v47, %v2636_v53 }
0x173a   : > { %v2641_v21 = vmul.f32 %v2640_v56, %v2624_v38 }
0x173c   : > { %v2647_v58 = vmul.f32 %v3156_v54, %v2641_v21 }
0x173e   : > { %v2653_v59 = vadd.f32 %v3157_v57, %v2647_v58 }
0x1740   : > { %v2654_v60 = vpack.c.bf16 %v2653_v59, %v2653_v59 }
0x1742   : > { %3034 = vmatmul.msk.bf16.vlgmr.msrb.gmra.mxu0 %vm1021_vm2, %v2654_v60 }
0x17bf   : > { %v2687_v61 = vpop.f32.mrf.mxu0 }
0x17c0   : > { %v2688_v62 = vadd.f32 %v3158_v32, %v2687_v61 }
0x17c2   : > { %2691 = vst [vmem:[%s600_s24] sm:$0xff] %v2688_v62 }
0x17c3   : > { %3385 = shalt.err (!%p3382_p10)
}
0x17c4   : > { %3067 = dma.vmem_to_hbm [thread:$0]  (%p3601_p13), %s2706_s26, 128, %s2708_s20, %s2693_s30  }
0x17c7   : > { %v2689_v63 = vpop.f32.mrf.mxu0 }
0x17c8 PF: > { %s2719_s22 = sand.u32 1, %s3420_s18   ;;  %p4186_p11 = scmp.ge.s32.totalorder %s3432_s21, 2 }
0x17c9   : > { %s2720_s23 = scalar_lea.sflag [#allocation4], %s2719_s22 }
0x17ca   : > { %p3084_p0 = pnand %p4186_p11, %p3606_p4 }
0x17cc   : > { %p3085_p2 = pneg %p3084_p0 }
0x17ce   : > { %3415 = dma.done.wait (%p3085_p2), %s2720_s23, 128  }
0x17cf   : > { %3417 = vsyncadd (%p3085_p2), %s2720_s23, 4294967168  ;;  %s4187_s21 = sld [smem:[#allocation16_spill]]  ;;  %s4190_s18 = smov %s3424_s19 }
0x17d0   : > { %s4188_s29 = sld [smem:[#allocation15_spill]] }
0x17d1   : > { %s4189_s20 = sld [smem:[#allocation17_spill]] }
0x17d5   : > { %p30_p6 = scmp.ge.s32.totalorder %s4187_s21, 4  }
0x17d6   : > { %s4191_s19 = smov %s4188_s29 }
0x17d7   :  { %32 = sbr.rel (!%p30_p6) target bundleno = 13 (0xd), region = 177 }
0x17dc   :  { %2726 = vsyncpa [#allocation3], 1 }
0x17dd   :  { %2728 = vsyncpa [#allocation3 + $0x1], 1 }
0x17de   :  { %2729 = vsyncpa [#allocation6], 1 }
0x17df   :  { %2730 = vsyncpa [#allocation9], 1 }
0x17e0   :  { %2731 = vsyncpa [#allocation4], 1 }
0x17e1   :  { %2733 = vsyncpa [#allocation4 + $0x1], 1 }

</bundles_post_ra>
